<compile_context>
chip_gen: v6e
topology: v6e:2x2x1
jax: 0.10.0
libtpu: 0.0.40
codegen_flags: <defaults>
</compile_context>

<pallas_src>
import jax
import jax.numpy as jnp
from jax import lax
from jax.experimental import pallas as pl
from jax.experimental.pallas import tpu as pltpu

# ---- static sizes -----------------------------------------------------------
L = 16                      # sequence length (L % POOL_OUT == 0)
B_TILE = 8                  # patients per grid step -> B_TILE*L = 128 lanes
BLT = B_TILE * L            # 128 lanes per tile (full vreg width)
OUT_LANES = 128             # lane-dense output block per tile
POOL_OUT = 4                # AdaptiveAvgPool1d(4)
BIN = L // POOL_OUT
C1, C2, C3 = 32, 64, 128
FEAT = C3 * POOL_OUT        # 512 per branch
H1, H2, H3 = 128, 64, 32    # fc1 / fc2 / fc3 widths


# ---------------------------------------------------------------------------
# Fused kernel: conv stack (both branches) -> pool+fc1 -> MLP head -> sigmoid.
# Activations: (channels, B_TILE*L); MLP: (features, B_TILE).
# ---------------------------------------------------------------------------
def fused_kernel(x_ref, bmask_ref, w1t_ref, b1c_ref, w2k_ref, b2_ref,
                 w3k_ref, b3_ref, psel_ref, w1cat_ref, b1f_ref,
                 w2f_ref, b2f_ref, w3f_ref, b3f_ref, wo_ref, bo_ref, out_ref):
    f32, bf16 = jnp.float32, jnp.bfloat16
    mprev = bmask_ref[0:1, :]        # 0 where t % L == 0     (no "previous" pos)
    mnext = bmask_ref[1:2, :]        # 0 where t % L == L - 1 (no "next" pos)

    def shifted(h):                  # conv padding=1 halo: XLU roll + VPU mask
        hp = pltpu.roll(h, 1, 1) * mprev          # h[:, t-1], zero at seg start
        hn = pltpu.roll(h, BLT - 1, 1) * mnext    # h[:, t+1], zero at seg end
        return hp, hn

    # --- conv1 (Cin=1 per branch): VPU broadcast FMAs, both branches at once --
    x = x_ref[...]                                    # (2, BLT): vitals / labs
    xp, xn = shifted(x)
    w1t = w1t_ref[...]                                # (2, C1, 3)
    y = (w1t[:, :, 0:1] * xp[:, None, :]              # tap k=0 -> x[t-1]
         + w1t[:, :, 1:2] * x[:, None, :]             # tap k=1 -> x[t]
         + w1t[:, :, 2:3] * xn[:, None, :]            # tap k=2 -> x[t+1]
         + b1c_ref[...])                              # (2, C1, BLT)
    h = jnp.maximum(y, 0.0).reshape(2 * C1, BLT)      # leading-dim merge

    # --- conv2 / conv3: three accumulating per-tap block-diag MXU matmuls -----
    def conv_taps(h, wk_ref, b_ref):
        hp, hn = shifted(h)
        acc = (jnp.dot(wk_ref[0], hp.astype(bf16), preferred_element_type=f32)
               + jnp.dot(wk_ref[1], h.astype(bf16), preferred_element_type=f32)
               + jnp.dot(wk_ref[2], hn.astype(bf16), preferred_element_type=f32)
               + b_ref[...])
        return jnp.maximum(acc, 0.0)

    h = conv_taps(h, w2k_ref, b2_ref)                 # (2*C2, BLT)
    h = conv_taps(h, w3k_ref, b3_ref)                 # (2*C3, BLT)

    # --- pool(4) + flatten + cat + fc1: 4 selector dots -> sublane stack ------
    # --- -> one big-K fc1 dot --------------------------------------------------
    hb = h.astype(bf16)
    pooled = [jnp.dot(hb, psel_ref[p], preferred_element_type=f32)
              for p in range(POOL_OUT)]               # 4 x (2*C3, B_TILE)
    stacked = jnp.concatenate(pooled, axis=0).astype(bf16)   # (4*2*C3, B_TILE)
    h = jnp.dot(w1cat_ref[...], stacked, preferred_element_type=f32) + b1f_ref[...]
    h = jnp.maximum(h, 0.0)                           # (H1, B_TILE)
    # TODO(synk): Dropout(0.3) eval-mode identity; training-mode masking not implemented.

    # --- fc2 -> fc3 -> output -> sigmoid (features on sublanes, batch on lanes)
    h = jnp.maximum(jnp.dot(w2f_ref[...], h.astype(bf16),
                            preferred_element_type=f32) + b2f_ref[...], 0.0)
    h = jnp.maximum(jnp.dot(w3f_ref[...], h.astype(bf16),
                            preferred_element_type=f32) + b3f_ref[...], 0.0)
    logit = jnp.dot(wo_ref[...], h.astype(bf16),
                    preferred_element_type=f32) + bo_ref[...]      # (1, B_TILE)
    sig = 1.0 / (1.0 + jnp.exp(-logit))

    # Lane-dense (1,128) block so the HBM writeback is an unmasked store.
    out_ref[...] = jnp.zeros((1, OUT_LANES), f32)
    out_ref[:, :B_TILE] = sig


# ---------------------------------------------------------------------------
# Wrapper: fold batch onto lanes in tiles of B_TILE, grid over batch tiles.
# ---------------------------------------------------------------------------
def cnn_model_pallas(vitals, labs, kernel_params):
    b_real = vitals.shape[0]
    pad = (-b_real) % B_TILE
    if pad:
        zeros = jnp.zeros((pad, L), vitals.dtype)
        vitals = jnp.concatenate([vitals, zeros], axis=0)
        labs = jnp.concatenate([labs, zeros], axis=0)
    b_pad = b_real + pad
    nt = b_pad // B_TILE                              # batch tiles (grid size)

    # lane index within a tile = b_local * L + t
    x_both = jnp.stack([vitals.reshape(-1), labs.reshape(-1)],
                       axis=0).astype(jnp.float32)    # (2, b_pad*L)

    def full_spec(a):
        nd = a.ndim
        return pl.BlockSpec(a.shape, lambda i, _nd=nd: (0,) * _nd)

    in_specs = [pl.BlockSpec((2, BLT), lambda i: (0, i))]   # batch-tiled input
    in_specs += [full_spec(a) for a in kernel_params]       # tile-invariant weights

    out = pl.pallas_call(
        fused_kernel,
        out_shape=jax.ShapeDtypeStruct((1, nt * OUT_LANES), jnp.float32),
        grid_spec=pltpu.PrefetchScalarGridSpec(
            num_scalar_prefetch=0,
            grid=(nt,),
            in_specs=in_specs,
            out_specs=pl.BlockSpec((1, OUT_LANES), lambda i: (0, i)),
        ),
        compiler_params=pltpu.CompilerParams(
            dimension_semantics=("parallel",),        # v7x: batch tiles across TCs
            vmem_limit_bytes=32 * 1024 * 1024,        # footprint ~4 MiB, huge headroom
        ),
    )(x_both, *kernel_params)

    out = out.reshape(nt, OUT_LANES)[:, :B_TILE].reshape(b_pad, 1)
    return out[:b_real]


# ---------------------------------------------------------------------------
# Host-side parameter preparation (pure weight re-layout, done once).
# ---------------------------------------------------------------------------
def prepare_kernel_params(tp):
    (w1v, b1v), (w2v, b2v), (w3v, b3v) = tp["vit"]
    (w1l, b1l), (w2l, b2l), (w3l, b3l) = tp["lab"]
    (fw1, fb1), (fw2, fb2), (fw3, fb3), (fw4, fb4) = tp["fcs"]
    bf16 = jnp.bfloat16

    # Segment-boundary masks for the roll-based halo (same for every lane tile).
    t = jnp.arange(BLT)
    mprev = (t % L != 0).astype(jnp.float32)
    mnext = (t % L != L - 1).astype(jnp.float32)
    bmask = jnp.stack([mprev, mnext], axis=0)                    # (2, BLT)

    # conv1 taps / biases per branch (VPU path, f32).
    w1t = jnp.stack([w1v[:, 0, :], w1l[:, 0, :]], axis=0)        # (2, C1, 3)
    b1c = jnp.stack([b1v.reshape(C1, 1), b1l.reshape(C1, 1)], axis=0)

    # Per-tap block-diagonal conv weights, both branches fused, bf16 MXU operands.
    def blockdiag_taps(wv, wl):
        cout, cin, kk = wv.shape
        W = jnp.zeros((kk, 2 * cout, 2 * cin), jnp.float32)
        W = W.at[:, :cout, :cin].set(jnp.transpose(wv, (2, 0, 1)))
        W = W.at[:, cout:, cin:].set(jnp.transpose(wl, (2, 0, 1)))
        return W.astype(bf16)

    w2k = blockdiag_taps(w2v, w2l)                               # (3, 2*C2, 2*C1)
    b2c = jnp.concatenate([b2v, b2l]).reshape(2 * C2, 1)
    w3k = blockdiag_taps(w3v, w3l)                               # (3, 2*C3, 2*C2)
    b3c = jnp.concatenate([b3v, b3l]).reshape(2 * C3, 1)

    # Pool selectors: psel[p, b_local*L + t, b_local] = 1/BIN if t in bin p.
    q = jnp.arange(BLT)
    psel = jnp.zeros((POOL_OUT, BLT, B_TILE), jnp.float32)
    psel = psel.at[(q % L) // BIN, q, q // L].set(1.0 / BIN)
    psel = psel.astype(bf16)

    # fc1 remapped to the stacked-pool layout:
    #   stacked row = p*(2*C3) + br*C3 + c  <->  torch col = br*FEAT + c*4 + p.
    w1cat = jnp.zeros((H1, POOL_OUT * 2 * C3), jnp.float32)
    for br in range(2):
        blk = fw1[:, br * FEAT:(br + 1) * FEAT].reshape(H1, C3, POOL_OUT)
        for p in range(POOL_OUT):
            col = p * 2 * C3 + br * C3
            w1cat = w1cat.at[:, col:col + C3].set(blk[:, :, p])
    w1cat = w1cat.astype(bf16)

    return (bmask, w1t, b1c, w2k, b2c, w3k, b3c, psel, w1cat,
            fb1.reshape(H1, 1), fw2.astype(bf16), fb2.reshape(H2, 1),
            fw3.astype(bf16), fb3.reshape(H3, 1),
            fw4.astype(bf16), fb4.reshape(1, 1))


# ---------------------------------------------------------------------------
# Deterministic parameter init (PyTorch default-style uniform bounds).
# ---------------------------------------------------------------------------
def _uniform(key, shape, fan_in):
    bound = 1.0 / jnp.sqrt(jnp.float32(fan_in))
    return jax.random.uniform(key, shape, jnp.float32, -bound, bound)


def init_params(key):
    keys = jax.random.split(key, 20)
    k = iter(keys)

    def conv_p(cin, cout):
        w = _uniform(next(k), (cout, cin, 3), cin * 3)    # torch (O, I, K)
        b = _uniform(next(k), (cout,), cin * 3)
        return w, b

    def lin_p(fin, fout):
        w = _uniform(next(k), (fout, fin), fin)           # torch (out, in)
        b = _uniform(next(k), (fout,), fin)
        return w, b

    return {
        "vit": [conv_p(1, C1), conv_p(C1, C2), conv_p(C2, C3)],
        "lab": [conv_p(1, C1), conv_p(C1, C2), conv_p(C2, C3)],
        "fcs": [lin_p(2 * FEAT, H1), lin_p(H1, H2), lin_p(H2, H3), lin_p(H3, 1)],
    }


# ---------------------------------------------------------------------------
# Pure-JAX reference (mirrors the PyTorch module, eval mode, f32).
# ---------------------------------------------------------------------------
def _ref_branch(x, convs):
    b = x.shape[0]
    h = x[:, None, :].astype(jnp.float32)                 # (B, 1, L) NCW
    for (w, b_) in convs:
        h = lax.conv_general_dilated(h, w, window_strides=(1,),
                                     padding=((1, 1),),
                                     dimension_numbers=("NCH", "OIH", "NCH"))
        h = jax.nn.relu(h + b_[None, :, None])
    h = h.reshape(b, C3, POOL_OUT, BIN).mean(-1)          # adaptive avg pool(4)
    return h.reshape(b, FEAT)                             # torch .view flatten


def cnn_model_ref(vitals, labs, tp):
    v = _ref_branch(vitals, tp["vit"])
    l = _ref_branch(labs, tp["lab"])
    h = jnp.concatenate([v, l], axis=1)
    for i, (w, b) in enumerate(tp["fcs"]):
        h = h @ w.T + b
        h = jax.nn.relu(h) if i < 3 else jax.nn.sigmoid(h)
    return h


if __name__ == "__main__":
    B = 16                                                # 2 batch tiles of 8
    key = jax.random.PRNGKey(0)
    k_vit, k_lab, k_par = jax.random.split(key, 3)
    vitals = jax.random.normal(k_vit, (B, L), jnp.float32)
    labs = jax.random.normal(k_lab, (B, L), jnp.float32)

    torch_style = init_params(k_par)
    kernel_params = prepare_kernel_params(torch_style)

    out = cnn_model_pallas(vitals, labs, kernel_params)
    out = jax.block_until_ready(out)

    ref = cnn_model_ref(vitals, labs, torch_style)
    assert out.shape == (B, 1), out.shape
    assert bool(jnp.all(jnp.isfinite(out)))
    # bf16 MXU operands (f32 accumulate) -> loosened tolerance vs f32 reference.
    err = float(jnp.max(jnp.abs(out - ref)))
    assert err < 5e-2, (err, out, ref)

    print("KERNEL_OK")
</pallas_src>

<mosaic_0001>
module attributes {stable_mosaic.version = 11 : i64} {
  func.func @fused_kernel(%arg0: i32, %arg1: memref<2x128xf32, #tpu.memory_space<vmem>>, %arg2: memref<2x128xf32, #tpu.memory_space<vmem>>, %arg3: memref<2x32x3xf32, #tpu.memory_space<vmem>>, %arg4: memref<2x32x1xf32, #tpu.memory_space<vmem>>, %arg5: memref<3x128x64xbf16, #tpu.memory_space<vmem>>, %arg6: memref<128x1xf32, #tpu.memory_space<vmem>>, %arg7: memref<3x256x128xbf16, #tpu.memory_space<vmem>>, %arg8: memref<256x1xf32, #tpu.memory_space<vmem>>, %arg9: memref<4x128x8xbf16, #tpu.memory_space<vmem>>, %arg10: memref<128x1024xbf16, #tpu.memory_space<vmem>>, %arg11: memref<128x1xf32, #tpu.memory_space<vmem>>, %arg12: memref<64x128xbf16, #tpu.memory_space<vmem>>, %arg13: memref<64x1xf32, #tpu.memory_space<vmem>>, %arg14: memref<32x64xbf16, #tpu.memory_space<vmem>>, %arg15: memref<32x1xf32, #tpu.memory_space<vmem>>, %arg16: memref<1x32xbf16, #tpu.memory_space<vmem>>, %arg17: memref<1x1xf32, #tpu.memory_space<vmem>>, %arg18: memref<1x128xf32, #tpu.memory_space<vmem>>) attributes {dimension_semantics = [#tpu.dimension_semantics<parallel>], iteration_bounds = array<i64: 2>, scalar_prefetch = 0 : i64, scratch_operands = 0 : i64, tpu.core_type = #tpu.core_type<tc>, window_params = [{transform_indices = @transform_0, window_bounds = array<i64: 2, 128>}, {pipeline_mode = #tpu.pipeline_mode<synchronous>, transform_indices = @transform_1, window_bounds = array<i64: 2, 128>}, {pipeline_mode = #tpu.pipeline_mode<synchronous>, transform_indices = @transform_2, window_bounds = array<i64: 2, 32, 3>}, {pipeline_mode = #tpu.pipeline_mode<synchronous>, transform_indices = @transform_3, window_bounds = array<i64: 2, 32, 1>}, {pipeline_mode = #tpu.pipeline_mode<synchronous>, transform_indices = @transform_4, window_bounds = array<i64: 3, 128, 64>}, {pipeline_mode = #tpu.pipeline_mode<synchronous>, transform_indices = @transform_5, window_bounds = array<i64: 128, 1>}, {pipeline_mode = #tpu.pipeline_mode<synchronous>, transform_indices = @transform_6, window_bounds = array<i64: 3, 256, 128>}, {pipeline_mode = #tpu.pipeline_mode<synchronous>, transform_indices = @transform_7, window_bounds = array<i64: 256, 1>}, {pipeline_mode = #tpu.pipeline_mode<synchronous>, transform_indices = @transform_8, window_bounds = array<i64: 4, 128, 8>}, {pipeline_mode = #tpu.pipeline_mode<synchronous>, transform_indices = @transform_9, window_bounds = array<i64: 128, 1024>}, {pipeline_mode = #tpu.pipeline_mode<synchronous>, transform_indices = @transform_10, window_bounds = array<i64: 128, 1>}, {pipeline_mode = #tpu.pipeline_mode<synchronous>, transform_indices = @transform_11, window_bounds = array<i64: 64, 128>}, {pipeline_mode = #tpu.pipeline_mode<synchronous>, transform_indices = @transform_12, window_bounds = array<i64: 64, 1>}, {pipeline_mode = #tpu.pipeline_mode<synchronous>, transform_indices = @transform_13, window_bounds = array<i64: 32, 64>}, {pipeline_mode = #tpu.pipeline_mode<synchronous>, transform_indices = @transform_14, window_bounds = array<i64: 32, 1>}, {pipeline_mode = #tpu.pipeline_mode<synchronous>, transform_indices = @transform_15, window_bounds = array<i64: 1, 32>}, {pipeline_mode = #tpu.pipeline_mode<synchronous>, transform_indices = @transform_16, window_bounds = array<i64: 1, 1>}, {transform_indices = @transform_17, window_bounds = array<i64: 1, 128>}]} {
    %c0 = arith.constant 0 : index
    %c0_0 = arith.constant 0 : index
    %0 = vector.load %arg2[%c0, %c0_0] : memref<2x128xf32, #tpu.memory_space<vmem>>, vector<1x128xf32>
    %c1 = arith.constant 1 : index
    %c0_1 = arith.constant 0 : index
    %1 = vector.load %arg2[%c1, %c0_1] : memref<2x128xf32, #tpu.memory_space<vmem>>, vector<1x128xf32>
    %c0_2 = arith.constant 0 : index
    %c0_3 = arith.constant 0 : index
    %2 = vector.load %arg1[%c0_2, %c0_3] : memref<2x128xf32, #tpu.memory_space<vmem>>, vector<2x128xf32>
    %c1_i32 = arith.constant 1 : i32
    %3 = tpu.dynamic_rotate %2 by %c1_i32 dim 1 : vector<2x128xf32>, i32 -> vector<2x128xf32>
    %4 = vector.broadcast %0 : vector<1x128xf32> to vector<2x128xf32>
    %5 = arith.mulf %3, %4 : vector<2x128xf32>
    %c127_i32 = arith.constant 127 : i32
    %6 = tpu.dynamic_rotate %2 by %c127_i32 dim 1 : vector<2x128xf32>, i32 -> vector<2x128xf32>
    %7 = vector.broadcast %1 : vector<1x128xf32> to vector<2x128xf32>
    %8 = arith.mulf %6, %7 : vector<2x128xf32>
    %c0_4 = arith.constant 0 : index
    %c0_5 = arith.constant 0 : index
    %c0_6 = arith.constant 0 : index
    %9 = vector.load %arg3[%c0_4, %c0_5, %c0_6] : memref<2x32x3xf32, #tpu.memory_space<vmem>>, vector<2x32x3xf32>
    %10 = vector.extract_strided_slice %9 {offsets = [0, 0, 0], sizes = [2, 32, 1], strides = [1, 1, 1]} : vector<2x32x3xf32> to vector<2x32x1xf32>
    %11 = vector.shape_cast %5 : vector<2x128xf32> to vector<2x1x128xf32>
    %12 = vector.broadcast %10 : vector<2x32x1xf32> to vector<2x32x128xf32>
    %13 = vector.broadcast %11 : vector<2x1x128xf32> to vector<2x32x128xf32>
    %14 = arith.mulf %12, %13 : vector<2x32x128xf32>
    %15 = vector.extract_strided_slice %9 {offsets = [0, 0, 1], sizes = [2, 32, 1], strides = [1, 1, 1]} : vector<2x32x3xf32> to vector<2x32x1xf32>
    %16 = vector.shape_cast %2 : vector<2x128xf32> to vector<2x1x128xf32>
    %17 = vector.broadcast %15 : vector<2x32x1xf32> to vector<2x32x128xf32>
    %18 = vector.broadcast %16 : vector<2x1x128xf32> to vector<2x32x128xf32>
    %19 = arith.mulf %17, %18 : vector<2x32x128xf32>
    %20 = arith.addf %14, %19 : vector<2x32x128xf32>
    %21 = vector.extract_strided_slice %9 {offsets = [0, 0, 2], sizes = [2, 32, 1], strides = [1, 1, 1]} : vector<2x32x3xf32> to vector<2x32x1xf32>
    %22 = vector.shape_cast %8 : vector<2x128xf32> to vector<2x1x128xf32>
    %23 = vector.broadcast %21 : vector<2x32x1xf32> to vector<2x32x128xf32>
    %24 = vector.broadcast %22 : vector<2x1x128xf32> to vector<2x32x128xf32>
    %25 = arith.mulf %23, %24 : vector<2x32x128xf32>
    %26 = arith.addf %20, %25 : vector<2x32x128xf32>
    %c0_7 = arith.constant 0 : index
    %c0_8 = arith.constant 0 : index
    %c0_9 = arith.constant 0 : index
    %27 = vector.load %arg4[%c0_7, %c0_8, %c0_9] : memref<2x32x1xf32, #tpu.memory_space<vmem>>, vector<2x32x1xf32>
    %28 = vector.broadcast %27 : vector<2x32x1xf32> to vector<2x32x128xf32>
    %29 = arith.addf %26, %28 : vector<2x32x128xf32>
    %cst = arith.constant 0.000000e+00 : f32
    %30 = vector.broadcast %cst : f32 to vector<2x32x128xf32>
    %31 = arith.maximumf %29, %30 : vector<2x32x128xf32>
    %32 = vector.shape_cast %31 : vector<2x32x128xf32> to vector<64x128xf32>
    %c1_i32_10 = arith.constant 1 : i32
    %33 = tpu.dynamic_rotate %32 by %c1_i32_10 dim 1 : vector<64x128xf32>, i32 -> vector<64x128xf32>
    %34 = vector.broadcast %0 : vector<1x128xf32> to vector<64x128xf32>
    %35 = arith.mulf %33, %34 : vector<64x128xf32>
    %c127_i32_11 = arith.constant 127 : i32
    %36 = tpu.dynamic_rotate %32 by %c127_i32_11 dim 1 : vector<64x128xf32>, i32 -> vector<64x128xf32>
    %37 = vector.broadcast %1 : vector<1x128xf32> to vector<64x128xf32>
    %38 = arith.mulf %36, %37 : vector<64x128xf32>
    %c0_12 = arith.constant 0 : index
    %c0_13 = arith.constant 0 : index
    %c0_14 = arith.constant 0 : index
    %39 = vector.load %arg5[%c0_12, %c0_13, %c0_14] : memref<3x128x64xbf16, #tpu.memory_space<vmem>>, vector<1x128x64xbf16>
    %40 = vector.shape_cast %39 : vector<1x128x64xbf16> to vector<128x64xbf16>
    %41 = arith.truncf %35 : vector<64x128xf32> to vector<64x128xbf16>
    %cst_15 = arith.constant dense<0.000000e+00> : vector<128x128xf32>
    %42 = tpu.matmul %40, %41, %cst_15 {dimension_numbers = #tpu.dot_dimension_numbers<[1], [0], [0], [1], [0, 0, 1, 1], [], []>} : vector<128x64xbf16>, vector<64x128xbf16>, vector<128x128xf32> -> vector<128x128xf32>
    %c1_16 = arith.constant 1 : index
    %c0_17 = arith.constant 0 : index
    %c0_18 = arith.constant 0 : index
    %43 = vector.load %arg5[%c1_16, %c0_17, %c0_18] : memref<3x128x64xbf16, #tpu.memory_space<vmem>>, vector<1x128x64xbf16>
    %44 = vector.shape_cast %43 : vector<1x128x64xbf16> to vector<128x64xbf16>
    %45 = arith.truncf %32 : vector<64x128xf32> to vector<64x128xbf16>
    %cst_19 = arith.constant dense<0.000000e+00> : vector<128x128xf32>
    %46 = tpu.matmul %44, %45, %cst_19 {dimension_numbers = #tpu.dot_dimension_numbers<[1], [0], [0], [1], [0, 0, 1, 1], [], []>} : vector<128x64xbf16>, vector<64x128xbf16>, vector<128x128xf32> -> vector<128x128xf32>
    %47 = arith.addf %42, %46 : vector<128x128xf32>
    %c2 = arith.constant 2 : index
    %c0_20 = arith.constant 0 : index
    %c0_21 = arith.constant 0 : index
    %48 = vector.load %arg5[%c2, %c0_20, %c0_21] : memref<3x128x64xbf16, #tpu.memory_space<vmem>>, vector<1x128x64xbf16>
    %49 = vector.shape_cast %48 : vector<1x128x64xbf16> to vector<128x64xbf16>
    %50 = arith.truncf %38 : vector<64x128xf32> to vector<64x128xbf16>
    %cst_22 = arith.constant dense<0.000000e+00> : vector<128x128xf32>
    %51 = tpu.matmul %49, %50, %cst_22 {dimension_numbers = #tpu.dot_dimension_numbers<[1], [0], [0], [1], [0, 0, 1, 1], [], []>} : vector<128x64xbf16>, vector<64x128xbf16>, vector<128x128xf32> -> vector<128x128xf32>
    %52 = arith.addf %47, %51 : vector<128x128xf32>
    %c0_23 = arith.constant 0 : index
    %c0_24 = arith.constant 0 : index
    %53 = vector.load %arg6[%c0_23, %c0_24] : memref<128x1xf32, #tpu.memory_space<vmem>>, vector<128x1xf32>
    %54 = vector.broadcast %53 : vector<128x1xf32> to vector<128x128xf32>
    %55 = arith.addf %52, %54 : vector<128x128xf32>
    %cst_25 = arith.constant 0.000000e+00 : f32
    %56 = vector.broadcast %cst_25 : f32 to vector<128x128xf32>
    %57 = arith.maximumf %55, %56 : vector<128x128xf32>
    %c1_i32_26 = arith.constant 1 : i32
    %58 = tpu.dynamic_rotate %57 by %c1_i32_26 dim 1 : vector<128x128xf32>, i32 -> vector<128x128xf32>
    %59 = vector.broadcast %0 : vector<1x128xf32> to vector<128x128xf32>
    %60 = arith.mulf %58, %59 : vector<128x128xf32>
    %c127_i32_27 = arith.constant 127 : i32
    %61 = tpu.dynamic_rotate %57 by %c127_i32_27 dim 1 : vector<128x128xf32>, i32 -> vector<128x128xf32>
    %62 = vector.broadcast %1 : vector<1x128xf32> to vector<128x128xf32>
    %63 = arith.mulf %61, %62 : vector<128x128xf32>
    %c0_28 = arith.constant 0 : index
    %c0_29 = arith.constant 0 : index
    %c0_30 = arith.constant 0 : index
    %64 = vector.load %arg7[%c0_28, %c0_29, %c0_30] : memref<3x256x128xbf16, #tpu.memory_space<vmem>>, vector<1x256x128xbf16>
    %65 = vector.shape_cast %64 : vector<1x256x128xbf16> to vector<256x128xbf16>
    %66 = arith.truncf %60 : vector<128x128xf32> to vector<128x128xbf16>
    %cst_31 = arith.constant dense<0.000000e+00> : vector<256x128xf32>
    %67 = tpu.matmul %65, %66, %cst_31 {dimension_numbers = #tpu.dot_dimension_numbers<[1], [0], [0], [1], [0, 0, 1, 1], [], []>} : vector<256x128xbf16>, vector<128x128xbf16>, vector<256x128xf32> -> vector<256x128xf32>
    %c1_32 = arith.constant 1 : index
    %c0_33 = arith.constant 0 : index
    %c0_34 = arith.constant 0 : index
    %68 = vector.load %arg7[%c1_32, %c0_33, %c0_34] : memref<3x256x128xbf16, #tpu.memory_space<vmem>>, vector<1x256x128xbf16>
    %69 = vector.shape_cast %68 : vector<1x256x128xbf16> to vector<256x128xbf16>
    %70 = arith.truncf %57 : vector<128x128xf32> to vector<128x128xbf16>
    %cst_35 = arith.constant dense<0.000000e+00> : vector<256x128xf32>
    %71 = tpu.matmul %69, %70, %cst_35 {dimension_numbers = #tpu.dot_dimension_numbers<[1], [0], [0], [1], [0, 0, 1, 1], [], []>} : vector<256x128xbf16>, vector<128x128xbf16>, vector<256x128xf32> -> vector<256x128xf32>
    %72 = arith.addf %67, %71 : vector<256x128xf32>
    %c2_36 = arith.constant 2 : index
    %c0_37 = arith.constant 0 : index
    %c0_38 = arith.constant 0 : index
    %73 = vector.load %arg7[%c2_36, %c0_37, %c0_38] : memref<3x256x128xbf16, #tpu.memory_space<vmem>>, vector<1x256x128xbf16>
    %74 = vector.shape_cast %73 : vector<1x256x128xbf16> to vector<256x128xbf16>
    %75 = arith.truncf %63 : vector<128x128xf32> to vector<128x128xbf16>
    %cst_39 = arith.constant dense<0.000000e+00> : vector<256x128xf32>
    %76 = tpu.matmul %74, %75, %cst_39 {dimension_numbers = #tpu.dot_dimension_numbers<[1], [0], [0], [1], [0, 0, 1, 1], [], []>} : vector<256x128xbf16>, vector<128x128xbf16>, vector<256x128xf32> -> vector<256x128xf32>
    %77 = arith.addf %72, %76 : vector<256x128xf32>
    %c0_40 = arith.constant 0 : index
    %c0_41 = arith.constant 0 : index
    %78 = vector.load %arg8[%c0_40, %c0_41] : memref<256x1xf32, #tpu.memory_space<vmem>>, vector<256x1xf32>
    %79 = vector.broadcast %78 : vector<256x1xf32> to vector<256x128xf32>
    %80 = arith.addf %77, %79 : vector<256x128xf32>
    %cst_42 = arith.constant 0.000000e+00 : f32
    %81 = vector.broadcast %cst_42 : f32 to vector<256x128xf32>
    %82 = arith.maximumf %80, %81 : vector<256x128xf32>
    %83 = arith.truncf %82 : vector<256x128xf32> to vector<256x128xbf16>
    %c0_43 = arith.constant 0 : index
    %c0_44 = arith.constant 0 : index
    %c0_45 = arith.constant 0 : index
    %84 = vector.load %arg9[%c0_43, %c0_44, %c0_45] : memref<4x128x8xbf16, #tpu.memory_space<vmem>>, vector<1x128x8xbf16>
    %85 = vector.shape_cast %84 : vector<1x128x8xbf16> to vector<128x8xbf16>
    %cst_46 = arith.constant dense<0.000000e+00> : vector<256x8xf32>
    %86 = tpu.matmul %83, %85, %cst_46 {dimension_numbers = #tpu.dot_dimension_numbers<[1], [0], [0], [1], [0, 0, 1, 1], [], []>} : vector<256x128xbf16>, vector<128x8xbf16>, vector<256x8xf32> -> vector<256x8xf32>
    %c1_47 = arith.constant 1 : index
    %c0_48 = arith.constant 0 : index
    %c0_49 = arith.constant 0 : index
    %87 = vector.load %arg9[%c1_47, %c0_48, %c0_49] : memref<4x128x8xbf16, #tpu.memory_space<vmem>>, vector<1x128x8xbf16>
    %88 = vector.shape_cast %87 : vector<1x128x8xbf16> to vector<128x8xbf16>
    %cst_50 = arith.constant dense<0.000000e+00> : vector<256x8xf32>
    %89 = tpu.matmul %83, %88, %cst_50 {dimension_numbers = #tpu.dot_dimension_numbers<[1], [0], [0], [1], [0, 0, 1, 1], [], []>} : vector<256x128xbf16>, vector<128x8xbf16>, vector<256x8xf32> -> vector<256x8xf32>
    %c2_51 = arith.constant 2 : index
    %c0_52 = arith.constant 0 : index
    %c0_53 = arith.constant 0 : index
    %90 = vector.load %arg9[%c2_51, %c0_52, %c0_53] : memref<4x128x8xbf16, #tpu.memory_space<vmem>>, vector<1x128x8xbf16>
    %91 = vector.shape_cast %90 : vector<1x128x8xbf16> to vector<128x8xbf16>
    %cst_54 = arith.constant dense<0.000000e+00> : vector<256x8xf32>
    %92 = tpu.matmul %83, %91, %cst_54 {dimension_numbers = #tpu.dot_dimension_numbers<[1], [0], [0], [1], [0, 0, 1, 1], [], []>} : vector<256x128xbf16>, vector<128x8xbf16>, vector<256x8xf32> -> vector<256x8xf32>
    %c3 = arith.constant 3 : index
    %c0_55 = arith.constant 0 : index
    %c0_56 = arith.constant 0 : index
    %93 = vector.load %arg9[%c3, %c0_55, %c0_56] : memref<4x128x8xbf16, #tpu.memory_space<vmem>>, vector<1x128x8xbf16>
    %94 = vector.shape_cast %93 : vector<1x128x8xbf16> to vector<128x8xbf16>
    %cst_57 = arith.constant dense<0.000000e+00> : vector<256x8xf32>
    %95 = tpu.matmul %83, %94, %cst_57 {dimension_numbers = #tpu.dot_dimension_numbers<[1], [0], [0], [1], [0, 0, 1, 1], [], []>} : vector<256x128xbf16>, vector<128x8xbf16>, vector<256x8xf32> -> vector<256x8xf32>
    %96 = tpu.concatenate %86, %89, %92, %95 in 0 : vector<256x8xf32>, vector<256x8xf32>, vector<256x8xf32>, vector<256x8xf32> -> vector<1024x8xf32>
    %97 = arith.truncf %96 : vector<1024x8xf32> to vector<1024x8xbf16>
    %c0_58 = arith.constant 0 : index
    %c0_59 = arith.constant 0 : index
    %98 = vector.load %arg10[%c0_58, %c0_59] : memref<128x1024xbf16, #tpu.memory_space<vmem>>, vector<128x1024xbf16>
    %cst_60 = arith.constant dense<0.000000e+00> : vector<128x8xf32>
    %99 = tpu.matmul %98, %97, %cst_60 {dimension_numbers = #tpu.dot_dimension_numbers<[1], [0], [0], [1], [0, 0, 1, 1], [], []>} : vector<128x1024xbf16>, vector<1024x8xbf16>, vector<128x8xf32> -> vector<128x8xf32>
    %c0_61 = arith.constant 0 : index
    %c0_62 = arith.constant 0 : index
    %100 = vector.load %arg11[%c0_61, %c0_62] : memref<128x1xf32, #tpu.memory_space<vmem>>, vector<128x1xf32>
    %101 = vector.broadcast %100 : vector<128x1xf32> to vector<128x8xf32>
    %102 = arith.addf %99, %101 : vector<128x8xf32>
    %cst_63 = arith.constant 0.000000e+00 : f32
    %103 = vector.broadcast %cst_63 : f32 to vector<128x8xf32>
    %104 = arith.maximumf %102, %103 : vector<128x8xf32>
    %c0_64 = arith.constant 0 : index
    %c0_65 = arith.constant 0 : index
    %105 = vector.load %arg12[%c0_64, %c0_65] : memref<64x128xbf16, #tpu.memory_space<vmem>>, vector<64x128xbf16>
    %106 = arith.truncf %104 : vector<128x8xf32> to vector<128x8xbf16>
    %cst_66 = arith.constant dense<0.000000e+00> : vector<64x8xf32>
    %107 = tpu.matmul %105, %106, %cst_66 {dimension_numbers = #tpu.dot_dimension_numbers<[1], [0], [0], [1], [0, 0, 1, 1], [], []>} : vector<64x128xbf16>, vector<128x8xbf16>, vector<64x8xf32> -> vector<64x8xf32>
    %c0_67 = arith.constant 0 : index
    %c0_68 = arith.constant 0 : index
    %108 = vector.load %arg13[%c0_67, %c0_68] : memref<64x1xf32, #tpu.memory_space<vmem>>, vector<64x1xf32>
    %109 = vector.broadcast %108 : vector<64x1xf32> to vector<64x8xf32>
    %110 = arith.addf %107, %109 : vector<64x8xf32>
    %cst_69 = arith.constant 0.000000e+00 : f32
    %111 = vector.broadcast %cst_69 : f32 to vector<64x8xf32>
    %112 = arith.maximumf %110, %111 : vector<64x8xf32>
    %c0_70 = arith.constant 0 : index
    %c0_71 = arith.constant 0 : index
    %113 = vector.load %arg14[%c0_70, %c0_71] : memref<32x64xbf16, #tpu.memory_space<vmem>>, vector<32x64xbf16>
    %114 = arith.truncf %112 : vector<64x8xf32> to vector<64x8xbf16>
    %cst_72 = arith.constant dense<0.000000e+00> : vector<32x8xf32>
    %115 = tpu.matmul %113, %114, %cst_72 {dimension_numbers = #tpu.dot_dimension_numbers<[1], [0], [0], [1], [0, 0, 1, 1], [], []>} : vector<32x64xbf16>, vector<64x8xbf16>, vector<32x8xf32> -> vector<32x8xf32>
    %c0_73 = arith.constant 0 : index
    %c0_74 = arith.constant 0 : index
    %116 = vector.load %arg15[%c0_73, %c0_74] : memref<32x1xf32, #tpu.memory_space<vmem>>, vector<32x1xf32>
    %117 = vector.broadcast %116 : vector<32x1xf32> to vector<32x8xf32>
    %118 = arith.addf %115, %117 : vector<32x8xf32>
    %cst_75 = arith.constant 0.000000e+00 : f32
    %119 = vector.broadcast %cst_75 : f32 to vector<32x8xf32>
    %120 = arith.maximumf %118, %119 : vector<32x8xf32>
    %c0_76 = arith.constant 0 : index
    %c0_77 = arith.constant 0 : index
    %121 = vector.load %arg16[%c0_76, %c0_77] : memref<1x32xbf16, #tpu.memory_space<vmem>>, vector<1x32xbf16>
    %122 = arith.truncf %120 : vector<32x8xf32> to vector<32x8xbf16>
    %cst_78 = arith.constant dense<0.000000e+00> : vector<1x8xf32>
    %123 = tpu.matmul %121, %122, %cst_78 {dimension_numbers = #tpu.dot_dimension_numbers<[1], [0], [0], [1], [0, 0, 1, 1], [], []>} : vector<1x32xbf16>, vector<32x8xbf16>, vector<1x8xf32> -> vector<1x8xf32>
    %c0_79 = arith.constant 0 : index
    %c0_80 = arith.constant 0 : index
    %124 = vector.load %arg17[%c0_79, %c0_80] : memref<1x1xf32, #tpu.memory_space<vmem>>, vector<1x1xf32>
    %125 = vector.broadcast %124 : vector<1x1xf32> to vector<1x8xf32>
    %126 = arith.addf %123, %125 : vector<1x8xf32>
    %cst_81 = arith.constant 0.000000e+00 : f32
    %127 = vector.broadcast %cst_81 : f32 to vector<1x8xf32>
    %128 = arith.subf %127, %126 : vector<1x8xf32>
    %129 = math.exp %128 : vector<1x8xf32>
    %cst_82 = arith.constant 1.000000e+00 : f32
    %130 = vector.broadcast %cst_82 : f32 to vector<1x8xf32>
    %131 = arith.addf %130, %129 : vector<1x8xf32>
    %cst_83 = arith.constant 1.000000e+00 : f32
    %132 = vector.broadcast %cst_83 : f32 to vector<1x8xf32>
    %133 = arith.divf %132, %131 : vector<1x8xf32>
    %cst_84 = arith.constant 0.000000e+00 : f32
    %134 = vector.broadcast %cst_84 : f32 to vector<1x128xf32>
    %c0_85 = arith.constant 0 : index
    %c0_86 = arith.constant 0 : index
    %135 = vector.load %arg18[%c0_85, %c0_86] : memref<1x128xf32, #tpu.memory_space<vmem>>, vector<1x128xf32>
    tpu.vector_store %arg18[%c0_85, %c0_86], %134 {strides = array<i32>} : memref<1x128xf32, #tpu.memory_space<vmem>>, vector<1x128xf32>,
    %c0_87 = arith.constant 0 : index
    %c0_88 = arith.constant 0 : index
    %136 = vector.load %arg18[%c0_87, %c0_88] : memref<1x128xf32, #tpu.memory_space<vmem>>, vector<1x8xf32>
    tpu.vector_store %arg18[%c0_87, %c0_88], %133 {strides = array<i32>} : memref<1x128xf32, #tpu.memory_space<vmem>>, vector<1x8xf32>,
    return
  }
  func.func @transform_0(%arg0: i32) -> (i32, i32) {
    %c0_i32 = arith.constant 0 : i32
    %c0_i32_0 = arith.constant 0 : i32
    return %c0_i32, %arg0 : i32, i32
  }
  func.func @transform_1(%arg0: i32) -> (i32, i32) {
    %c0_i32 = arith.constant 0 : i32
    %c0_i32_0 = arith.constant 0 : i32
    %c0_i32_1 = arith.constant 0 : i32
    return %c0_i32, %c0_i32_0 : i32, i32
  }
  func.func @transform_2(%arg0: i32) -> (i32, i32, i32) {
    %c0_i32 = arith.constant 0 : i32
    %c0_i32_0 = arith.constant 0 : i32
    %c0_i32_1 = arith.constant 0 : i32
    %c0_i32_2 = arith.constant 0 : i32
    return %c0_i32, %c0_i32_0, %c0_i32_1 : i32, i32, i32
  }
  func.func @transform_3(%arg0: i32) -> (i32, i32, i32) {
    %c0_i32 = arith.constant 0 : i32
    %c0_i32_0 = arith.constant 0 : i32
    %c0_i32_1 = arith.constant 0 : i32
    %c0_i32_2 = arith.constant 0 : i32
    return %c0_i32, %c0_i32_0, %c0_i32_1 : i32, i32, i32
  }
  func.func @transform_4(%arg0: i32) -> (i32, i32, i32) {
    %c0_i32 = arith.constant 0 : i32
    %c0_i32_0 = arith.constant 0 : i32
    %c0_i32_1 = arith.constant 0 : i32
    %c0_i32_2 = arith.constant 0 : i32
    return %c0_i32, %c0_i32_0, %c0_i32_1 : i32, i32, i32
  }
  func.func @transform_5(%arg0: i32) -> (i32, i32) {
    %c0_i32 = arith.constant 0 : i32
    %c0_i32_0 = arith.constant 0 : i32
    %c0_i32_1 = arith.constant 0 : i32
    return %c0_i32, %c0_i32_0 : i32, i32
  }
  func.func @transform_6(%arg0: i32) -> (i32, i32, i32) {
    %c0_i32 = arith.constant 0 : i32
    %c0_i32_0 = arith.constant 0 : i32
    %c0_i32_1 = arith.constant 0 : i32
    %c0_i32_2 = arith.constant 0 : i32
    return %c0_i32, %c0_i32_0, %c0_i32_1 : i32, i32, i32
  }
  func.func @transform_7(%arg0: i32) -> (i32, i32) {
    %c0_i32 = arith.constant 0 : i32
    %c0_i32_0 = arith.constant 0 : i32
    %c0_i32_1 = arith.constant 0 : i32
    return %c0_i32, %c0_i32_0 : i32, i32
  }
  func.func @transform_8(%arg0: i32) -> (i32, i32, i32) {
    %c0_i32 = arith.constant 0 : i32
    %c0_i32_0 = arith.constant 0 : i32
    %c0_i32_1 = arith.constant 0 : i32
    %c0_i32_2 = arith.constant 0 : i32
    return %c0_i32, %c0_i32_0, %c0_i32_1 : i32, i32, i32
  }
  func.func @transform_9(%arg0: i32) -> (i32, i32) {
    %c0_i32 = arith.constant 0 : i32
    %c0_i32_0 = arith.constant 0 : i32
    %c0_i32_1 = arith.constant 0 : i32
    return %c0_i32, %c0_i32_0 : i32, i32
  }
  func.func @transform_10(%arg0: i32) -> (i32, i32) {
    %c0_i32 = arith.constant 0 : i32
    %c0_i32_0 = arith.constant 0 : i32
    %c0_i32_1 = arith.constant 0 : i32
    return %c0_i32, %c0_i32_0 : i32, i32
  }
  func.func @transform_11(%arg0: i32) -> (i32, i32) {
    %c0_i32 = arith.constant 0 : i32
    %c0_i32_0 = arith.constant 0 : i32
    %c0_i32_1 = arith.constant 0 : i32
    return %c0_i32, %c0_i32_0 : i32, i32
  }
  func.func @transform_12(%arg0: i32) -> (i32, i32) {
    %c0_i32 = arith.constant 0 : i32
    %c0_i32_0 = arith.constant 0 : i32
    %c0_i32_1 = arith.constant 0 : i32
    return %c0_i32, %c0_i32_0 : i32, i32
  }
  func.func @transform_13(%arg0: i32) -> (i32, i32) {
    %c0_i32 = arith.constant 0 : i32
    %c0_i32_0 = arith.constant 0 : i32
    %c0_i32_1 = arith.constant 0 : i32
    return %c0_i32, %c0_i32_0 : i32, i32
  }
  func.func @transform_14(%arg0: i32) -> (i32, i32) {
    %c0_i32 = arith.constant 0 : i32
    %c0_i32_0 = arith.constant 0 : i32
    %c0_i32_1 = arith.constant 0 : i32
    return %c0_i32, %c0_i32_0 : i32, i32
  }
  func.func @transform_15(%arg0: i32) -> (i32, i32) {
    %c0_i32 = arith.constant 0 : i32
    %c0_i32_0 = arith.constant 0 : i32
    %c0_i32_1 = arith.constant 0 : i32
    return %c0_i32, %c0_i32_0 : i32, i32
  }
  func.func @transform_16(%arg0: i32) -> (i32, i32) {
    %c0_i32 = arith.constant 0 : i32
    %c0_i32_0 = arith.constant 0 : i32
    %c0_i32_1 = arith.constant 0 : i32
    return %c0_i32, %c0_i32_0 : i32, i32
  }
  func.func @transform_17(%arg0: i32) -> (i32, i32) {
    %c0_i32 = arith.constant 0 : i32
    %c0_i32_0 = arith.constant 0 : i32
    return %c0_i32, %arg0 : i32, i32
  }
}

</mosaic_0001>

<bundles_post_ra>
// kernel: tpu_custom_call.1
= control target key start
LH: loop header
LB: loop body
LE: loop exit
PB: predicated region body
PF: predicated region fallthrough
CT: control target
= control target key end

     0   :  { %s8627_s0 = inlined_call_operand.vmem [shape: f32[2,256], index: 0, kind: input, shape index: {}]   ;;  %s8628_s1 = inlined_call_operand.vmem [shape: f32[2,128], index: 1, kind: input, shape index: {}]   ;;  %s8629_s2 = inlined_call_operand.vmem [shape: f32[2,32,3], index: 2, kind: input, shape index: {}]   ;;  %s8630_s3 = inlined_call_operand.vmem [shape: f32[2,32,1], index: 3, kind: input, shape index: {}]   ;;  %s8631_s4 = inlined_call_operand.vmem [shape: bf16[3,128,64], index: 4, kind: input, shape index: {}]   ;;  %s8632_s5 = inlined_call_operand.vmem [shape: f32[128,1], index: 5, kind: input, shape index: {}]   ;;  %s8633_s6 = inlined_call_operand.vmem [shape: bf16[3,256,128], index: 6, kind: input, shape index: {}]   ;;  %s8634_s7 = inlined_call_operand.vmem [shape: f32[256,1], index: 7, kind: input, shape index: {}]   ;;  %s8635_s8 = inlined_call_operand.vmem [shape: bf16[4,128,8], index: 8, kind: input, shape index: {}]   ;;  %s8636_s9 = inlined_call_operand.vmem [shape: bf16[128,1024], index: 9, kind: input, shape index: {}]   ;;  %s8637_s10 = inlined_call_operand.vmem [shape: f32[128,1], index: 10, kind: input, shape index: {}]   ;;  %s8638_s11 = inlined_call_operand.vmem [shape: bf16[64,128], index: 11, kind: input, shape index: {}]   ;;  %s8639_s12 = inlined_call_operand.vmem [shape: f32[64,1], index: 12, kind: input, shape index: {}]   ;;  %s8640_s13 = inlined_call_operand.vmem [shape: bf16[32,64], index: 13, kind: input, shape index: {}]   ;;  %s8641_s14 = inlined_call_operand.vmem [shape: f32[32,1], index: 14, kind: input, shape index: {}]   ;;  %s8642_s15 = inlined_call_operand.vmem [shape: bf16[1,32], index: 15, kind: input, shape index: {}]   ;;  %s8643_s16 = inlined_call_operand.<no memory space> [shape: f32[1,1], index: 16, kind: input, shape index: {}]   ;;  %s8644_s17 = inlined_call_operand.hbm [shape: f32[1,256], index: 17, kind: output, shape index: {}]  }
   0x1   :  { %8673 = sst [smem:[#allocation35_spill]] %s8627_s0  ;;  %v22_v0 = vstv %s8643_s16 }
   0x2   :  { %8674 = sst [smem:[#allocation36_spill]] %s8628_s1  ;;  %23 = vst [vmem:[#allocation2] sm:$0x1] %v22_v0 }
   0x3   :  { %8675 = sst [smem:[#allocation37_spill]] %s8629_s2 }
   0x4   :  { %8676 = sst [smem:[#allocation38_spill]] %s8630_s3 }
   0x5   :  { %24 = vsyncpa [#allocation4], 0 }
   0x6   :  { %26 = vsyncpa [#allocation4 + $0x1], 0  ;;  %s6787_s26 = smov 0   ;;  %s6789_s27 = smov 0  }
   0x7   :  { %s6791_s28 = smov 0   ;;  %s6793_s29 = smov 0  }
   0x8 LB: > { %8677 = sst [smem:[#allocation6_spill]] %s6679_s28  ;;  %s6808_s16 = sadd.s32 4294967295, %s6683_s29   ;;  %s6683_s29 = sphi %s6793_s29, %s8768_s29   ;;  %s6679_s28 = sphi %s6791_s28, %s8770_s28   ;;  %s6675_s27 = sphi %s6789_s27, %s8772_s27   ;;  %s6671_s26 = sphi %s6787_s26, %s8771_s26  }
   0x9   : > { %s5156_s0 = sadd.s32 4294967294, %s6683_s29   ;;  %s6812_s30 = sadd.s32 1, %s6683_s29  }
   0xa   : > { %8678 = sst [smem:[#allocation7_spill]] %s6812_s30  ;;  %s401_s18 = sadd.s32 1, %s6679_s28 }
   0xb   : > { %s398_s19 = ssub.s32 %s6683_s29, %s6812_s30  ;;  %p411_p0 = scmp.ne.s32.totalorder %s6679_s28, %s6675_s27 }
   0xc   : > { %p399_p1 = scmp.eq.s32.totalorder %s398_s19, 0  ;;  %p412_p2 = scmp.eq.s32.totalorder %s6808_s16, 1 }
   0xd   : > { %p417_p3 = scmp.ne.s32.totalorder %s6675_s27, %s6671_s26  ;;  %p418_p4 = scmp.eq.s32.totalorder %s5156_s0, 1 }
   0xe   : > { %s6823_s1 = scalar_select %p399_p1, %s6679_s28, %s401_s18  }
   0xf   : > { %p6825_p5 = por %p412_p2, %p411_p0  ;;  %p6829_p6 = por %p418_p4, %p417_p3 }
  0x10   : > { %8679 = sst [smem:[#allocation8_spill]] %s6823_s1  ;;  %p5159_p7 = scmp.ge.s32.totalorder %s6683_s29, 1 }
  0x11   : > { %s8681_s21 = scalar_select %p6829_p6, 1, 0 }
  0x12   : > { %p491_p8 = scmp.lt.s32.totalorder %s6683_s29, 3 }
  0x13   : > { %8682 = sst [smem:[#allocation9_spill]] %s8681_s21 }
  0x14   : > { %p492_p9 = pnand %p5159_p7, %p491_p8 }
  0x16   : > { %495 = sbr.rel (%p492_p9) target bundleno = 2332 (0x91c), region = 88 }
  0x1b   : > { %s8683_s2 = sld [smem:[#allocation37_spill]]  ;;  %p541_p10 = scmp.lt.s32.totalorder %s6808_s16, 1  ;;  %v6685_v2 = vmov 0   ;;  %v6686_v3 = vmov 2   ;;  %v6688_v6 = vmov 1   ;;  %v575_v25 = vlaneseq }
  0x1c   : > { %6491 = vset.pattern.permute.xlu1 %v6685_v2  ;;  %6494 = vset.pattern.permute.xlu0 %v6686_v3  ;;  %s8684_s28 = sld [smem:[#allocation35_spill]]  ;;  %s8649_s23 = smov 1   ;;  %v6690_v23 = vmov 1966171168   ;;  %vm1007_vm0 = vcmask 523264   ;;  %vm6692_vm1 = vmmov 0  }
  0x1d   : > { %s542_s24 = scalar_select %p541_p10, %s6808_s16, 1  ;;  %v573_v24 = vunpack.c.l.s4 %v6690_v23  ;;  %v576_v28 = vshrl.u32 %v575_v25, 7  ;;  %vm5035_vm2 = vcmask 261120   ;;  %vm5086_vm3 = vcmask 57344  }
  0x1e   : > { %s8651_s30 = smov 127   ;;  %s8685_s3 = sld [smem:[#allocation38_spill]] }
  0x1f   : > { %s5160_s18 = sshll.u32 %s542_s24, 1  ;;  %v574_v27 = vunpack.c.0.s8 %v573_v24  ;;  %s8686_s19 = sld [smem:[#allocation36_spill]]  ;;  %v6913_v47 = vsub.s32 0, %v576_v28 }
  0x20   : > { %s8688_s25 = smov 1   ;;  %s539_s1 = sand.u32 1, %s6675_s27  }
  0x21   : > { %v569_v1 = vld [vmem:[%s8683_s2 + $0x30] sm:$0xff]  ;;  %v570_v4 = vld [vmem:[%s8683_s2 + $0x38] sm:$0xff]  ;;  %v568_v7 = vld [vmem:[%s8683_s2 + $0x28] sm:$0xff]  ;;  %v577_v32 = vsub.s32 %v574_v27, %v576_v28  ;;  %8687 = vst [vmem:[#allocation10_spill] sm:$0xff] %v6913_v47 }
  0x22   : > { %626 = vperm.xlu1 %6491, %v569_v1   ;;  %s544_s22 = scalar_lea.vmem %s8684_s28, %s5160_s18  ;;  %v567_v8 = vld [vmem:[%s8683_s2 + $0x20] sm:$0xff]  ;;  %v566_v9 = vld [vmem:[%s8683_s2 + $0x18] sm:$0xff]  ;;  %v564_v10 = vld [vmem:[%s8683_s2 + $0x8] sm:$0xff] }
  0x23   : > { %v6847_v5 = vld [vmem:[%s544_s22] sm:$0x3]  ;;  %v565_v12 = vld [vmem:[%s8683_s2 + $0x10] sm:$0xff]  ;;  %s6693_s22 = smov [#allocation3]  }
  0x24   : > { %549 = vrot.lane.b32.xlu0 %v6847_v5, %s8649_s23  ;;  %v820_v11 = vld [vmem:[%s8685_s3 + $0x30] sm:$0xff]  ;;  %v821_v13 = vld [vmem:[%s8685_s3 + $0x38] sm:$0xff]  ;;  %v818_v14 = vld [vmem:[%s8685_s3 + $0x20] sm:$0xff]  ;;  %v659_v37 = vrot.slane %v6847_v5, %v577_v32  ;;  %s6627_s24 = sshll.u32 %s6693_s22, 4  ;;  %s6628_s24 = int_to_ptr.vmem [resolvable:$false] %s6627_s24 }
  0x25   : > { %v816_v15 = vld [vmem:[%s8685_s3 + $0x10] sm:$0xff]  ;;  %v815_v16 = vld [vmem:[%s8685_s3 + $0x8] sm:$0xff]  ;;  %v563_v18 = vld [vmem:[%s8683_s2] sm:$0xff]  ;;  %s540_s2 = scalar_lea.vmem [#allocation3], %s539_s1 }
  0x26   : > { %631 = vperm.xlu1 %6491, %v570_v4   ;;  %v819_v17 = vld [vmem:[%s8685_s3 + $0x28] sm:$0xff]  ;;  %v817_v19 = vld [vmem:[%s8685_s3 + $0x18] sm:$0xff]  ;;  %v814_v20 = vld [vmem:[%s8685_s3] sm:$0xff]  ;;  %v660_v42 = vcombine.high %v659_v37, %v659_v37  ;;  %s5101_s0 = sshll.u32 %s540_s2, 4  ;;  %s5102_s0 = int_to_ptr.vmem [resolvable:$true] %s5101_s0 }
  0x27   : > { %v6903_v31 = vld [vmem:[%s8686_s19] ss:$0 sm:$0xff]  ;;  %v6909_v35 = vld [vmem:[%s8686_s19 + $0x1] ss:$0 sm:$0xff]  ;;  %s6623_s18 = scalar_lea.vmem %s5102_s0, 16  ;;  %p6630_p0 = scmp.lt.s32.totalorder %s5102_s0, %s6628_s24 }
  0x28   : > { %556 = vrot.lane.b32.xlu0 %v6847_v5, %s8651_s30  ;;  %v674_v48 = vrot.slane %v660_v42, %v577_v32  ;;  %p6624_p11 = scmp.ne.s32.totalorder %s5102_s0, %s6623_s18 }
  0x2a   : > { %6492 = vset.pattern.permute.xlu1 %v6688_v6  ;;  %v714_v55 = vrot.slane %v674_v48, %v6913_v47  ;;  %p6625_p12 = pnand %p6624_p11, %p6825_p5 }
  0x2b   : > { %704 = vperm.xlu1 %6492, %v570_v4  }
  0x2c   : > { %785 = vperm.xlu0 %6494, %v570_v4   ;;  %p6626_p13 = pneg %p6625_p12 }
  0x2f   : > { %6493 = vset.pattern.permute.xlu1 %v6686_v3 }
  0x30   : > { %781 = vperm.xlu1 %6493, %v569_v1   ;;  %777 = vperm.xlu0 %6494, %v568_v7  }
  0x34   : > { %6495 = vset.pattern.permute.xlu1 %v6685_v2  ;;  %6498 = vset.pattern.permute.xlu0 %v6688_v6 }
  0x35   : > { %616 = vperm.xlu1 %6495, %v567_v8   ;;  %700 = vperm.xlu0 %6498, %v569_v1  }
  0x39   : > { %621 = vperm.xlu1 %6495, %v568_v7   ;;  %692 = vperm.xlu0 %6498, %v567_v8  }
  0x3d   : > { %6496 = vset.pattern.permute.xlu1 %v6688_v6  ;;  %688 = vperm.xlu0 %6498, %v566_v9  }
  0x3e   : > { %696 = vperm.xlu1 %6496, %v568_v7  }
  0x41   : > { %680 = vperm.xlu0 %6498, %v564_v10  }
  0x42   : > { %6497 = vset.pattern.permute.xlu1 %v6686_v3 }
  0x43   : > { %773 = vperm.xlu1 %6497, %v567_v8  }
  0x45   : > { %6504 = vset.pattern.permute.xlu0 %v6685_v2 }
  0x46   : > { %606 = vperm.xlu0 %6504, %v565_v12  }
  0x47   : > { %6499 = vset.pattern.permute.xlu1 %v6685_v2 }
  0x48   : > { %854 = vperm.xlu1 %6499, %v820_v11  }
  0x4a   : > { %844 = vperm.xlu0 %6504, %v818_v14   ;;  %v667_v14 = vrot.slane %v659_v37, %v577_v32 }
  0x4c   : > { %859 = vperm.xlu1 %6499, %v821_v13  }
  0x4e   : > { %601 = vperm.xlu0 %6504, %v564_v10  }
  0x50   : > { %611 = vperm.xlu1 %6499, %v566_v9  }
  0x52   : > { %834 = vperm.xlu0 %6504, %v816_v15  }
  0x54   : > { %6500 = vset.pattern.permute.xlu1 %v6688_v6 }
  0x55   : > { %684 = vperm.xlu1 %6500, %v565_v12  }
  0x56   : > { %829 = vperm.xlu0 %6504, %v815_v16  }
  0x59   : > { %6501 = vset.pattern.permute.xlu1 %v6686_v3 }
  0x5a   : > { %765 = vperm.xlu1 %6501, %v565_v12  }
  0x5e   : > { %769 = vperm.xlu1 %6501, %v566_v9  }
  0x62   : > { %6502 = vset.pattern.permute.xlu1 %v6685_v2 }
  0x63   : > { %849 = vperm.xlu1 %6502, %v819_v17  }
  0x67   : > { %596 = vperm.xlu1 %6502, %v563_v18  }
  0x6b   : > { %6503 = vset.pattern.permute.xlu1 %v6688_v6 }
  0x6c   : > { %676 = vperm.xlu1 %6503, %v563_v18  }
  0x70   : > { %6505 = vset.pattern.permute.xlu1 %v6686_v3 }
  0x71   : > { %757 = vperm.xlu1 %6505, %v563_v18   ;;  %v710_v18 = vrot.slane %v667_v14, %v6913_v47 }
  0x75   : > { %761 = vperm.xlu1 %6505, %v564_v10  }
  0x79   : > { %6506 = vset.pattern.permute.xlu1 %v6685_v2 }
  0x7a   : > { %839 = vperm.xlu1 %6506, %v817_v19  }
  0x7e   : > { %824 = vperm.xlu1 %6506, %v814_v20  }
  0x96   : > { %v550_v26 = vpop.permute.xlu0 %549 }
  0x97   : > { %v555_v33 = vmul.f32 %v6903_v31, %v550_v26 }
  0x99   : > { %v578_v38 = vrot.slane %v555_v33, %v577_v32 }
  0x9a   : > { %v557_v29 = vpop.permute.xlu0 %556 }
  0x9b   : > { %v562_v39 = vmul.f32 %v6909_v35, %v557_v29  ;;  %v579_v43 = vcombine.high %v578_v38, %v578_v38  ;;  %v586_v15 = vrot.slane %v578_v38, %v577_v32 }
  0x9d   : > { %v627_v21 = vpop.permute.xlu1 %626  ;;  %v740_v44 = vrot.slane %v562_v39, %v577_v32  ;;  %v593_v49 = vrot.slane %v579_v43, %v577_v32  ;;  %v637_v19 = vrot.slane %v586_v15, %v6913_v47 }
  0x9f   : > { %v741_v50 = vcombine.high %v740_v44, %v740_v44  ;;  %v641_v53 = vrot.slane %v593_v49, %v6913_v47  ;;  %v748_v20 = vrot.slane %v740_v44, %v577_v32 }
  0xa1   : > { %v632_v22 = vpop.permute.xlu1 %631  ;;  %v755_v54 = vrot.slane %v741_v50, %v577_v32  ;;  %v650_v58 = vmul.f32 %v641_v53, %v627_v21  ;;  %v791_v24 = vrot.slane %v748_v20, %v6913_v47 }
  0xa2   : > { %v651_v0 = vmul.f32 %v641_v53, %v632_v22 }
  0xa3   : > { %v795_v59 = vrot.slane %v755_v54, %v6913_v47 }
  0xa6   : > { %v705_v30 = vpop.permute.xlu1 %704 }
  0xa7   : > { %v786_v34 = vpop.permute.xlu0 %785  ;;  %v724_v61 = vmul.f32 %v714_v55, %v705_v30 }
  0xa8   : > { %v805_v1 = vmul.f32 %v795_v59, %v786_v34 }
  0xa9   : > { %v732_v4 = vadd.f32 %v724_v61, %v651_v0 }
  0xab   : > { %v782_v36 = vpop.permute.xlu1 %781  ;;  %v778_v40 = vpop.permute.xlu0 %777  ;;  %v813_v7 = vadd.f32 %v805_v1, %v732_v4 }
  0xac   : > { %v804_v2 = vmul.f32 %v795_v59, %v782_v36  ;;  %v803_v39 = vmul.f32 %v795_v59, %v778_v40 }
  0xb0   : > { %v617_v41 = vpop.permute.xlu1 %616  ;;  %v701_v45 = vpop.permute.xlu0 %700 }
  0xb1   : > { %v723_v57 = vmul.f32 %v714_v55, %v701_v45  ;;  %v648_v33 = vmul.f32 %v641_v53, %v617_v41 }
  0xb3   : > { %v731_v62 = vadd.f32 %v723_v57, %v650_v58 }
  0xb4   : > { %v622_v46 = vpop.permute.xlu1 %621  ;;  %v693_v51 = vpop.permute.xlu0 %692 }
  0xb5   : > { %v812_v5 = vadd.f32 %v804_v2, %v731_v62  ;;  %v721_v26 = vmul.f32 %v714_v55, %v693_v51  ;;  %v649_v34 = vmul.f32 %v641_v53, %v622_v46  ;;  %v6507_v46 = vld [vmem:[%s8631_s4 + $0x40] sm:$0xff]  }
  0xb6   : > { %6000 = vmatprep.mubr.msk.bf16.mxu0 %vm1007_vm0, %v6507_v46 }
  0xb7   : > { %v729_v42 = vadd.f32 %v721_v26, %v648_v33  ;;  %v6511_v26 = vld [vmem:[%s8631_s4 + $0x60] sm:$0xff]   ;;  %v1494_v33 = vld [vmem:[%s8632_s5 + $0x30] sm:$0xff] }
  0xb8   : > { %v6917_v56 = vpop.permute.xlu0 %688 }
  0xb9   : > { %v697_v52 = vpop.permute.xlu1 %696  ;;  %v720_v58 = vmul.f32 %v710_v18, %v6917_v56 }
  0xba   : > { %v722_v27 = vmul.f32 %v714_v55, %v697_v52 }
  0xbc   : > { %v6920_v63 = vpop.permute.xlu0 %680  ;;  %v730_v43 = vadd.f32 %v722_v27, %v649_v34  ;;  %v1498_v27 = vld [vmem:[%s8632_s5 + $0x50] sm:$0xff]  ;;  %v1503_v34 = vld [vmem:[%s8632_s5 + $0x78] sm:$0xff] }
  0xbe   : > { %v774_v60 = vpop.permute.xlu1 %773  ;;  %v811_v50 = vadd.f32 %v803_v39, %v730_v43  ;;  %v1501_v39 = vld [vmem:[%s8632_s5 + $0x68] sm:$0xff]  ;;  %v1499_v43 = vld [vmem:[%s8632_s5 + $0x58] sm:$0xff] }
  0xbf   : > { %v802_v36 = vmul.f32 %v795_v59, %v774_v60  ;;  %v718_v59 = vmul.f32 %v710_v18, %v6920_v63 }
  0xc1   : > { %v607_v8 = vpop.permute.xlu0 %606  ;;  %v810_v45 = vadd.f32 %v802_v36, %v729_v42  ;;  %v1492_v36 = vld [vmem:[%s8632_s5 + $0x20] sm:$0xff]  ;;  %v1490_v42 = vld [vmem:[%s8632_s5 + $0x10] sm:$0xff] }
  0xc2   : > { %v646_v25 = vmul.f32 %v637_v19, %v607_v8 }
  0xc3   : > { %v855_v3 = vpop.permute.xlu1 %854 }
  0xc4   : > { %v868_v6 = vadd.f32 %v855_v3, %v812_v5 }
  0xc5   : > { %v845_v17 = vpop.permute.xlu0 %844 }
  0xc6   : > { %v876_v11 = vmax.f32 %v868_v6, 0.0  ;;  %v866_v49 = vadd.f32 %v845_v17, %v810_v45  ;;  %v1495_v45 = vld [vmem:[%s8632_s5 + $0x38] sm:$0xff] }
  0xc7   : > { %v860_v9 = vpop.permute.xlu1 %859 }
  0xc8   : > { %v869_v10 = vadd.f32 %v860_v9, %v813_v7  ;;  %v874_v52 = vmax.f32 %v866_v49, 0.0  ;;  %v1491_v49 = vld [vmem:[%s8632_s5 + $0x18] sm:$0xff] }
  0xc9   : > { %v602_v23 = vpop.permute.xlu0 %601 }
  0xca   : > { %v6922_v12 = vmax.f32 %v869_v10, 0.0  ;;  %v645_v61 = vmul.f32 %v637_v19, %v602_v23  ;;  %v1502_v23 = vld [vmem:[%s8632_s5 + $0x70] sm:$0xff] }
  0xcb   : > { %v612_v13 = vpop.permute.xlu1 %611 }
  0xcc   : > { %v966_v16 = vpack.c.bf16 %v6922_v12, %v876_v11  ;;  %v647_v60 = vmul.f32 %v637_v19, %v612_v13  ;;  %v726_v3 = vadd.f32 %v718_v59, %v645_v61 }
  0xcd   : > { %v835_v37 = vpop.permute.xlu0 %834 }
  0xce   : > { %5992 = vmatprep.subr.bf16.mxu0 %v966_v16  ;;  %v728_v2 = vadd.f32 %v720_v58, %v647_v60 }
  0xcf   : > { %5993 = vmatpush3.bf16.msra.mxu0 %v966_v16 }
  0xd0   : > { %v685_v21 = vpop.permute.xlu1 %684 }
  0xd1   : > { %v719_v22 = vmul.f32 %v710_v18, %v685_v21  ;;  %v830_v63 = vpop.permute.xlu0 %829  ;;  %v6508_v21 = vld [vmem:[%s8631_s4 + $0x48] sm:$0xff]  }
  0xd3   : > { %v727_v29 = vadd.f32 %v719_v22, %v646_v25  ;;  %v6509_v22 = vld [vmem:[%s8631_s4 + $0x50] sm:$0xff]   ;;  %v6510_v25 = vld [vmem:[%s8631_s4 + $0x58] sm:$0xff]  }
  0xd5   : > { %v766_v28 = vpop.permute.xlu1 %765 }
  0xd6   : > { %v800_v30 = vmul.f32 %v791_v24, %v766_v28  ;;  %v1496_v28 = vld [vmem:[%s8632_s5 + $0x40] sm:$0xff] }
  0xd8   : > { %v808_v38 = vadd.f32 %v800_v30, %v727_v29  ;;  %v6512_v29 = vld [vmem:[%s8631_s4 + $0x68] sm:$0xff]   ;;  %v6513_v30 = vld [vmem:[%s8631_s4 + $0x70] sm:$0xff]  }
  0xd9   : > { %v770_v32 = vpop.permute.xlu1 %769 }
  0xda   : > { %v864_v44 = vadd.f32 %v835_v37, %v808_v38  ;;  %v801_v62 = vmul.f32 %v791_v24, %v770_v32  ;;  %v6514_v37 = vld [vmem:[%s8631_s4 + $0x78] sm:$0xff]   ;;  %v6517_v38 = vld [vmem:[%s8631_s4 + $0x80] sm:$0xff]  }
  0xdb   : > { %v1488_v32 = vld [vmem:[%s8632_s5] sm:$0xff] }
  0xdc   : > { %v872_v48 = vmax.f32 %v864_v44, 0.0  ;;  %v809_v8 = vadd.f32 %v801_v62, %v728_v2  ;;  %v1497_v44 = vld [vmem:[%s8632_s5 + $0x48] sm:$0xff] }
  0xde   : > { %v850_v54 = vpop.permute.xlu1 %849  ;;  %882 = vrot.lane.b32.xlu1 %v872_v48, %s8649_s23 }
  0xdf   : > { %v867_v51 = vadd.f32 %v850_v54, %v811_v50  ;;  %v1489_v50 = vld [vmem:[%s8632_s5 + $0x8] sm:$0xff] }
  0xe1   : > { %v6929_v55 = vmax.f32 %v867_v51, 0.0 }
  0xe2   : > { %v597_v41 = vpop.permute.xlu1 %596  ;;  %906 = vrot.lane.b32.xlu1 %v872_v48, %s8651_s30 }
  0xe3   : > { %v965_v40 = vpack.c.bf16 %v6929_v55, %v874_v52  ;;  %v644_v5 = vmul.f32 %v637_v19, %v597_v41 }
  0xe5   : > { %5994 = vmatprep.subr.bf16.mxu0 %v965_v40 }
  0xe6   : > { %890 = vrot.lane.b32.xlu1 %v876_v11, %s8649_s23  ;;  %5995 = vmatpush3.bf16.msra.mxu0 %v965_v40 }
  0xe7   : > { %v677_v53 = vpop.permute.xlu1 %676 }
  0xe8   : > { %v717_v4 = vmul.f32 %v710_v18, %v677_v53 }
  0xea   : > { %914 = vrot.lane.b32.xlu1 %v876_v11, %s8651_s30  ;;  %v725_v56 = vadd.f32 %v717_v4, %v644_v5 }
  0xec   : > { %v758_v57 = vpop.permute.xlu1 %757 }
  0xed   : > { %v798_v6 = vmul.f32 %v791_v24, %v758_v57 }
  0xee   : > { %886 = vrot.lane.b32.xlu1 %v874_v52, %s8649_s23 }
  0xef   : > { %v806_v14 = vadd.f32 %v798_v6, %v725_v56 }
  0xf0   : > { %v762_v0 = vpop.permute.xlu1 %761 }
  0xf1   : > { %v799_v1 = vmul.f32 %v791_v24, %v762_v0  ;;  %v1500_v24 = vld [vmem:[%s8632_s5 + $0x60] sm:$0xff] }
  0xf2   : > { %910 = vrot.lane.b32.xlu1 %v874_v52, %s8651_s30 }
  0xf3   : > { %v807_v7 = vadd.f32 %v799_v1, %v726_v3 }
  0xf5   : > { %v840_v9 = vpop.permute.xlu1 %839  ;;  %v863_v11 = vadd.f32 %v830_v63, %v807_v7 }
  0xf6   : > { %v865_v10 = vadd.f32 %v840_v9, %v809_v8 }
  0xf7   : > { %v871_v20 = vmax.f32 %v863_v11, 0.0 }
  0xf8   : > { %v873_v13 = vmax.f32 %v865_v10, 0.0 }
  0xf9   : > { %v825_v15 = vpop.permute.xlu1 %824 }
  0xfa   : > { %v862_v16 = vadd.f32 %v825_v15, %v806_v14  ;;  %884 = vrot.lane.b32.xlu0 %v873_v13, %s8649_s23  ;;  %v964_v17 = vpack.c.bf16 %v873_v13, %v872_v48  ;;  %v1493_v48 = vld [vmem:[%s8632_s5 + $0x28] sm:$0xff] }
  0xfc   : > { %v870_v18 = vmax.f32 %v862_v16, 0.0  ;;  %5996 = vmatprep.subr.bf16.mxu0 %v964_v17 }
  0xfd   : > { %5997 = vmatpush3.bf16.msra.mxu0 %v964_v17 }
  0xfe   : > { %908 = vrot.lane.b32.xlu0 %v873_v13, %s8651_s30  ;;  %878 = vrot.lane.b32.xlu1 %v870_v18, %s8649_s23  ;;  %v963_v19 = vpack.c.bf16 %v871_v20, %v870_v18 }
 0x100   : > { %5998 = vmatprep.subr.bf16.mxu0 %v963_v19 }
 0x101   : > { %5999 = vmatpush3.bf16.msra.mxu0 %v963_v19 }
 0x102   : > { %892 = vrot.lane.b32.xlu0 %v6922_v12, %s8649_s23  ;;  %902 = vrot.lane.b32.xlu1 %v870_v18, %s8651_s30  ;;  %s8689_s23 = smov 127  }
 0x104   : > { %6001 = vmatmul.mubr.msk.bf16.vlgmr.msra.gmra.mxu0 %vm1007_vm0, %v6508_v21 }
 0x105   : > { %6004 = vmatprep.mubr.msk.bf16.mxu0 %vm1007_vm0, %v6509_v22 }
 0x106   : > { %916 = vrot.lane.b32.xlu0 %v6922_v12, %s8651_s30  ;;  %1576 = vperm.xlu1 %6506, %v1502_v23   ;;  %v6515_v12 = vld [vmem:[%s8631_s4] sm:$0xff]   ;;  %s5089_s30 = scalar_lea.sflag [#allocation4], %s539_s1 }
 0x107   : > { %6024 = vmatprep.mubr.msk.bf16.mxu1 %vm1007_vm0, %v6515_v12  ;;  %v6520_v12 = vld [vmem:[%s8631_s4 + $0x18] sm:$0xff]  }
 0x10a   : > { %888 = vrot.lane.b32.xlu0 %v6929_v55, %s8688_s25  ;;  %1566 = vperm.xlu1 %6506, %v1500_v24   ;;  %v6516_v24 = vld [vmem:[%s8631_s4 + $0x8] sm:$0xff]  }
 0x10c   : > { %6005 = vmatmul.mubr.msk.bf16.gmra.mxu0 %vm1007_vm0, %v6510_v25 }
 0x10d   : > { %6008 = vmatprep.mubr.msk.bf16.mxu0 %vm1007_vm0, %v6511_v26  ;;  %v6518_v26 = vld [vmem:[%s8631_s4 + $0x88] sm:$0xff]  }
 0x10e   : > { %912 = vrot.lane.b32.xlu0 %v6929_v55, %s8689_s23  ;;  %1556 = vperm.xlu1 %6506, %v1498_v27   ;;  %v6523_v27 = vld [vmem:[%s8631_s4 + $0x20] sm:$0xff]  }
 0x112   : > { %880 = vrot.lane.b32.xlu0 %v871_v20, %s8688_s25  ;;  %1546 = vperm.xlu1 %6506, %v1496_v28   ;;  %v6522_v28 = vld [vmem:[%s8631_s4 + $0x98] sm:$0xff]  }
 0x114   : > { %6009 = vmatmul.mubr.msk.bf16.gmra.mxu0 %vm1007_vm0, %v6512_v29  ;;  %v6525_v29 = vld [vmem:[%s8631_s4 + $0xa0] sm:$0xff]  }
 0x115   : > { %6012 = vmatprep.mubr.msk.bf16.mxu0 %vm1007_vm0, %v6513_v30  ;;  %v6524_v30 = vld [vmem:[%s8631_s4 + $0x28] sm:$0xff]  }
 0x116   : > { %904 = vrot.lane.b32.xlu0 %v871_v20, %s8689_s23  ;;  %1536 = vperm.xlu1 %6506, %v1494_v33   ;;  %v6527_v33 = vld [vmem:[%s8631_s4 + $0x30] sm:$0xff]  }
 0x11a   : > { %1581 = vperm.xlu0 %6504, %v1503_v34   ;;  %1526 = vperm.xlu1 %6506, %v1492_v36   ;;  %v6526_v34 = vld [vmem:[%s8631_s4 + $0xa8] sm:$0xff]   ;;  %v6529_v36 = vld [vmem:[%s8631_s4 + $0xb0] sm:$0xff]  }
 0x11c   : > { %6013 = vmatmul.mubr.msk.bf16.gmra.mxu0 %vm1007_vm0, %v6514_v37  ;;  %v6528_v37 = vld [vmem:[%s8631_s4 + $0x38] sm:$0xff]  }
 0x11d   : > { %6048 = vmatprep.mubr.msk.bf16.mxu0 %vm1007_vm0, %v6517_v38  ;;  %v6530_v38 = vld [vmem:[%s8631_s4 + $0xb8] sm:$0xff]  }
 0x11e   : > { %1571 = vperm.xlu0 %6504, %v1501_v39   ;;  %1516 = vperm.xlu1 %6506, %v1490_v42  }
 0x122   : > { %1561 = vperm.xlu0 %6504, %v1499_v43   ;;  %1506 = vperm.xlu1 %6506, %v1488_v32  }
 0x126   : > { %1551 = vperm.xlu0 %6504, %v1497_v44  }
 0x12a   : > { %1541 = vperm.xlu0 %6504, %v1495_v45  }
 0x12e   : > { %1531 = vperm.xlu0 %6504, %v1493_v48  }
 0x132   : > { %1521 = vperm.xlu0 %6504, %v1491_v49  }
 0x136   : > { %1511 = vperm.xlu0 %6504, %v1489_v50  }
 0x150   : > { %v883_v54 = vpop.permute.xlu1 %882 }
 0x151   : > { %v896_v6 = vmul.f32 %v6903_v31, %v883_v54 }
 0x154   : > { %v907_v51 = vpop.permute.xlu1 %906 }
 0x155   : > { %v920_v13 = vmul.f32 %v6909_v35, %v907_v51 }
 0x158   : > { %v891_v52 = vpop.permute.xlu1 %890 }
 0x159   : > { %v900_v53 = vmul.f32 %v6903_v31, %v891_v52 }
 0x15c   : > { %v915_v41 = vpop.permute.xlu1 %914 }
 0x15d   : > { %v924_v61 = vmul.f32 %v6909_v35, %v915_v41 }
 0x160   : > { %v887_v58 = vpop.permute.xlu1 %886 }
 0x161   : > { %v898_v3 = vmul.f32 %v6903_v31, %v887_v58 }
 0x164   : > { %v911_v1 = vpop.permute.xlu1 %910 }
 0x165   : > { %v922_v56 = vmul.f32 %v6909_v35, %v911_v1 }
 0x16c   : > { %v885_v55 = vpop.permute.xlu0 %884 }
 0x16d   : > { %v897_v4 = vmul.f32 %v6903_v31, %v885_v55 }
 0x16f   : > { %v943_v10 = vpack.c.bf16 %v897_v4, %v896_v6 }
 0x170   : > { %v909_v40 = vpop.permute.xlu0 %908  ;;  %v879_v8 = vpop.permute.xlu1 %878 }
 0x171   : > { %v921_v63 = vmul.f32 %v6909_v35, %v909_v40  ;;  %v894_v17 = vmul.f32 %v6903_v31, %v879_v8 }
 0x173   : > { %v1308_v16 = vpack.c.bf16 %v921_v63, %v920_v13 }
 0x174   : > { %v893_v46 = vpop.permute.xlu0 %892  ;;  %v903_v18 = vpop.permute.xlu1 %902 }
 0x175   : > { %v901_v57 = vmul.f32 %v6903_v31, %v893_v46  ;;  %v918_v22 = vmul.f32 %v6909_v35, %v903_v18 }
 0x177   : > { %v945_v59 = vpack.c.bf16 %v901_v57, %v900_v53 }
 0x178   : > { %v917_v60 = vpop.permute.xlu0 %916 }
 0x179   : > { %v925_v62 = vmul.f32 %v6909_v35, %v917_v60  ;;  %6016 = vmatprep.subr.bf16.mxu1 %v945_v59 }
 0x17a   : > { %6017 = vmatpush3.bf16.msra.mxu1 %v945_v59 }
 0x17b   : > { %v1310_v0 = vpack.c.bf16 %v925_v62, %v924_v61 }
 0x17c   : > { %v889_v2 = vpop.permute.xlu0 %888 }
 0x17d   : > { %v899_v5 = vmul.f32 %v6903_v31, %v889_v2  ;;  %6040 = vmatprep.subr.bf16.mxu0 %v1310_v0 }
 0x17e   : > { %6041 = vmatpush3.bf16.msra.mxu0 %v1310_v0 }
 0x17f   : > { %v944_v7 = vpack.c.bf16 %v899_v5, %v898_v3  ;;  %v6531_v5 = vld [vmem:[%s8633_s6 + $0x80] sm:$0xff]  }
 0x180   : > { %v913_v9 = vpop.permute.xlu0 %912 }
 0x181   : > { %v923_v11 = vmul.f32 %v6909_v35, %v913_v9  ;;  %6018 = vmatprep.subr.bf16.mxu1 %v944_v7  ;;  %v7125_v55 = vpop.permute.xlu1 %1576 }
 0x182   : > { %6019 = vmatpush3.bf16.msra.mxu1 %v944_v7 }
 0x183   : > { %v1309_v14 = vpack.c.bf16 %v923_v11, %v922_v56  ;;  %6020 = vmatprep.subr.bf16.mxu1 %v943_v10 }
 0x184   : > { %v881_v15 = vpop.permute.xlu0 %880 }
 0x185   : > { %v895_v20 = vmul.f32 %v6903_v31, %v881_v15  ;;  %6042 = vmatprep.subr.bf16.mxu0 %v1309_v14  ;;  %v6519_v31 = vld [vmem:[%s8631_s4 + $0x10] sm:$0xff]   ;;  %v7131_v53 = vpop.permute.xlu1 %1566 }
 0x186   : > { %6021 = vmatpush3.bf16.msra.mxu1 %v943_v10  ;;  %6043 = vmatpush3.bf16.msra.mxu0 %v1309_v14 }
 0x187   : > { %v942_v19 = vpack.c.bf16 %v895_v20, %v894_v17  ;;  %6044 = vmatprep.subr.bf16.mxu0 %v1308_v16 }
 0x188   : > { %v905_v21 = vpop.permute.xlu0 %904 }
 0x189   : > { %v919_v23 = vmul.f32 %v6909_v35, %v905_v21  ;;  %6022 = vmatprep.subr.bf16.mxu1 %v942_v19  ;;  %v6521_v35 = vld [vmem:[%s8631_s4 + $0x90] sm:$0xff]   ;;  %v1557_v60 = vpop.permute.xlu1 %1556 }
 0x18a   : > { %6023 = vmatpush3.bf16.msra.mxu1 %v942_v19  ;;  %6045 = vmatpush3.bf16.msra.mxu0 %v1308_v16 }
 0x18b   : > { %v1307_v25 = vpack.c.bf16 %v919_v23, %v918_v22 }
 0x18d   : > { %6025 = vmatmul.mubr.msk.bf16.vlgmr.msra.gmra.mxu1 %vm1007_vm0, %v6516_v24  ;;  %6046 = vmatprep.subr.bf16.mxu0 %v1307_v25  ;;  %v1547_v6 = vpop.permute.xlu1 %1546 }
 0x18e   : > { %6047 = vmatpush3.bf16.msra.mxu0 %v1307_v25  ;;  %6028 = vmatprep.mubr.msk.bf16.mxu1 %vm1007_vm0, %v6519_v31 }
 0x191   : > { %6049 = vmatmul.mubr.msk.bf16.vlgmr.msra.gmra.mxu0 %vm1007_vm0, %v6518_v26  ;;  %v1537_v14 = vpop.permute.xlu1 %1536 }
 0x192   : > { %6052 = vmatprep.mubr.msk.bf16.mxu0 %vm1007_vm0, %v6521_v35 }
 0x195   : > { %6029 = vmatmul.mubr.msk.bf16.gmra.mxu1 %vm1007_vm0, %v6520_v12  ;;  %v7127_v40 = vpop.permute.xlu0 %1581 }
 0x196   : > { %6032 = vmatprep.mubr.msk.bf16.mxu1 %vm1007_vm0, %v6523_v27 }
 0x199   : > { %6053 = vmatmul.mubr.msk.bf16.gmra.mxu0 %vm1007_vm0, %v6522_v28  ;;  %v7135_v58 = vpop.permute.xlu0 %1571 }
 0x19a   : > { %6056 = vmatprep.mubr.msk.bf16.mxu0 %vm1007_vm0, %v6525_v29 }
 0x19d   : > { %6033 = vmatmul.mubr.msk.bf16.gmra.mxu1 %vm1007_vm0, %v6524_v30  ;;  %v1562_v2 = vpop.permute.xlu0 %1561 }
 0x19e   : > { %6036 = vmatprep.mubr.msk.bf16.mxu1 %vm1007_vm0, %v6527_v33 }
 0x1a1   : > { %6057 = vmatmul.mubr.msk.bf16.gmra.mxu0 %vm1007_vm0, %v6526_v34  ;;  %v1552_v10 = vpop.permute.xlu0 %1551 }
 0x1a2   : > { %6060 = vmatprep.mubr.msk.bf16.mxu0 %vm1007_vm0, %v6529_v36 }
 0x1a5   : > { %6037 = vmatmul.mubr.msk.bf16.gmra.mxu1 %vm1007_vm0, %v6528_v37  ;;  %v1542_v22 = vpop.permute.xlu0 %1541 }
 0x1a6   : > { %6080 = vmatprep.mubr.bf16.mxu1 %v6531_v5 }
 0x1a9   : > { %6061 = vmatmul.mubr.msk.bf16.gmra.mxu0 %vm1007_vm0, %v6530_v38 }
 0x1c4   : > { %v7113_v39 = vpop.f32.mrf.mxu0 }
 0x1c6   : > { %v7115_v42 = vpop.f32.mrf.mxu0 }
 0x1c8   : > { %v7117_v43 = vpop.f32.mrf.mxu0 }
 0x1ca   : > { %v7119_v32 = vpop.f32.mrf.mxu0 }
 0x1cc   : > { %v6006_v44 = vpop.f32.mrf.mxu0 }
 0x1ce   : > { %v7121_v45 = vpop.f32.mrf.mxu0 }
 0x1d0   : > { %v6007_v48 = vpop.f32.mrf.mxu0 }
 0x1d2   : > { %v7123_v49 = vpop.f32.mrf.mxu0 }
 0x1d4   : > { %v6010_v50 = vpop.f32.mrf.mxu0 }
 0x1d6   : > { %v1098_v54 = vpop.f32.mrf.mxu0 }
 0x1d8   : > { %v6011_v51 = vpop.f32.mrf.mxu0 }
 0x1da   : > { %v1101_v52 = vpop.f32.mrf.mxu0 }
 0x1dc   : > { %v6014_v41 = vpop.f32.mrf.mxu0 }
 0x1de   : > { %v7129_v46 = vpop.f32.mrf.mxu0 }
 0x1e0   : > { %v7133_v57 = vpop.f32.mrf.mxu0 }
 0x1e2   : > { %v7139_v61 = vpop.f32.mrf.mxu0 }
 0x24d   : > { %v7137_v59 = vpop.f32.mrf.mxu1 }
 0x24f   : > { %v7141_v62 = vpop.f32.mrf.mxu1 }
 0x251   : > { %v7143_v0 = vpop.f32.mrf.mxu1  ;;  %v7145_v1 = vpop.f32.mrf.mxu0 }
 0x253   : > { %v7147_v3 = vpop.f32.mrf.mxu1  ;;  %v7149_v4 = vpop.f32.mrf.mxu0 }
 0x255   : > { %v6030_v7 = vpop.f32.mrf.mxu1  ;;  %v7154_v8 = vpop.f32.mrf.mxu0 }
 0x256   : > { %v1252_v63 = vadd.f32 %v6030_v7, %v6006_v44 }
 0x257   : > { %v7156_v9 = vpop.f32.mrf.mxu1  ;;  %v7158_v56 = vpop.f32.mrf.mxu0 }
 0x259   : > { %v6031_v11 = vpop.f32.mrf.mxu1  ;;  %v6054_v13 = vpop.f32.mrf.mxu0 }
 0x25a   : > { %v1478_v15 = vadd.f32 %v6054_v13, %v1252_v63  ;;  %v1255_v20 = vadd.f32 %v6031_v11, %v6007_v48 }
 0x25b   : > { %v7160_v16 = vpop.f32.mrf.mxu1  ;;  %v7162_v17 = vpop.f32.mrf.mxu0 }
 0x25c   : > { %v1590_v18 = vadd.f32 %v1537_v14, %v1478_v15 }
 0x25d   : > { %v6034_v19 = vpop.f32.mrf.mxu1  ;;  %v6055_v21 = vpop.f32.mrf.mxu0 }
 0x25e   : > { %v7164_v23 = vmax.f32 %v1590_v18, 0.0  ;;  %v1479_v24 = vadd.f32 %v6055_v21, %v1255_v20  ;;  %v1268_v26 = vadd.f32 %v6034_v19, %v6010_v50 }
 0x25f   : > { %v1259_v31 = vpop.f32.mrf.mxu1  ;;  %v7166_v25 = vpop.f32.mrf.mxu0 }
 0x260   : > { %v1591_v35 = vadd.f32 %v1542_v22, %v1479_v24  ;;  %1628 = vrot.lane.b32.xlu1 %v7164_v23, %s8688_s25  ;;  %v1260_v30 = vadd.f32 %v1259_v31, %v1098_v54 }
 0x261   : > { %v6035_v12 = vpop.f32.mrf.mxu1  ;;  %v6058_v27 = vpop.f32.mrf.mxu0 }
 0x262   : > { %v7170_v28 = vmax.f32 %v1591_v35, 0.0  ;;  %v1482_v29 = vadd.f32 %v6058_v27, %v1268_v26  ;;  %v1271_v36 = vadd.f32 %v6035_v12, %v6011_v51 }
 0x263   : > { %v1262_v33 = vpop.f32.mrf.mxu1  ;;  %v1441_v34 = vpop.f32.mrf.mxu0 }
 0x264   : > { %v1594_v37 = vadd.f32 %v1557_v60, %v1482_v29  ;;  %1676 = vrot.lane.b32.xlu1 %v7164_v23, %s8689_s23  ;;  %1630 = vrot.lane.b32.xlu0 %v7170_v28, %s8688_s25  ;;  %v1480_v38 = vadd.f32 %v1441_v34, %v1260_v30  ;;  %v1263_v11 = vadd.f32 %v1262_v33, %v1101_v52 }
 0x265   : > { %v6038_v44 = vpop.f32.mrf.mxu1  ;;  %v6059_v48 = vpop.f32.mrf.mxu0 }
 0x266   : > { %v1610_v50 = vmax.f32 %v1594_v37, 0.0  ;;  %v1483_v5 = vadd.f32 %v6059_v48, %v1271_v36  ;;  %v1284_v13 = vadd.f32 %v6038_v44, %v6014_v41  ;;  %v1592_v51 = vadd.f32 %v1547_v6, %v1480_v38  ;;  %v1527_v44 = vpop.permute.xlu1 %1526 }
 0x267   : > { %v1275_v7 = vpop.f32.mrf.mxu1  ;;  %v1444_v63 = vpop.f32.mrf.mxu0  ;;  %v1244_v36 = vadd.f32 %v7156_v9, %v7121_v45  ;;  %v1239_v48 = vadd.f32 %v7143_v0, %v7117_v43  ;;  %v1231_v43 = vadd.f32 %v7147_v3, %v7119_v32 }
 0x268   : > { %v1595_v54 = vadd.f32 %v1562_v2, %v1483_v5  ;;  %1678 = vrot.lane.b32.xlu0 %v7170_v28, %s8689_s23  ;;  %1636 = vrot.lane.b32.xlu1 %v1610_v50, %s8688_s25  ;;  %v1276_v20 = vadd.f32 %v1275_v7, %v7129_v46  ;;  %v1481_v18 = vadd.f32 %v1444_v63, %v1263_v11  ;;  %v1608_v41 = vmax.f32 %v1592_v51, 0.0 }
 0x269   : > { %v6039_v60 = vpop.f32.mrf.mxu1  ;;  %v6062_v14 = vpop.f32.mrf.mxu0  ;;  %v1476_v5 = vadd.f32 %v7162_v17, %v1244_v36  ;;  %v1475_v45 = vadd.f32 %v7154_v8, %v1239_v48  ;;  %v1473_v8 = vadd.f32 %v7158_v56, %v1231_v43  ;;  %v1788_v63 = vpack.c.bf16 %v7170_v28, %v7164_v23  ;;  %v2652_v36 = vld [vmem:[%s8634_s7 + $0x78] sm:$0xff]  ;;  %v6545_v48 = vld [vmem:[%s8633_s6 + $0xf0] sm:$0xff]  }
 0x26a   : > { %v1611_v15 = vmax.f32 %v1595_v54, 0.0  ;;  %v1486_v19 = vadd.f32 %v6062_v14, %v1284_v13  ;;  %v1287_v24 = vadd.f32 %v6039_v60, %v7133_v57  ;;  %v1593_v31 = vadd.f32 %v1552_v10, %v1481_v18  ;;  %v1517_v17 = vpop.permute.xlu1 %1516  ;;  %v6532_v14 = vld [vmem:[%s8633_s6 + $0x88] sm:$0xff]   ;;  %v6534_v18 = vld [vmem:[%s8633_s6 + $0x98] sm:$0xff]  }
 0x26b   : > { %v1278_v21 = vpop.f32.mrf.mxu1  ;;  %v1457_v22 = vpop.f32.mrf.mxu0  ;;  %v1588_v0 = vadd.f32 %v1527_v44, %v1476_v5  ;;  %v6544_v44 = vld [vmem:[%s8633_s6 + $0xe8] sm:$0xff]   ;;  %v2657_v5 = vld [vmem:[%s8634_s7 + $0xa0] sm:$0xff]  ;;  %v2660_v43 = vld [vmem:[%s8634_s7 + $0xb8] sm:$0xff] }
 0x26c   : > { %v1484_v52 = vadd.f32 %v1457_v22, %v1276_v20  ;;  %1684 = vrot.lane.b32.xlu1 %v1610_v50, %s8689_s23  ;;  %1638 = vrot.lane.b32.xlu0 %v1611_v15, %s8688_s25  ;;  %v1598_v6 = vadd.f32 %v7125_v55, %v1486_v19  ;;  %v1279_v26 = vadd.f32 %v1278_v21, %v7139_v61  ;;  %v1609_v10 = vmax.f32 %v1593_v31, 0.0  ;;  %v6547_v20 = vld [vmem:[%s8633_s6] sm:$0xff]   ;;  %v2639_v22 = vld [vmem:[%s8634_s7 + $0x10] sm:$0xff] }
 0x26d   : > { %v6063_v2 = vpop.f32.mrf.mxu0  ;;  %v1790_v38 = vpack.c.bf16 %v1611_v15, %v1610_v50  ;;  %v1604_v3 = vmax.f32 %v1588_v0, 0.0  ;;  %6128 = vmatprep.mubr.bf16.mxu0 %v6547_v20  ;;  %v6535_v19 = vld [vmem:[%s8633_s6 + $0xa0] sm:$0xff]   ;;  %v2640_v31 = vld [vmem:[%s8634_s7 + $0x18] sm:$0xff]  ;;  %v2663_v0 = vld [vmem:[%s8634_s7 + $0xd0] sm:$0xff] }
 0x26e   : > { %v1487_v35 = vadd.f32 %v6063_v2, %v1287_v24  ;;  %v1596_v12 = vadd.f32 %v7131_v53, %v1484_v52  ;;  %v1614_v57 = vmax.f32 %v1598_v6, 0.0  ;;  %v1507_v56 = vpop.permute.xlu1 %1506  ;;  %v2637_v21 = vld [vmem:[%s8634_s7] sm:$0xff]  ;;  %v2638_v24 = vld [vmem:[%s8634_s7 + $0x8] sm:$0xff]  ;;  %v2643_v6 = vld [vmem:[%s8634_s7 + $0x30] sm:$0xff] }
 0x26f   : > { %v1460_v46 = vpop.f32.mrf.mxu0  ;;  %v6536_v52 = vld [vmem:[%s8633_s6 + $0xa8] sm:$0xff]   ;;  %v2641_v2 = vld [vmem:[%s8634_s7 + $0x20] sm:$0xff] }
 0x270   : > { %v1599_v27 = vadd.f32 %v7127_v40, %v1487_v35  ;;  %v1485_v29 = vadd.f32 %v1460_v46, %v1279_v26  ;;  %1632 = vrot.lane.b32.xlu1 %v1608_v41, %s8688_s25  ;;  %1686 = vrot.lane.b32.xlu0 %v1611_v15, %s8689_s23  ;;  %v1612_v34 = vmax.f32 %v1596_v12, 0.0  ;;  %v1247_v40 = vadd.f32 %v7160_v16, %v7123_v49  ;;  %v6533_v15 = vld [vmem:[%s8633_s6 + $0x90] sm:$0xff]   ;;  %v2642_v26 = vld [vmem:[%s8634_s7 + $0x28] sm:$0xff] }
 0x271   : > { %v1236_v49 = vadd.f32 %v7137_v59, %v7113_v39  ;;  %v1789_v16 = vpack.c.bf16 %v1609_v10, %v1608_v41  ;;  %v1228_v39 = vadd.f32 %v7141_v62, %v7115_v42  ;;  %v6538_v35 = vld [vmem:[%s8633_s6 + $0xb8] sm:$0xff]   ;;  %v6539_v46 = vld [vmem:[%s8633_s6 + $0xc0] sm:$0xff]  }
 0x272   : > { %v1615_v30 = vmax.f32 %v1599_v27, 0.0  ;;  %v1597_v33 = vadd.f32 %v7135_v58, %v1485_v29  ;;  %v1532_v58 = vpop.permute.xlu0 %1531  ;;  %v1477_v37 = vadd.f32 %v7166_v25, %v1247_v40  ;;  %v2645_v12 = vld [vmem:[%s8634_s7 + $0x40] sm:$0xff]  ;;  %v2644_v27 = vld [vmem:[%s8634_s7 + $0x38] sm:$0xff]  ;;  %v2647_v29 = vld [vmem:[%s8634_s7 + $0x50] sm:$0xff] }
 0x273   : > { %v1474_v50 = vadd.f32 %v7145_v1, %v1236_v49  ;;  %v1472_v32 = vadd.f32 %v7149_v4, %v1228_v39  ;;  %v6543_v40 = vld [vmem:[%s8633_s6 + $0xe0] sm:$0xff]   ;;  %v2656_v49 = vld [vmem:[%s8634_s7 + $0x98] sm:$0xff] }
 0x274   : > { %v1613_v55 = vmax.f32 %v1597_v33, 0.0  ;;  %1680 = vrot.lane.b32.xlu1 %v1608_v41, %s8689_s23  ;;  %1634 = vrot.lane.b32.xlu0 %v1609_v10, %s8688_s25  ;;  %v1792_v61 = vpack.c.bf16 %v1615_v30, %v1614_v57  ;;  %v1589_v9 = vadd.f32 %v1532_v58, %v1477_v37  ;;  %v6537_v41 = vld [vmem:[%s8633_s6 + $0xb0] sm:$0xff]   ;;  %v2653_v58 = vld [vmem:[%s8634_s7 + $0x80] sm:$0xff] }
 0x275   : > { %v1586_v1 = vadd.f32 %v1517_v17, %v1474_v50  ;;  %v1584_v28 = vadd.f32 %v1507_v56, %v1472_v32  ;;  %v6541_v33 = vld [vmem:[%s8633_s6 + $0xd0] sm:$0xff]   ;;  %v2661_v50 = vld [vmem:[%s8634_s7 + $0xc0] sm:$0xff]  ;;  %v2662_v17 = vld [vmem:[%s8634_s7 + $0xc8] sm:$0xff] }
 0x276   : > { %6064 = vmatprep.subr.bf16.mxu1 %v1792_v61  ;;  %v1791_v53 = vpack.c.bf16 %v1613_v55, %v1612_v34  ;;  %v1522_v25 = vpop.permute.xlu0 %1521  ;;  %v1605_v7 = vmax.f32 %v1589_v9, 0.0  ;;  %v2655_v37 = vld [vmem:[%s8634_s7 + $0x90] sm:$0xff]  ;;  %v2658_v9 = vld [vmem:[%s8634_s7 + $0xa8] sm:$0xff]  ;;  %v3948_v20 = vld [vmem:[%s8637_s10 + $0x40] sm:$0xff] }
 0x277   : > { %6065 = vmatpush3.bf16.msra.mxu1 %v1792_v61  ;;  %v1587_v59 = vadd.f32 %v1522_v25, %v1475_v45  ;;  %v1602_v23 = vmax.f32 %v1586_v1, 0.0  ;;  %v1600_v4 = vmax.f32 %v1584_v28, 0.0  ;;  %v2650_v61 = vld [vmem:[%s8634_s7 + $0x68] sm:$0xff]  ;;  %v2659_v45 = vld [vmem:[%s8634_s7 + $0xb0] sm:$0xff]  ;;  %v6549_v25 = vld [vmem:[%s8633_s6 + $0x100] sm:$0xff]  }
 0x278   : > { %1682 = vrot.lane.b32.xlu0 %v1609_v10, %s8689_s23  ;;  %1644 = vrot.lane.b32.xlu1 %v1614_v57, %s8688_s25  ;;  %v1787_v62 = vpack.c.bf16 %v1605_v7, %v1604_v3  ;;  %v2649_v10 = vld [vmem:[%s8634_s7 + $0x60] sm:$0xff]  ;;  %v2667_v1 = vld [vmem:[%s8634_s7 + $0xf0] sm:$0xff] }
 0x279   : > { %6066 = vmatprep.subr.bf16.mxu1 %v1791_v53  ;;  %v1603_v13 = vmax.f32 %v1587_v59, 0.0  ;;  %v2665_v59 = vld [vmem:[%s8634_s7 + $0xe0] sm:$0xff]  ;;  %v2666_v32 = vld [vmem:[%s8634_s7 + $0xe8] sm:$0xff]  ;;  %v3955_v28 = vld [vmem:[%s8637_s10 + $0x78] sm:$0xff] }
 0x27a   : > { %v1512_v11 = vpop.permute.xlu0 %1511 }
 0x27b   : > { %6067 = vmatpush3.bf16.msra.mxu1 %v1791_v53  ;;  %v1585_v42 = vadd.f32 %v1512_v11, %v1473_v8  ;;  %v1786_v51 = vpack.c.bf16 %v1603_v13, %v1602_v23  ;;  %v6542_v53 = vld [vmem:[%s8633_s6 + $0xd8] sm:$0xff]  }
 0x27c   : > { %1692 = vrot.lane.b32.xlu1 %v1614_v57, %s8689_s23  ;;  %1646 = vrot.lane.b32.xlu0 %v1615_v30, %s8688_s25  ;;  %v2646_v57 = vld [vmem:[%s8634_s7 + $0x48] sm:$0xff]  ;;  %v2664_v8 = vld [vmem:[%s8634_s7 + $0xd8] sm:$0xff] }
 0x27d   : > { %6068 = vmatprep.subr.bf16.mxu1 %v1790_v38  ;;  %v1601_v54 = vmax.f32 %v1585_v42, 0.0  ;;  %v2668_v42 = vld [vmem:[%s8634_s7 + $0xf8] sm:$0xff] }
 0x27f   : > { %6069 = vmatpush3.bf16.msra.mxu1 %v1790_v38  ;;  %v1785_v60 = vpack.c.bf16 %v1601_v54, %v1600_v4  ;;  %v2654_v38 = vld [vmem:[%s8634_s7 + $0x88] sm:$0xff] }
 0x280   : > { %1640 = vrot.lane.b32.xlu1 %v1612_v34, %s8688_s25  ;;  %1694 = vrot.lane.b32.xlu0 %v1615_v30, %s8689_s23  ;;  %v6540_v30 = vld [vmem:[%s8633_s6 + $0xc8] sm:$0xff]  }
 0x281   : > { %6070 = vmatprep.subr.bf16.mxu1 %v1789_v16 }
 0x283   : > { %6071 = vmatpush3.bf16.msra.mxu1 %v1789_v16  ;;  %v6546_v16 = vld [vmem:[%s8633_s6 + $0xf8] sm:$0xff]  }
 0x284   : > { %1688 = vrot.lane.b32.xlu1 %v1612_v34, %s8689_s23  ;;  %1642 = vrot.lane.b32.xlu0 %v1613_v55, %s8688_s25  ;;  %v2648_v34 = vld [vmem:[%s8634_s7 + $0x58] sm:$0xff] }
 0x285   : > { %6072 = vmatprep.subr.bf16.mxu1 %v1788_v63 }
 0x287   : > { %6073 = vmatpush3.bf16.msra.mxu1 %v1788_v63 }
 0x288   : > { %1624 = vrot.lane.b32.xlu1 %v1604_v3, %s8688_s25  ;;  %1690 = vrot.lane.b32.xlu0 %v1613_v55, %s8689_s23  ;;  %v2651_v55 = vld [vmem:[%s8634_s7 + $0x70] sm:$0xff] }
 0x289   : > { %6074 = vmatprep.subr.bf16.mxu1 %v1787_v62 }
 0x28b   : > { %6075 = vmatpush3.bf16.msra.mxu1 %v1787_v62 }
 0x28c   : > { %1672 = vrot.lane.b32.xlu1 %v1604_v3, %s8689_s23  ;;  %1626 = vrot.lane.b32.xlu0 %v1605_v7, %s8688_s25 }
 0x28d   : > { %6076 = vmatprep.subr.bf16.mxu1 %v1786_v51 }
 0x28f   : > { %6077 = vmatpush3.bf16.msra.mxu1 %v1786_v51 }
 0x290   : > { %1620 = vrot.lane.b32.xlu1 %v1602_v23, %s8688_s25  ;;  %1674 = vrot.lane.b32.xlu0 %v1605_v7, %s8689_s23 }
 0x291   : > { %6078 = vmatprep.subr.bf16.mxu1 %v1785_v60 }
 0x293   : > { %6079 = vmatpush3.bf16.msra.mxu1 %v1785_v60  ;;  %v3953_v60 = vld [vmem:[%s8637_s10 + $0x68] sm:$0xff] }
 0x294   : > { %1668 = vrot.lane.b32.xlu1 %v1602_v23, %s8689_s23  ;;  %1622 = vrot.lane.b32.xlu0 %v1603_v13, %s8688_s25  ;;  %v3952_v23 = vld [vmem:[%s8637_s10 + $0x60] sm:$0xff] }
 0x296   : > { %6081 = vmatmul.mubr.bf16.vlgmr.msra.gmra.mxu1 %v6532_v14 }
 0x297   : > { %6084 = vmatprep.mubr.bf16.mxu1 %v6533_v15 }
 0x298   : > { %1616 = vrot.lane.b32.xlu1 %v1600_v4, %s8688_s25  ;;  %1670 = vrot.lane.b32.xlu0 %v1603_v13, %s8689_s23  ;;  %v3954_v13 = vld [vmem:[%s8637_s10 + $0x70] sm:$0xff] }
 0x29c   : > { %1664 = vrot.lane.b32.xlu1 %v1600_v4, %s8689_s23  ;;  %1618 = vrot.lane.b32.xlu0 %v1601_v54, %s8688_s25  ;;  %v3950_v4 = vld [vmem:[%s8637_s10 + $0x50] sm:$0xff]  ;;  %s5508_s25 = sshll.u32 %s6808_s16, 4  ;;  %s6629_s16 = scalar_lea.vmem %s6628_s24, 32 }
 0x29d   : > { %s8592_s21 = scalar_lea.hbm %s8644_s17, %s5508_s25  ;;  %p6631_p1 = scmp.lt.s32.totalorder %s6629_s16, %s6623_s18 }
 0x29e   : > { %6085 = vmatmul.mubr.bf16.gmra.mxu1 %v6534_v18  ;;  %v3951_v18 = vld [vmem:[%s8637_s10 + $0x58] sm:$0xff] }
 0x29f   : > { %6088 = vmatprep.mubr.bf16.mxu1 %v6535_v19  ;;  %p6632_p2 = por %p6631_p1, %p6630_p0 }
 0x2a0   : > { %2671 = vperm.xlu1 %6506, %v2637_v21   ;;  %1666 = vrot.lane.b32.xlu0 %v1601_v54, %s8689_s23 }
 0x2a1   : > { %p6633_p3 = pnand %p6632_p2, %p6626_p13 }
 0x2a4   : > { %2681 = vperm.xlu1 %6506, %v2639_v22   ;;  %2676 = vperm.xlu0 %6504, %v2638_v24   ;;  %v3946_v22 = vld [vmem:[%s8637_s10 + $0x30] sm:$0xff]  ;;  %v3949_v24 = vld [vmem:[%s8637_s10 + $0x48] sm:$0xff] }
 0x2a6   : > { %6089 = vmatmul.mubr.bf16.gmra.mxu1 %v6536_v52 }
 0x2a7   : > { %6092 = vmatprep.mubr.bf16.mxu1 %v6537_v41 }
 0x2a8   : > { %2691 = vperm.xlu1 %6506, %v2641_v2   ;;  %2686 = vperm.xlu0 %6504, %v2640_v31   ;;  %v7426_v2 = vld [vmem:[%s8686_s19] ss:$0 sm:$0xff] }
 0x2ac   : > { %2701 = vperm.xlu1 %6506, %v2643_v6   ;;  %2696 = vperm.xlu0 %6504, %v2642_v26  }
 0x2ae   : > { %6093 = vmatmul.mubr.bf16.gmra.mxu1 %v6538_v35  ;;  %v3944_v35 = vld [vmem:[%s8637_s10 + $0x20] sm:$0xff] }
 0x2af   : > { %6096 = vmatprep.mubr.bf16.mxu1 %v6539_v46 }
 0x2b0   : > { %2711 = vperm.xlu1 %6506, %v2645_v12   ;;  %2706 = vperm.xlu0 %6504, %v2644_v27   ;;  %v3947_v27 = vld [vmem:[%s8637_s10 + $0x38] sm:$0xff] }
 0x2b4   : > { %2721 = vperm.xlu1 %6506, %v2647_v29   ;;  %2716 = vperm.xlu0 %6504, %v2646_v57   ;;  %v7439_v29 = vld [vmem:[%s8686_s19 + $0x1] ss:$0 sm:$0xff] }
 0x2b6   : > { %6097 = vmatmul.mubr.bf16.gmra.mxu1 %v6540_v30 }
 0x2b7   : > { %6100 = vmatprep.mubr.bf16.mxu1 %v6541_v33 }
 0x2b8   : > { %2731 = vperm.xlu1 %6506, %v2649_v10   ;;  %2726 = vperm.xlu0 %6504, %v2648_v34   ;;  %v3942_v10 = vld [vmem:[%s8637_s10 + $0x10] sm:$0xff] }
 0x2bc   : > { %2741 = vperm.xlu1 %6506, %v2651_v55   ;;  %2736 = vperm.xlu0 %6504, %v2650_v61   ;;  %v3945_v61 = vld [vmem:[%s8637_s10 + $0x28] sm:$0xff] }
 0x2be   : > { %6101 = vmatmul.mubr.bf16.gmra.mxu1 %v6542_v53 }
 0x2bf   : > { %6104 = vmatprep.mubr.bf16.mxu1 %v6543_v40 }
 0x2c0   : > { %2751 = vperm.xlu1 %6506, %v2653_v58   ;;  %2746 = vperm.xlu0 %6504, %v2652_v36  }
 0x2c4   : > { %2761 = vperm.xlu1 %6506, %v2655_v37   ;;  %2756 = vperm.xlu0 %6504, %v2654_v38   ;;  %v3940_v38 = vld [vmem:[%s8637_s10] sm:$0xff] }
 0x2c6   : > { %6105 = vmatmul.mubr.bf16.gmra.mxu1 %v6544_v44 }
 0x2c7   : > { %6108 = vmatprep.mubr.bf16.mxu1 %v6545_v48 }
 0x2c8   : > { %2771 = vperm.xlu1 %6506, %v2657_v5   ;;  %2766 = vperm.xlu0 %6504, %v2656_v49   ;;  %v3943_v5 = vld [vmem:[%s8637_s10 + $0x18] sm:$0xff] }
 0x2cc   : > { %2781 = vperm.xlu1 %6506, %v2659_v45   ;;  %2776 = vperm.xlu0 %6504, %v2658_v9  }
 0x2ce   : > { %6109 = vmatmul.mubr.bf16.gmra.mxu1 %v6546_v16 }
 0x2cf   : > { %6176 = vmatprep.mubr.bf16.mxu1 %v6549_v25 }
 0x2d0   : > { %2791 = vperm.xlu1 %6506, %v2661_v50   ;;  %2786 = vperm.xlu0 %6504, %v2660_v43   ;;  %v4782_v43 = vld [vmem:[%s8639_s12 + $0x30] sm:$0xff] }
 0x2d2   : > { %v7365_v39 = vpop.permute.xlu1 %1628 }
 0x2d4   : > { %2801 = vperm.xlu1 %6506, %v2663_v0   ;;  %2796 = vperm.xlu0 %6504, %v2662_v17  }
 0x2d6   : > { %v7373_v7 = vpop.permute.xlu1 %1676  ;;  %v7375_v63 = vpop.permute.xlu0 %1630 }
 0x2d8   : > { %2811 = vperm.xlu1 %6506, %v2665_v59   ;;  %2806 = vperm.xlu0 %6504, %v2664_v8  }
 0x2da   : > { %v7383_v3 = vpop.permute.xlu0 %1678  ;;  %v1637_v11 = vpop.permute.xlu1 %1636 }
 0x2db   : > { %v1658_v36 = vmul.f32 %v7426_v2, %v1637_v11 }
 0x2dc   : > { %2821 = vperm.xlu1 %6506, %v2667_v1   ;;  %2816 = vperm.xlu0 %6504, %v2666_v32   ;;  %v3941_v1 = vld [vmem:[%s8637_s10 + $0x8] sm:$0xff]  ;;  %v1655_v32 = vmul.f32 %v7426_v2, %v7375_v63 }
 0x2de   : > { %v7391_v62 = vpop.permute.xlu1 %1684  ;;  %v1639_v56 = vpop.permute.xlu0 %1638 }
 0x2df   : > { %v1659_v53 = vmul.f32 %v7426_v2, %v1639_v56  ;;  %v1706_v0 = vmul.f32 %v7439_v29, %v7391_v62  ;;  %v4780_v62 = vld [vmem:[%s8639_s12 + $0x20] sm:$0xff]  ;;  %v1654_v56 = vmul.f32 %v7426_v2, %v7365_v39  ;;  %v1702_v39 = vmul.f32 %v7439_v29, %v7373_v7 }
 0x2e0   : > { %4028 = vperm.xlu1 %6506, %v3954_v13   ;;  %2826 = vperm.xlu0 %6504, %v2668_v42  }
 0x2e1   : > { %v1749_v49 = vpack.c.bf16 %v1659_v53, %v1658_v36 }
 0x2e2   : > { %v7399_v54 = vpop.permute.xlu1 %1632  ;;  %v1687_v51 = vpop.permute.xlu0 %1686 }
 0x2e3   : > { %v1707_v16 = vmul.f32 %v7439_v29, %v1687_v51  ;;  %v1656_v17 = vmul.f32 %v7426_v2, %v7399_v54  ;;  %v4783_v54 = vld [vmem:[%s8639_s12 + $0x38] sm:$0xff]  ;;  %v1703_v51 = vmul.f32 %v7439_v29, %v7383_v3 }
 0x2e4   : > { %4018 = vperm.xlu1 %6506, %v3952_v23   ;;  %4033 = vperm.xlu0 %6504, %v3955_v28  }
 0x2e5   : > { %v2345_v11 = vpack.c.bf16 %v1707_v16, %v1706_v0  ;;  %v6581_v16 = vld [vmem:[%s8635_s8 + $0x30] sm:$0xff]   ;;  %v6552_v0 = vld [vmem:[%s8633_s6 + $0x18] sm:$0xff]  }
 0x2e6   : > { %v7407_v14 = vpop.permute.xlu1 %1680  ;;  %v1635_v15 = vpop.permute.xlu0 %1634 }
 0x2e7   : > { %v1657_v25 = vmul.f32 %v7426_v2, %v1635_v15  ;;  %v1704_v63 = vmul.f32 %v7439_v29, %v7407_v14  ;;  %v4778_v14 = vld [vmem:[%s8639_s12 + $0x10] sm:$0xff] }
 0x2e8   : > { %4008 = vperm.xlu1 %6506, %v3950_v4   ;;  %4023 = vperm.xlu0 %6504, %v3953_v60   ;;  %v1747_v4 = vpack.c.bf16 %v1655_v32, %v1654_v56  ;;  %v6557_v32 = vld [vmem:[%s8633_s6 + $0x120] sm:$0xff]   ;;  %v6560_v56 = vld [vmem:[%s8633_s6 + $0x38] sm:$0xff]  }
 0x2e9   : > { %v1748_v13 = vpack.c.bf16 %v1657_v25, %v1656_v17  ;;  %v6550_v25 = vld [vmem:[%s8633_s6 + $0x108] sm:$0xff]  }
 0x2ea   : > { %v7415_v19 = vpop.permute.xlu0 %1682  ;;  %v1645_v21 = vpop.permute.xlu1 %1644  ;;  %v6583_v17 = vld [vmem:[%s8635_s8 + $0x28] sm:$0xff]  }
 0x2eb   : > { %v1662_v31 = vmul.f32 %v7426_v2, %v1645_v21  ;;  %v1705_v42 = vmul.f32 %v7439_v29, %v7415_v19  ;;  %v4781_v19 = vld [vmem:[%s8639_s12 + $0x28] sm:$0xff]  ;;  %v2343_v21 = vpack.c.bf16 %v1703_v51, %v1702_v39  ;;  %v6567_v51 = vld [vmem:[%s8633_s6 + $0x50] sm:$0xff]   ;;  %v6571_v39 = vld [vmem:[%s8633_s6 + $0x60] sm:$0xff]  }
 0x2ec   : > { %3998 = vperm.xlu1 %6506, %v3948_v20   ;;  %4013 = vperm.xlu0 %6504, %v3951_v18  }
 0x2ed   : > { %v2344_v60 = vpack.c.bf16 %v1705_v42, %v1704_v63  ;;  %v6558_v42 = vld [vmem:[%s8633_s6 + $0x128] sm:$0xff]   ;;  %v6563_v63 = vld [vmem:[%s8633_s6 + $0x40] sm:$0xff]  }
 0x2ee   : > { %v1693_v52 = vpop.permute.xlu1 %1692  ;;  %v1647_v41 = vpop.permute.xlu0 %1646 }
 0x2ef   : > { %v1663_v6 = vmul.f32 %v7426_v2, %v1647_v41  ;;  %v1710_v57 = vmul.f32 %v7439_v29, %v1693_v52  ;;  %v4776_v52 = vld [vmem:[%s8639_s12] sm:$0xff] }
 0x2f0   : > { %3988 = vperm.xlu1 %6506, %v3946_v22   ;;  %4003 = vperm.xlu0 %6504, %v3949_v24  }
 0x2f1   : > { %v1751_v26 = vpack.c.bf16 %v1663_v6, %v1662_v31 }
 0x2f2   : > { %v1641_v46 = vpop.permute.xlu1 %1640  ;;  %v1695_v12 = vpop.permute.xlu0 %1694 }
 0x2f3   : > { %v1711_v30 = vmul.f32 %v7439_v29, %v1695_v12  ;;  %6112 = vmatprep.subr.bf16.mxu0 %v1751_v26  ;;  %v1660_v40 = vmul.f32 %v7426_v2, %v1641_v46 }
 0x2f4   : > { %3978 = vperm.xlu1 %6506, %v3944_v35   ;;  %6113 = vmatpush3.bf16.msra.mxu0 %v1751_v26  ;;  %v4779_v35 = vld [vmem:[%s8639_s12 + $0x18] sm:$0xff] }
 0x2f5   : > { %v2347_v33 = vpack.c.bf16 %v1711_v30, %v1710_v57  ;;  %3993 = vperm.xlu0 %6504, %v3947_v27   ;;  %v4931_v57 = vld [vmem:[%s8641_s14 + $0x10] sm:$0xff] }
 0x2f6   : > { %v1689_v34 = vpop.permute.xlu1 %1688  ;;  %v1643_v55 = vpop.permute.xlu0 %1642 }
 0x2f7   : > { %v1661_v58 = vmul.f32 %v7426_v2, %v1643_v55  ;;  %6160 = vmatprep.subr.bf16.mxu1 %v2347_v33  ;;  %v1708_v45 = vmul.f32 %v7439_v29, %v1689_v34 }
 0x2f8   : > { %3968 = vperm.xlu1 %6506, %v3942_v10   ;;  %6161 = vmatpush3.bf16.msra.mxu1 %v2347_v33  ;;  %v4777_v10 = vld [vmem:[%s8639_s12 + $0x8] sm:$0xff] }
 0x2f9   : > { %v1750_v37 = vpack.c.bf16 %v1661_v58, %v1660_v40  ;;  %3983 = vperm.xlu0 %6504, %v3945_v61   ;;  %v4929_v58 = vld [vmem:[%s8641_s14] sm:$0xff] }
 0x2fa   : > { %v1625_v44 = vpop.permute.xlu1 %1624  ;;  %v1691_v48 = vpop.permute.xlu0 %1690 }
 0x2fb   : > { %v1709_v9 = vmul.f32 %v7439_v29, %v1691_v48  ;;  %6114 = vmatprep.subr.bf16.mxu0 %v1750_v37  ;;  %v1652_v20 = vmul.f32 %v7426_v2, %v1625_v44  ;;  %v6548_v44 = vld [vmem:[%s8633_s6 + $0x8] sm:$0xff]   ;;  %v6551_v48 = vld [vmem:[%s8633_s6 + $0x10] sm:$0xff]  }
 0x2fc   : > { %3958 = vperm.xlu1 %6506, %v3940_v38   ;;  %6115 = vmatpush3.bf16.msra.mxu0 %v1750_v37  ;;  %v4932_v37 = vld [vmem:[%s8641_s14 + $0x18] sm:$0xff] }
 0x2fd   : > { %v2346_v50 = vpack.c.bf16 %v1709_v9, %v1708_v45  ;;  %3973 = vperm.xlu0 %6504, %v3943_v5   ;;  %6116 = vmatprep.subr.bf16.mxu0 %v1749_v49  ;;  %v6579_v5 = vld [vmem:[%s8635_s8 + $0x38] sm:$0xff]   ;;  %v5025_v45 = vld [vmem:[#allocation2] sm:$0x1] }
 0x2fe   : > { %v1673_v59 = vpop.permute.xlu1 %1672  ;;  %v1627_v8 = vpop.permute.xlu0 %1626  ;;  %v6580_v9 = vld [vmem:[%s8635_s8 + $0x78] sm:$0xff]  }
 0x2ff   : > { %6162 = vmatprep.subr.bf16.mxu1 %v2346_v50  ;;  %v1653_v15 = vmul.f32 %v7426_v2, %v1627_v8  ;;  %v1700_v41 = vmul.f32 %v7439_v29, %v1673_v59  ;;  %v6555_v59 = vld [vmem:[%s8633_s6 + $0x20] sm:$0xff]   ;;  %v6584_v8 = vld [vmem:[%s8635_s8 + $0x68] sm:$0xff]  }
 0x300   : > { %4816 = vperm.xlu1 %6506, %v4782_v43   ;;  %6117 = vmatpush3.bf16.msra.mxu0 %v1749_v49  ;;  %v6582_v43 = vld [vmem:[%s8635_s8 + $0x70] sm:$0xff]  }
 0x301   : > { %3963 = vperm.xlu0 %6504, %v3941_v1   ;;  %6163 = vmatpush3.bf16.msra.mxu1 %v2346_v50  ;;  %v1746_v22 = vpack.c.bf16 %v1653_v15, %v1652_v20  ;;  %v6553_v50 = vld [vmem:[%s8633_s6 + $0x110] sm:$0xff]   ;;  %v6554_v1 = vld [vmem:[%s8633_s6 + $0x118] sm:$0xff]   ;;  %v6573_v20 = vld [vmem:[%s8633_s6 + $0x160] sm:$0xff]  }
 0x302   : > { %6118 = vmatprep.subr.bf16.mxu0 %v1748_v13  ;;  %6164 = vmatprep.subr.bf16.mxu1 %v2345_v11  ;;  %v1621_v23 = vpop.permute.xlu1 %1620  ;;  %v1675_v28 = vpop.permute.xlu0 %1674  ;;  %v6568_v15 = vld [vmem:[%s8633_s6 + $0x58] sm:$0xff]  }
 0x303   : > { %v1701_v7 = vmul.f32 %v7439_v29, %v1675_v28  ;;  %v1650_v31 = vmul.f32 %v7426_v2, %v1621_v23  ;;  %v6562_v23 = vld [vmem:[%s8633_s6 + $0x138] sm:$0xff]   ;;  %v6565_v28 = vld [vmem:[%s8633_s6 + $0x140] sm:$0xff]  }
 0x304   : > { %4806 = vperm.xlu1 %6506, %v4780_v62   ;;  %6119 = vmatpush3.bf16.msra.mxu0 %v1748_v13  ;;  %v6559_v13 = vld [vmem:[%s8633_s6 + $0x30] sm:$0xff]  }
 0x305   : > { %4821 = vperm.xlu0 %6504, %v4783_v54   ;;  %6165 = vmatpush3.bf16.msra.mxu1 %v2345_v11  ;;  %v2342_v46 = vpack.c.bf16 %v1701_v7, %v1700_v41  ;;  %v6556_v11 = vld [vmem:[%s8633_s6 + $0x28] sm:$0xff]   ;;  %v6561_v62 = vld [vmem:[%s8633_s6 + $0x130] sm:$0xff]   ;;  %v6578_v7 = vld [vmem:[%s8633_s6 + $0x178] sm:$0xff]  }
 0x306   : > { %6120 = vmatprep.subr.bf16.mxu0 %v1747_v4  ;;  %6166 = vmatprep.subr.bf16.mxu1 %v2344_v60  ;;  %v1669_v3 = vpop.permute.xlu1 %1668  ;;  %v1623_v18 = vpop.permute.xlu0 %1622  ;;  %v6564_v54 = vld [vmem:[%s8633_s6 + $0x48] sm:$0xff]   ;;  %v6587_v41 = vld [vmem:[%s8635_s8 + $0x18] sm:$0xff]  }
 0x307   : > { %v1651_v24 = vmul.f32 %v7426_v2, %v1623_v18  ;;  %v1698_v30 = vmul.f32 %v7439_v29, %v1669_v3  ;;  %v6572_v3 = vld [vmem:[%s8633_s6 + $0x68] sm:$0xff]   ;;  %v6575_v18 = vld [vmem:[%s8633_s6 + $0x70] sm:$0xff]  }
 0x308   : > { %4796 = vperm.xlu1 %6506, %v4778_v14   ;;  %6121 = vmatpush3.bf16.msra.mxu0 %v1747_v4  ;;  %v6566_v4 = vld [vmem:[%s8633_s6 + $0x148] sm:$0xff]   ;;  %v6570_v14 = vld [vmem:[%s8633_s6 + $0x158] sm:$0xff]  }
 0x309   : > { %4811 = vperm.xlu0 %6504, %v4781_v19   ;;  %6167 = vmatpush3.bf16.msra.mxu1 %v2344_v60  ;;  %v1745_v12 = vpack.c.bf16 %v1651_v24, %v1650_v31  ;;  %v6569_v60 = vld [vmem:[%s8633_s6 + $0x150] sm:$0xff]   ;;  %v6574_v19 = vld [vmem:[%s8633_s6 + $0x168] sm:$0xff]   ;;  %v6585_v24 = vld [vmem:[%s8635_s8 + $0x20] sm:$0xff]  }
 0x30a   : > { %6122 = vmatprep.subr.bf16.mxu0 %v1746_v22  ;;  %6168 = vmatprep.subr.bf16.mxu1 %v2343_v21  ;;  %v1617_v6 = vpop.permute.xlu1 %1616  ;;  %v1671_v26 = vpop.permute.xlu0 %1670  ;;  %v6588_v31 = vld [vmem:[%s8635_s8 + $0x58] sm:$0xff]  }
 0x30b   : > { %v1699_v27 = vmul.f32 %v7439_v29, %v1671_v26  ;;  %v1648_v34 = vmul.f32 %v7426_v2, %v1617_v6  ;;  %v6589_v26 = vld [vmem:[%s8635_s8 + $0x10] sm:$0xff]  }
 0x30c   : > { %4786 = vperm.xlu1 %6506, %v4776_v52   ;;  %6123 = vmatpush3.bf16.msra.mxu0 %v1746_v22  ;;  %v6576_v22 = vld [vmem:[%s8633_s6 + $0x78] sm:$0xff]   ;;  %v6586_v52 = vld [vmem:[%s8635_s8 + $0x60] sm:$0xff]  }
 0x30d   : > { %4801 = vperm.xlu0 %6504, %v4779_v35   ;;  %6169 = vmatpush3.bf16.msra.mxu1 %v2343_v21  ;;  %v2341_v61 = vpack.c.bf16 %v1699_v27, %v1698_v30  ;;  %v6577_v21 = vld [vmem:[%s8633_s6 + $0x170] sm:$0xff]   ;;  %v6592_v27 = vld [vmem:[%s8635_s8 + $0x48] sm:$0xff]   ;;  %v6593_v30 = vld [vmem:[%s8635_s8] sm:$0xff]  }
 0x30e   : > { %6124 = vmatprep.subr.bf16.mxu0 %v1745_v12  ;;  %6170 = vmatprep.subr.bf16.mxu1 %v2342_v46  ;;  %v1619_v33 = vpop.permute.xlu0 %1618  ;;  %v1665_v53 = vpop.permute.xlu1 %1664  ;;  %v6590_v35 = vld [vmem:[%s8635_s8 + $0x50] sm:$0xff]  }
 0x30f   : > { %v1649_v55 = vmul.f32 %v7426_v2, %v1619_v33  ;;  %v1696_v38 = vmul.f32 %v7439_v29, %v1665_v53  ;;  %v6594_v33 = vld [vmem:[%s8635_s8 + $0x40] sm:$0xff]  }
 0x310   : > { %4945 = vperm.xlu1 %6506, %v4931_v57   ;;  %6125 = vmatpush3.bf16.msra.mxu0 %v1745_v12  ;;  %v6591_v12 = vld [vmem:[%s8635_s8 + $0x8] sm:$0xff]  }
 0x311   : > { %v1744_v40 = vpack.c.bf16 %v1649_v55, %v1648_v34  ;;  %4791 = vperm.xlu0 %6504, %v4777_v10   ;;  %6171 = vmatpush3.bf16.msra.mxu1 %v2342_v46 }
 0x312   : > { %6172 = vmatprep.subr.bf16.mxu1 %v2341_v61  ;;  %v1667_v36 = vpop.permute.xlu0 %1666 }
 0x313   : > { %v1697_v2 = vmul.f32 %v7439_v29, %v1667_v36  ;;  %6126 = vmatprep.subr.bf16.mxu0 %v1744_v40  ;;  %v4930_v29 = vld [vmem:[%s8641_s14 + $0x8] sm:$0xff] }
 0x314   : > { %4935 = vperm.xlu1 %6506, %v4929_v58   ;;  %6127 = vmatpush3.bf16.msra.mxu0 %v1744_v40 }
 0x315   : > { %v2340_v49 = vpack.c.bf16 %v1697_v2, %v1696_v38  ;;  %4950 = vperm.xlu0 %6504, %v4932_v37   ;;  %6173 = vmatpush3.bf16.msra.mxu1 %v2341_v61  ;;  %v7689_v38 = vld [vmem:[%s8635_s8 + $0xb8] sm:$0xff]  }
 0x316   : > { %6208 = vmatprep.subr.bf16.mxu0 %v6579_v5  ;;  %v7694_v2 = vld [vmem:[%s8635_s8 + $0xf8] sm:$0xff]  }
 0x317   : > { %6129 = vmatmul.mubr.bf16.vlgmr.msra.gmra.mxu0 %v6548_v44  ;;  %6174 = vmatprep.subr.bf16.mxu1 %v2340_v49 }
 0x318   : > { %5028 = vperm.xlu1 %6506, %v5025_v45   ;;  %6132 = vmatprep.mubr.bf16.mxu0 %v6551_v48 }
 0x319   : > { %4940 = vperm.xlu0 %6504, %v4930_v29   ;;  %6175 = vmatpush3.bf16.msra.mxu1 %v2340_v49 }
 0x31a   : > { %6256 = vmatprep.subr.bf16.mxu1 %v6580_v9  ;;  %6209 = vmatpush3.bf16.msra.mxu0 %v6579_v5 }
 0x31b   : > { %6210 = vmatprep.subr.bf16.mxu0 %v6581_v16 }
 0x31c   : > { %6177 = vmatmul.mubr.bf16.vlgmr.msra.gmra.mxu1 %v6550_v25 }
 0x31d   : > { %6180 = vmatprep.mubr.bf16.mxu1 %v6553_v50  ;;  %6257 = vmatpush3.bf16.msra.mxu1 %v6580_v9 }
 0x31e   : > { %6258 = vmatprep.subr.bf16.mxu1 %v6582_v43  ;;  %6211 = vmatpush3.bf16.msra.mxu0 %v6581_v16 }
 0x31f   : > { %6133 = vmatmul.mubr.bf16.gmra.mxu0 %v6552_v0  ;;  %6212 = vmatprep.subr.bf16.mxu0 %v6583_v17 }
 0x320   : > { %6136 = vmatprep.mubr.bf16.mxu0 %v6555_v59  ;;  %v2677_v59 = vpop.permute.xlu0 %2676 }
 0x321   : > { %6259 = vmatpush3.bf16.msra.mxu1 %v6582_v43 }
 0x322   : > { %6260 = vmatprep.subr.bf16.mxu1 %v6584_v8  ;;  %6213 = vmatpush3.bf16.msra.mxu0 %v6583_v17 }
 0x323   : > { %6214 = vmatprep.subr.bf16.mxu0 %v6585_v24 }
 0x324   : > { %6181 = vmatmul.mubr.bf16.gmra.mxu1 %v6554_v1 }
 0x325   : > { %6184 = vmatprep.mubr.bf16.mxu1 %v6557_v32  ;;  %6261 = vmatpush3.bf16.msra.mxu1 %v6584_v8  ;;  %v2672_v8 = vpop.permute.xlu1 %2671  ;;  %v2687_v32 = vpop.permute.xlu0 %2686 }
 0x326   : > { %6262 = vmatprep.subr.bf16.mxu1 %v6586_v52  ;;  %6215 = vmatpush3.bf16.msra.mxu0 %v6585_v24 }
 0x327   : > { %6137 = vmatmul.mubr.bf16.gmra.mxu0 %v6556_v11  ;;  %6216 = vmatprep.subr.bf16.mxu0 %v6587_v41 }
 0x328   : > { %6140 = vmatprep.mubr.bf16.mxu0 %v6559_v13 }
 0x329   : > { %6263 = vmatpush3.bf16.msra.mxu1 %v6586_v52  ;;  %v2682_v13 = vpop.permute.xlu1 %2681 }
 0x32a   : > { %6264 = vmatprep.subr.bf16.mxu1 %v6588_v31  ;;  %6217 = vmatpush3.bf16.msra.mxu0 %v6587_v41 }
 0x32b   : > { %6218 = vmatprep.subr.bf16.mxu0 %v6589_v26 }
 0x32c   : > { %6185 = vmatmul.mubr.bf16.gmra.mxu1 %v6558_v42 }
 0x32d   : > { %6188 = vmatprep.mubr.bf16.mxu1 %v6561_v62  ;;  %6265 = vmatpush3.bf16.msra.mxu1 %v6588_v31  ;;  %v7730_v62 = vpop.permute.xlu0 %2696 }
 0x32e   : > { %6266 = vmatprep.subr.bf16.mxu1 %v6590_v35  ;;  %6219 = vmatpush3.bf16.msra.mxu0 %v6589_v26 }
 0x32f   : > { %6141 = vmatmul.mubr.bf16.gmra.mxu0 %v6560_v56  ;;  %6220 = vmatprep.subr.bf16.mxu0 %v6591_v12  ;;  %v2692_v56 = vpop.permute.xlu1 %2691 }
 0x330   : > { %6144 = vmatprep.mubr.bf16.mxu0 %v6563_v63 }
 0x331   : > { %6267 = vmatpush3.bf16.msra.mxu1 %v6590_v35 }
 0x332   : > { %6268 = vmatprep.subr.bf16.mxu1 %v6592_v27  ;;  %6221 = vmatpush3.bf16.msra.mxu0 %v6591_v12 }
 0x333   : > { %6222 = vmatprep.subr.bf16.mxu0 %v6593_v30 }
 0x334   : > { %6189 = vmatmul.mubr.bf16.gmra.mxu1 %v6562_v23  ;;  %v2707_v23 = vpop.permute.xlu0 %2706 }
 0x335   : > { %6192 = vmatprep.mubr.bf16.mxu1 %v6565_v28  ;;  %6269 = vmatpush3.bf16.msra.mxu1 %v6592_v27 }
 0x336   : > { %6270 = vmatprep.subr.bf16.mxu1 %v6594_v33  ;;  %6223 = vmatpush3.bf16.msra.mxu0 %v6593_v30 }
 0x337   : > { %6145 = vmatmul.mubr.bf16.gmra.mxu0 %v6564_v54  ;;  %6304 = vmatprep.subr.bf16.mxu0 %v7689_v38  ;;  %v2702_v54 = vpop.permute.xlu1 %2701 }
 0x338   : > { %6148 = vmatprep.mubr.bf16.mxu0 %v6567_v51 }
 0x339   : > { %6271 = vmatpush3.bf16.msra.mxu1 %v6594_v33 }
 0x33a   : > { %6352 = vmatprep.subr.bf16.mxu1 %v7694_v2 }
 0x33c   : > { %6193 = vmatmul.mubr.bf16.gmra.mxu1 %v6566_v4 }
 0x33d   : > { %6196 = vmatprep.mubr.bf16.mxu1 %v6569_v60  ;;  %v7738_v60 = vpop.permute.xlu0 %2716 }
 0x33f   : > { %6149 = vmatmul.mubr.bf16.gmra.mxu0 %v6568_v15  ;;  %v7740_v15 = vpop.permute.xlu1 %2711 }
 0x340   : > { %6152 = vmatprep.mubr.bf16.mxu0 %v6571_v39 }
 0x343   : > { %v7747_v24 = vpop.permute.xlu1 %2721 }
 0x344   : > { %6197 = vmatmul.mubr.bf16.gmra.mxu1 %v6570_v14 }
 0x345   : > { %6200 = vmatprep.mubr.bf16.mxu1 %v6573_v20 }
 0x347   : > { %6153 = vmatmul.mubr.bf16.gmra.mxu0 %v6572_v3 }
 0x348   : > { %6156 = vmatprep.mubr.bf16.mxu0 %v6575_v18 }
 0x34c   : > { %6201 = vmatmul.mubr.bf16.gmra.mxu1 %v6574_v19 }
 0x34d   : > { %6204 = vmatprep.mubr.bf16.mxu1 %v6577_v21  ;;  %v7744_v21 = vpop.permute.xlu0 %2726 }
 0x34f   : > { %6157 = vmatmul.mubr.bf16.gmra.mxu0 %v6576_v22 }
 0x354   : > { %6205 = vmatmul.mubr.bf16.gmra.mxu1 %v6578_v7 }
 0x356   : > { %v7650_v6 = vpop.f32.mrf.mxu1 }
 0x358   : > { %v1923_v46 = vpop.f32.mrf.mxu1 }
 0x35a   : > { %v6083_v57 = vpop.f32.mrf.mxu1 }
 0x35c   : > { %v1926_v10 = vpop.f32.mrf.mxu1 }
 0x35e   : > { %v7670_v34 = vpop.f32.mrf.mxu1 }
 0x360   : > { %v7672_v55 = vpop.f32.mrf.mxu1 }
 0x362   : > { %v7674_v61 = vpop.f32.mrf.mxu1 }
 0x364   : > { %v7676_v53 = vpop.f32.mrf.mxu1 }
 0x366   : > { %v7678_v40 = vpop.f32.mrf.mxu1 }
 0x368   : > { %v7680_v58 = vpop.f32.mrf.mxu1 }
 0x36a   : > { %v7682_v36 = vpop.f32.mrf.mxu1 }
 0x36c   : > { %v7684_v37 = vpop.f32.mrf.mxu1 }
 0x36e   : > { %v7698_v44 = vpop.f32.mrf.mxu1 }
 0x370   : > { %v7700_v48 = vpop.f32.mrf.mxu1 }
 0x372   : > { %v7702_v5 = vpop.f32.mrf.mxu1 }
 0x374   : > { %v7704_v49 = vpop.f32.mrf.mxu1 }
 0x376   : > { %v7706_v45 = vpop.f32.mrf.mxu1 }
 0x378   : > { %v7708_v29 = vpop.f32.mrf.mxu1 }
 0x37a   : > { %v7710_v9 = vpop.f32.mrf.mxu1 }
 0x37c   : > { %v7712_v16 = vpop.f32.mrf.mxu1 }
 0x37e   : > { %v7714_v25 = vpop.f32.mrf.mxu1 }
 0x380   : > { %v7716_v50 = vpop.f32.mrf.mxu1 }
 0x382   : > { %v7718_v43 = vpop.f32.mrf.mxu1 }
 0x384   : > { %v7720_v0 = vpop.f32.mrf.mxu1 }
 0x386   : > { %v7722_v17 = vpop.f32.mrf.mxu1 }
 0x388   : > { %v7724_v1 = vpop.f32.mrf.mxu1 }
 0x38a   : > { %v7726_v11 = vpop.f32.mrf.mxu1 }
 0x38c   : > { %v7728_v42 = vpop.f32.mrf.mxu1 }
 0x38e   : > { %v7732_v63 = vpop.f32.mrf.mxu1 }
 0x38f   : > { %8690 = vst [vmem:[#allocation11_spill] sm:$0xff] %v7732_v63 }
 0x390   : > { %v7734_v28 = vpop.f32.mrf.mxu1 }
 0x392   : > { %v7736_v51 = vpop.f32.mrf.mxu1 }
 0x393   : > { %8691 = vst [vmem:[#allocation12_spill] sm:$0xff] %v7736_v51  ;;  %v7749_v51 = vpop.permute.xlu0 %2736 }
 0x394   : > { %v7742_v14 = vpop.f32.mrf.mxu1 }
 0x395   : > { %8692 = vst [vmem:[#allocation13_spill] sm:$0xff] %v7742_v14 }
 0x3d7   : > { %v6130_v4 = vpop.f32.mrf.mxu0 }
 0x3d8   : > { %v2189_v22 = vadd.f32 %v6130_v4, %v7650_v6  ;;  %v7751_v4 = vpop.permute.xlu1 %2731 }
 0x3d9   : > { %v2180_v39 = vpop.f32.mrf.mxu0 }
 0x3da   : > { %v2181_v18 = vadd.f32 %v2180_v39, %v1923_v46 }
 0x3db   : > { %v6131_v20 = vpop.f32.mrf.mxu0 }
 0x3dc   : > { %v6178_v3 = vpop.f32.mrf.mxu1  ;;  %v2192_v52 = vadd.f32 %v6131_v20, %v6083_v57 }
 0x3dd   : > { %v2183_v19 = vpop.f32.mrf.mxu0  ;;  %v2607_v26 = vadd.f32 %v6178_v3, %v2189_v22 }
 0x3de   : > { %v2478_v7 = vpop.f32.mrf.mxu1  ;;  %v2184_v12 = vadd.f32 %v2183_v19, %v1926_v10 }
 0x3df   : > { %v2605_v41 = vadd.f32 %v2478_v7, %v2181_v18  ;;  %v6134_v31 = vpop.f32.mrf.mxu0  ;;  %v2831_v63 = vadd.f32 %v2682_v13, %v2607_v26 }
 0x3e0   : > { %v6179_v35 = vpop.f32.mrf.mxu1  ;;  %v2205_v3 = vadd.f32 %v6134_v31, %v7670_v34 }
 0x3e1   : > { %v2608_v27 = vadd.f32 %v6179_v35, %v2192_v52  ;;  %v2196_v30 = vpop.f32.mrf.mxu0  ;;  %v2829_v47 = vadd.f32 %v2672_v8, %v2605_v41  ;;  %v2863_v41 = vmax.f32 %v2831_v63, 0.0  ;;  %v7769_v63 = vpop.permute.xlu1 %2741 }
 0x3e2   : > { %v2481_v33 = vpop.f32.mrf.mxu1  ;;  %v2197_v57 = vadd.f32 %v2196_v30, %v7672_v55 }
 0x3e3   : > { %v2832_v14 = vadd.f32 %v2687_v32, %v2608_v27  ;;  %v2606_v46 = vadd.f32 %v2481_v33, %v2184_v12  ;;  %v6135_v39 = vpop.f32.mrf.mxu0  ;;  %v2861_v22 = vmax.f32 %v2829_v47, 0.0  ;;  %v7759_v27 = vpop.permute.xlu0 %2746  ;;  %v6597_v47 = vld [vmem:[%s8635_s8 + $0xb0] sm:$0xff]  }
 0x3e4   : > { %v6182_v6 = vpop.f32.mrf.mxu1  ;;  %v2208_v8 = vadd.f32 %v6135_v39, %v7674_v61  ;;  %v6598_v61 = vld [vmem:[%s8635_s8 + $0xf0] sm:$0xff]  }
 0x3e5   : > { %v2830_v20 = vadd.f32 %v2677_v59, %v2606_v46  ;;  %v2199_v18 = vpop.f32.mrf.mxu0  ;;  %v2864_v10 = vmax.f32 %v2832_v14, 0.0  ;;  %v2611_v35 = vadd.f32 %v6182_v6, %v2205_v3 }
 0x3e6   : > { %v2494_v19 = vpop.f32.mrf.mxu1  ;;  %v2200_v12 = vadd.f32 %v2199_v18, %v7676_v53 }
 0x3e7   : > { %v2862_v7 = vmax.f32 %v2830_v20, 0.0  ;;  %v2609_v32 = vadd.f32 %v2494_v19, %v2197_v57  ;;  %v6138_v52 = vpop.f32.mrf.mxu0  ;;  %v7761_v34 = vpack.c.bf16 %v2864_v10, %v2863_v41  ;;  %v2835_v46 = vadd.f32 %v2702_v54, %v2611_v35  ;;  %v6599_v54 = vld [vmem:[%s8635_s8 + $0xa8] sm:$0xff]   ;;  %v7787_v19 = vpop.permute.xlu0 %2756 }
 0x3e8   : > { %v6183_v13 = vpop.f32.mrf.mxu1 }
 0x3e9   : > { %v7756_v26 = vpack.c.bf16 %v2862_v7, %v2861_v22  ;;  %v2612_v55 = vadd.f32 %v6183_v13, %v2208_v8  ;;  %v2212_v59 = vpop.f32.mrf.mxu0  ;;  %v2833_v31 = vadd.f32 %v2692_v56, %v2609_v32  ;;  %v2221_v56 = vadd.f32 %v6138_v52, %v7678_v40  ;;  %v7789_v8 = vpop.permute.xlu1 %2751 }
 0x3ea   : > { %v2497_v14 = vpop.f32.mrf.mxu1  ;;  %v2213_v6 = vadd.f32 %v2212_v59, %v7680_v58  ;;  %v6600_v58 = vld [vmem:[%s8635_s8 + $0xe8] sm:$0xff]   ;;  %v2867_v40 = vmax.f32 %v2835_v46, 0.0 }
 0x3eb   : > { %v2836_v30 = vadd.f32 %v2707_v23, %v2612_v55  ;;  %v2610_v53 = vadd.f32 %v2497_v14, %v2200_v12  ;;  %6224 = vmatprep.mubr.bf16.mxu0 %v7756_v26  ;;  %6272 = vmatprep.mubr.bf16.mxu1 %v7756_v26  ;;  %v6139_v33 = vpop.f32.mrf.mxu0  ;;  %v6601_v12 = vld [vmem:[%s8635_s8 + $0xa0] sm:$0xff]  }
 0x3ec   : > { %v6186_v39 = vpop.f32.mrf.mxu1  ;;  %6225 = vmatmul.mubr.bf16.vlgmr.msra.gmra.mxu0 %v7761_v34  ;;  %6273 = vmatmul.mubr.bf16.vlgmr.msra.gmra.mxu1 %v7761_v34  ;;  %v6602_v55 = vld [vmem:[%s8635_s8 + $0xe0] sm:$0xff]  }
 0x3ed   : > { %v2834_v57 = vadd.f32 %v7730_v62, %v2610_v53  ;;  %v2215_v20 = vpop.f32.mrf.mxu0  ;;  %6305 = vmatpush3.bf16.msra.mxu0 %v7689_v38  ;;  %6353 = vmatpush3.bf16.msra.mxu1 %v7694_v2  ;;  %v2868_v23 = vmax.f32 %v2836_v30, 0.0  ;;  %v2865_v62 = vmax.f32 %v2833_v31, 0.0  ;;  %v2224_v38 = vadd.f32 %v6139_v33, %v7682_v36 }
 0x3ee   : > { %v2510_v18 = vpop.f32.mrf.mxu1  ;;  %6306 = vmatprep.subr.bf16.mxu0 %v6597_v47  ;;  %6354 = vmatprep.subr.bf16.mxu1 %v6598_v61  ;;  %v2615_v22 = vadd.f32 %v6186_v39, %v2221_v56  ;;  %v2216_v52 = vadd.f32 %v2215_v20, %v7684_v37 }
 0x3ef   : > { %v2866_v3 = vmax.f32 %v2834_v57, 0.0  ;;  %v2613_v10 = vadd.f32 %v2510_v18, %v2213_v6  ;;  %v6142_v2 = vpop.f32.mrf.mxu0  ;;  %v7794_v13 = vpack.c.bf16 %v2868_v23, %v2867_v40  ;;  %v6606_v40 = vld [vmem:[%s8635_s8 + $0xd0] sm:$0xff]  }
 0x3f0   : > { %v6187_v7 = vpop.f32.mrf.mxu1  ;;  %v2237_v33 = vadd.f32 %v6142_v2, %v7698_v44 }
 0x3f1   : > { %v7791_v32 = vpack.c.bf16 %v2866_v3, %v2865_v62  ;;  %v2616_v41 = vadd.f32 %v6187_v7, %v2224_v38  ;;  %v2228_v35 = vpop.f32.mrf.mxu0  ;;  %6307 = vmatpush3.bf16.msra.mxu0 %v6597_v47  ;;  %6355 = vmatpush3.bf16.msra.mxu1 %v6598_v61  ;;  %v2837_v59 = vadd.f32 %v7740_v15, %v2613_v10 }
 0x3f2   : > { %v2513_v36 = vpop.f32.mrf.mxu1  ;;  %6308 = vmatprep.subr.bf16.mxu0 %v6599_v54  ;;  %6356 = vmatprep.subr.bf16.mxu1 %v6600_v58  ;;  %v2839_v61 = vadd.f32 %v7747_v24, %v2615_v22  ;;  %v2229_v30 = vadd.f32 %v2228_v35, %v7700_v48  ;;  %v6603_v24 = vld [vmem:[%s8635_s8 + $0x98] sm:$0xff]  }
 0x3f3   : > { %v2840_v37 = vadd.f32 %v7744_v21, %v2616_v41  ;;  %v2614_v14 = vadd.f32 %v2513_v36, %v2216_v52  ;;  %6228 = vmatprep.mubr.bf16.mxu0 %v7791_v32  ;;  %6276 = vmatprep.mubr.bf16.mxu1 %v7791_v32  ;;  %v6143_v47 = vpop.f32.mrf.mxu0  ;;  %v7811_v21 = vpop.permute.xlu0 %2766  ;;  %v6604_v48 = vld [vmem:[%s8635_s8 + $0xd8] sm:$0xff]   ;;  %v2869_v6 = vmax.f32 %v2837_v59, 0.0 }
 0x3f4   : > { %v6190_v31 = vpop.f32.mrf.mxu1  ;;  %6229 = vmatmul.mubr.bf16.gmra.mxu0 %v7794_v13  ;;  %6277 = vmatmul.mubr.bf16.gmra.mxu1 %v7794_v13  ;;  %v2240_v20 = vadd.f32 %v6143_v47, %v7702_v5  ;;  %v2871_v23 = vmax.f32 %v2839_v61, 0.0  ;;  %v6605_v5 = vld [vmem:[%s8635_s8 + $0x90] sm:$0xff]   ;;  %v6608_v47 = vld [vmem:[%s8635_s8 + $0xc8] sm:$0xff]  }
 0x3f5   : > { %v2838_v53 = vadd.f32 %v7738_v60, %v2614_v14  ;;  %v2231_v15 = vpop.f32.mrf.mxu0  ;;  %6309 = vmatpush3.bf16.msra.mxu0 %v6599_v54  ;;  %6357 = vmatpush3.bf16.msra.mxu1 %v6600_v58  ;;  %v2872_v46 = vmax.f32 %v2840_v37, 0.0  ;;  %v7820_v60 = vpop.permute.xlu1 %2761  ;;  %v2619_v18 = vadd.f32 %v6190_v31, %v2237_v33 }
 0x3f6   : > { %v2526_v39 = vpop.f32.mrf.mxu1  ;;  %6310 = vmatprep.subr.bf16.mxu0 %v6601_v12  ;;  %6358 = vmatprep.subr.bf16.mxu1 %v6602_v55  ;;  %v2232_v62 = vadd.f32 %v2231_v15, %v7704_v49 }
 0x3f7   : > { %v2870_v57 = vmax.f32 %v2838_v53, 0.0  ;;  %v2617_v56 = vadd.f32 %v2526_v39, %v2229_v30  ;;  %v6146_v44 = vpop.f32.mrf.mxu0  ;;  %v7826_v10 = vpack.c.bf16 %v2872_v46, %v2871_v23  ;;  %v7838_v41 = vpop.permute.xlu0 %2776  ;;  %v2843_v35 = vadd.f32 %v7769_v63, %v2619_v18  ;;  %v6607_v63 = vld [vmem:[%s8635_s8 + $0x88] sm:$0xff]  }
 0x3f8   : > { %v6191_v54 = vpop.f32.mrf.mxu1  ;;  %v2253_v59 = vadd.f32 %v6146_v44, %v7706_v45 }
 0x3f9   : > { %v7823_v58 = vpack.c.bf16 %v2870_v57, %v2869_v6  ;;  %v2620_v3 = vadd.f32 %v6191_v54, %v2240_v20  ;;  %v2244_v38 = vpop.f32.mrf.mxu0  ;;  %6311 = vmatpush3.bf16.msra.mxu0 %v6601_v12  ;;  %6359 = vmatpush3.bf16.msra.mxu1 %v6602_v55  ;;  %v2841_v22 = vadd.f32 %v7751_v4, %v2617_v56  ;;  %v7843_v12 = vpop.permute.xlu1 %2771  ;;  %v2875_v53 = vmax.f32 %v2843_v35, 0.0  ;;  %v6610_v20 = vld [vmem:[%s8635_s8 + $0xc0] sm:$0xff]  }
 0x3fa   : > { %v2529_v2 = vpop.f32.mrf.mxu1  ;;  %6312 = vmatprep.subr.bf16.mxu0 %v6603_v24  ;;  %6360 = vmatprep.subr.bf16.mxu1 %v6604_v48  ;;  %v2245_v4 = vadd.f32 %v2244_v38, %v7708_v29 }
 0x3fb   : > { %v2844_v49 = vadd.f32 %v7759_v27, %v2620_v3  ;;  %v2618_v7 = vadd.f32 %v2529_v2, %v2232_v62  ;;  %6232 = vmatprep.mubr.bf16.mxu0 %v7823_v58  ;;  %6280 = vmatprep.mubr.bf16.mxu1 %v7823_v58  ;;  %v6147_v52 = vpop.f32.mrf.mxu0  ;;  %v2873_v29 = vmax.f32 %v2841_v22, 0.0 }
 0x3fc   : > { %v6194_v36 = vpop.f32.mrf.mxu1  ;;  %6233 = vmatmul.mubr.bf16.gmra.mxu0 %v7826_v10  ;;  %6281 = vmatmul.mubr.bf16.gmra.mxu1 %v7826_v10 }
 0x3fd   : > { %v2842_v27 = vadd.f32 %v7749_v51, %v2618_v7  ;;  %v2247_v55 = vpop.f32.mrf.mxu0  ;;  %6313 = vmatpush3.bf16.msra.mxu0 %v6603_v24  ;;  %6361 = vmatpush3.bf16.msra.mxu1 %v6604_v48  ;;  %v2876_v37 = vmax.f32 %v2844_v49, 0.0  ;;  %v2256_v51 = vadd.f32 %v6147_v52, %v7710_v9  ;;  %v2623_v45 = vadd.f32 %v6194_v36, %v2253_v59  ;;  %v2787_v48 = vpop.permute.xlu0 %2786  ;;  %v6609_v9 = vld [vmem:[%s8635_s8 + $0x80] sm:$0xff]  }
 0x3fe   : > { %v2542_v14 = vpop.f32.mrf.mxu1  ;;  %6314 = vmatprep.subr.bf16.mxu0 %v6605_v5  ;;  %6362 = vmatprep.subr.bf16.mxu1 %v6606_v40  ;;  %v2248_v46 = vadd.f32 %v2247_v55, %v7712_v16  ;;  %v2782_v56 = vpop.permute.xlu1 %2781 }
 0x3ff   : > { %v2874_v61 = vmax.f32 %v2842_v27, 0.0  ;;  %v2621_v31 = vadd.f32 %v2542_v14, %v2245_v4  ;;  %v6150_v30 = vpop.f32.mrf.mxu0  ;;  %v7858_v6 = vpack.c.bf16 %v2876_v37, %v2875_v53  ;;  %v2847_v54 = vadd.f32 %v7820_v60, %v2623_v45 }
 0x400   : > { %v6195_v15 = vpop.f32.mrf.mxu1 }
 0x401   : > { %v7855_v33 = vpack.c.bf16 %v2874_v61, %v2873_v29  ;;  %v2624_v39 = vadd.f32 %v6195_v15, %v2256_v51  ;;  %v2260_v24 = vpop.f32.mrf.mxu0  ;;  %6315 = vmatpush3.bf16.msra.mxu0 %v6605_v5  ;;  %6363 = vmatpush3.bf16.msra.mxu1 %v6606_v40  ;;  %v2845_v16 = vadd.f32 %v7789_v8, %v2621_v31  ;;  %v2797_v52 = vpop.permute.xlu0 %2796  ;;  %v2879_v35 = vmax.f32 %v2847_v54, 0.0 }
 0x402   : > { %v2545_v57 = vpop.f32.mrf.mxu1  ;;  %6316 = vmatprep.subr.bf16.mxu0 %v6607_v63  ;;  %6364 = vmatprep.subr.bf16.mxu1 %v6608_v47  ;;  %v2261_v3 = vadd.f32 %v2260_v24, %v7716_v50 }
 0x403   : > { %v2848_v44 = vadd.f32 %v7811_v21, %v2624_v39  ;;  %v2622_v23 = vadd.f32 %v2545_v57, %v2248_v46  ;;  %6236 = vmatprep.mubr.bf16.mxu0 %v7855_v33  ;;  %6284 = vmatprep.mubr.bf16.mxu1 %v7855_v33  ;;  %v6151_v18 = vpop.f32.mrf.mxu0  ;;  %v2269_v21 = vadd.f32 %v6150_v30, %v7714_v25  ;;  %v2877_v40 = vmax.f32 %v2845_v16, 0.0 }
 0x404   : > { %v6198_v62 = vpop.f32.mrf.mxu1  ;;  %6237 = vmatmul.mubr.bf16.gmra.mxu0 %v7858_v6  ;;  %6285 = vmatmul.mubr.bf16.gmra.mxu1 %v7858_v6  ;;  %v2272_v22 = vadd.f32 %v6151_v18, %v7718_v43 }
 0x405   : > { %v2846_v38 = vadd.f32 %v7787_v19, %v2622_v23  ;;  %v2263_v8 = vpop.f32.mrf.mxu0  ;;  %6317 = vmatpush3.bf16.msra.mxu0 %v6607_v63  ;;  %6365 = vmatpush3.bf16.msra.mxu1 %v6608_v47  ;;  %v2880_v2 = vmax.f32 %v2848_v44, 0.0  ;;  %v2627_v50 = vadd.f32 %v6198_v62, %v2269_v21  ;;  %v2792_v19 = vpop.permute.xlu1 %2791 }
 0x406   : > { %v2558_v5 = vpop.f32.mrf.mxu1  ;;  %6318 = vmatprep.subr.bf16.mxu0 %v6609_v9  ;;  %6366 = vmatprep.subr.bf16.mxu1 %v6610_v20  ;;  %v2264_v27 = vadd.f32 %v2263_v8, %v7720_v0  ;;  %v2807_v30 = vpop.permute.xlu0 %2806 }
 0x407   : > { %v2878_v60 = vmax.f32 %v2846_v38, 0.0  ;;  %v2625_v49 = vadd.f32 %v2558_v5, %v2261_v3  ;;  %v6154_v7 = vpop.f32.mrf.mxu0  ;;  %v7880_v59 = vpack.c.bf16 %v2880_v2, %v2879_v35  ;;  %v2851_v29 = vadd.f32 %v2782_v56, %v2627_v50  ;;  %v8693_v5 = vld [vmem:[#allocation11_spill] sm:$0xff]  ;;  %v8694_v50 = vld [vmem:[#allocation12_spill] sm:$0xff] }
 0x408   : > { %v6199_v36 = vpop.f32.mrf.mxu1 }
 0x409   : > { %v7877_v4 = vpack.c.bf16 %v2878_v60, %v2877_v40  ;;  %v2628_v25 = vadd.f32 %v6199_v36, %v2272_v22  ;;  %v2276_v55 = vpop.f32.mrf.mxu0  ;;  %6319 = vmatpush3.bf16.msra.mxu0 %v6609_v9  ;;  %6367 = vmatpush3.bf16.msra.mxu1 %v6610_v20  ;;  %v2849_v43 = vadd.f32 %v7843_v12, %v2625_v49  ;;  %v2802_v15 = vpop.permute.xlu1 %2801  ;;  %v2883_v9 = vmax.f32 %v2851_v29, 0.0 }
 0x40a   : > { %v2561_v37 = vpop.f32.mrf.mxu1  ;;  %v2277_v0 = vadd.f32 %v2276_v55, %v7724_v1  ;;  %v2285_v12 = vadd.f32 %v6154_v7, %v7722_v17  ;;  %v2817_v3 = vpop.permute.xlu0 %2816 }
 0x40b   : > { %v2852_v14 = vadd.f32 %v2787_v48, %v2628_v25  ;;  %v2626_v63 = vadd.f32 %v2561_v37, %v2264_v27  ;;  %6240 = vmatprep.mubr.bf16.mxu0 %v7877_v4  ;;  %6288 = vmatprep.mubr.bf16.mxu1 %v7877_v4  ;;  %v6155_v47 = vpop.f32.mrf.mxu0  ;;  %v2881_v46 = vmax.f32 %v2849_v43, 0.0  ;;  %v8695_v43 = vld [vmem:[#allocation13_spill] sm:$0xff] }
 0x40c   : > { %v6202_v61 = vpop.f32.mrf.mxu1  ;;  %6241 = vmatmul.mubr.bf16.gmra.mxu0 %v7880_v59  ;;  %6289 = vmatmul.mubr.bf16.gmra.mxu1 %v7880_v59  ;;  %v2288_v24 = vadd.f32 %v6155_v47, %v7726_v11 }
 0x40d   : > { %v2850_v51 = vadd.f32 %v7838_v41, %v2626_v63  ;;  %v2279_v31 = vpop.f32.mrf.mxu0  ;;  %v2884_v53 = vmax.f32 %v2852_v14, 0.0  ;;  %v2631_v20 = vadd.f32 %v6202_v61, %v2285_v12 }
 0x40e   : > { %v2574_v45 = vpop.f32.mrf.mxu1  ;;  %v2280_v1 = vadd.f32 %v2279_v31, %v7728_v42  ;;  %v2812_v42 = vpop.permute.xlu1 %2811 }
 0x40f   : > { %v2882_v39 = vmax.f32 %v2850_v51, 0.0  ;;  %v2629_v48 = vadd.f32 %v2574_v45, %v2277_v0  ;;  %v6158_v57 = vpop.f32.mrf.mxu0  ;;  %v7894_v23 = vpack.c.bf16 %v2884_v53, %v2883_v9  ;;  %v2855_v38 = vadd.f32 %v2802_v15, %v2631_v20  ;;  %v2827_v47 = vpop.permute.xlu0 %2826 }
 0x410   : > { %v6203_v56 = vpop.f32.mrf.mxu1  ;;  %v2301_v40 = vadd.f32 %v6158_v57, %v8693_v5 }
 0x411   : > { %v7891_v16 = vpack.c.bf16 %v2882_v39, %v2881_v46  ;;  %v2632_v41 = vadd.f32 %v6203_v56, %v2288_v24  ;;  %v2292_v44 = vpop.f32.mrf.mxu0  ;;  %v2853_v18 = vadd.f32 %v2792_v19, %v2629_v48  ;;  %v2887_v27 = vmax.f32 %v2855_v38, 0.0 }
 0x412   : > { %v2577_v17 = vpop.f32.mrf.mxu1  ;;  %v2293_v21 = vadd.f32 %v2292_v44, %v7734_v28  ;;  %v2822_v29 = vpop.permute.xlu1 %2821 }
 0x413   : > { %v2856_v54 = vadd.f32 %v2807_v30, %v2632_v41  ;;  %v2630_v62 = vadd.f32 %v2577_v17, %v2280_v1  ;;  %6244 = vmatprep.mubr.bf16.mxu0 %v7891_v16  ;;  %6292 = vmatprep.mubr.bf16.mxu1 %v7891_v16  ;;  %v6159_v11 = vpop.f32.mrf.mxu0  ;;  %v2885_v7 = vmax.f32 %v2853_v18, 0.0 }
 0x414   : > { %v6206_v8 = vpop.f32.mrf.mxu1  ;;  %6245 = vmatmul.mubr.bf16.gmra.mxu0 %v7894_v23  ;;  %6293 = vmatmul.mubr.bf16.gmra.mxu1 %v7894_v23  ;;  %v2304_v36 = vadd.f32 %v6159_v11, %v8694_v50 }
 0x415   : > { %v2854_v2 = vadd.f32 %v2797_v52, %v2630_v62  ;;  %v2888_v60 = vmax.f32 %v2856_v54, 0.0  ;;  %v2295_v22 = vpop.f32.mrf.mxu0  ;;  %v2635_v25 = vadd.f32 %v6206_v8, %v2301_v40 }
 0x416   : > { %v2590_v49 = vpop.f32.mrf.mxu1  ;;  %v2296_v14 = vadd.f32 %v2295_v22, %v8695_v43 }
 0x417   : > { %v2886_v35 = vmax.f32 %v2854_v2, 0.0  ;;  %v2633_v19 = vadd.f32 %v2590_v49, %v2293_v21  ;;  %v2906_v28 = vpack.c.bf16 %v2888_v60, %v2887_v27  ;;  %v2859_v31 = vadd.f32 %v2822_v29, %v2635_v25 }
 0x418   : > { %v6207_v55 = vpop.f32.mrf.mxu1 }
 0x419   : > { %v2905_v37 = vpack.c.bf16 %v2886_v35, %v2885_v7  ;;  %v2636_v63 = vadd.f32 %v6207_v55, %v2304_v36  ;;  %v2857_v61 = vadd.f32 %v2812_v42, %v2633_v19  ;;  %v2891_v15 = vmax.f32 %v2859_v31, 0.0 }
 0x41a   : > { %v2593_v52 = vpop.f32.mrf.mxu1 }
 0x41b   : > { %v2860_v0 = vadd.f32 %v2827_v47, %v2636_v63  ;;  %v2634_v51 = vadd.f32 %v2593_v52, %v2296_v14  ;;  %6248 = vmatprep.mubr.bf16.mxu0 %v2905_v37  ;;  %6296 = vmatprep.mubr.bf16.mxu1 %v2905_v37  ;;  %v2889_v53 = vmax.f32 %v2857_v61, 0.0 }
 0x41c   : > { %6249 = vmatmul.mubr.bf16.gmra.mxu0 %v2906_v28  ;;  %6297 = vmatmul.mubr.bf16.gmra.mxu1 %v2906_v28 }
 0x41d   : > { %v2858_v30 = vadd.f32 %v2817_v3, %v2634_v51  ;;  %v2892_v12 = vmax.f32 %v2860_v0, 0.0 }
 0x41f   : > { %v2890_v45 = vmax.f32 %v2858_v30, 0.0  ;;  %v2908_v39 = vpack.c.bf16 %v2892_v12, %v2891_v15 }
 0x421   : > { %v2907_v46 = vpack.c.bf16 %v2890_v45, %v2889_v53 }
 0x423   : > { %6252 = vmatprep.mubr.bf16.mxu0 %v2907_v46  ;;  %6300 = vmatprep.mubr.bf16.mxu1 %v2907_v46 }
 0x424   : > { %6253 = vmatmul.mubr.bf16.gmra.mxu0 %v2908_v39  ;;  %6301 = vmatmul.mubr.bf16.gmra.mxu1 %v2908_v39 }
 0x425   : > { %6320 = vmatprep.mubr.bf16.mxu0 %v7756_v26  ;;  %6368 = vmatprep.mubr.bf16.mxu1 %v7756_v26  ;;  %v7931_v26 = vld [vmem:[%s8636_s9] sm:$0xff] }
 0x426   : > { %8696 = vst [vmem:[#allocation11_spill] sm:$0xff] %v7931_v26 }
 0x42c   : > { %6321 = vmatmul.mubr.bf16.vlgmr.msra.gmra.mxu0 %v7761_v34  ;;  %6369 = vmatmul.mubr.bf16.vlgmr.msra.gmra.mxu1 %v7761_v34  ;;  %v7936_v34 = vld [vmem:[%s8636_s9 + $0x20] sm:$0xff] }
 0x42d   : > { %6324 = vmatprep.mubr.bf16.mxu0 %v7791_v32  ;;  %6372 = vmatprep.mubr.bf16.mxu1 %v7791_v32  ;;  %8697 = vst [vmem:[#allocation12_spill] sm:$0xff] %v7936_v34  ;;  %v7941_v32 = vld [vmem:[%s8636_s9 + $0x8] sm:$0xff] }
 0x42e   : > { %8698 = vst [vmem:[#allocation13_spill] sm:$0xff] %v7941_v32 }
 0x434   : > { %6325 = vmatmul.mubr.bf16.gmra.mxu0 %v7794_v13  ;;  %6373 = vmatmul.mubr.bf16.gmra.mxu1 %v7794_v13  ;;  %v5436_v13 = vcombine.high %v7931_v26, %v7936_v34 }
 0x435   : > { %6328 = vmatprep.mubr.bf16.mxu0 %v7823_v58  ;;  %6376 = vmatprep.mubr.bf16.mxu1 %v7823_v58  ;;  %v7948_v58 = vld [vmem:[%s8636_s9 + $0x28] sm:$0xff] }
 0x436   : > { %8699 = vst [vmem:[#allocation14_spill] sm:$0xff] %v7948_v58 }
 0x43c   : > { %6329 = vmatmul.mubr.bf16.gmra.mxu0 %v7826_v10  ;;  %6377 = vmatmul.mubr.bf16.gmra.mxu1 %v7826_v10 }
 0x43d   : > { %6332 = vmatprep.mubr.bf16.mxu0 %v7855_v33  ;;  %6380 = vmatprep.mubr.bf16.mxu1 %v7855_v33 }
 0x444   : > { %6333 = vmatmul.mubr.bf16.gmra.mxu0 %v7858_v6  ;;  %6381 = vmatmul.mubr.bf16.gmra.mxu1 %v7858_v6  ;;  %v5438_v6 = vcombine.high %v7941_v32, %v7948_v58 }
 0x445   : > { %6336 = vmatprep.mubr.bf16.mxu0 %v7877_v4  ;;  %6384 = vmatprep.mubr.bf16.mxu1 %v7877_v4 }
 0x44c   : > { %6337 = vmatmul.mubr.bf16.gmra.mxu0 %v7880_v59  ;;  %6385 = vmatmul.mubr.bf16.gmra.mxu1 %v7880_v59 }
 0x44d   : > { %6340 = vmatprep.mubr.bf16.mxu0 %v7891_v16  ;;  %6388 = vmatprep.mubr.bf16.mxu1 %v7891_v16 }
 0x454   : > { %6341 = vmatmul.mubr.bf16.gmra.mxu0 %v7894_v23  ;;  %6389 = vmatmul.mubr.bf16.gmra.mxu1 %v7894_v23 }
 0x455   : > { %6344 = vmatprep.mubr.bf16.mxu0 %v2905_v37  ;;  %6392 = vmatprep.mubr.bf16.mxu1 %v2905_v37 }
 0x45c   : > { %6345 = vmatmul.mubr.bf16.gmra.mxu0 %v2906_v28  ;;  %6393 = vmatmul.mubr.bf16.gmra.mxu1 %v2906_v28 }
 0x45d   : > { %6348 = vmatprep.mubr.bf16.mxu0 %v2907_v46  ;;  %6396 = vmatprep.mubr.bf16.mxu1 %v2907_v46 }
 0x464   : > { %6349 = vmatmul.mubr.bf16.gmra.mxu0 %v2908_v39  ;;  %6397 = vmatmul.mubr.bf16.gmra.mxu1 %v2908_v39 }
 0x465   : > { %4388 = vmatprep.mubr.bf16.mxu0 %v5436_v13  ;;  %4485 = vmatprep.mubr.bf16.mxu1 %v5438_v6 }
 0x4ac   : > { %v7956_v4 = vpop.f32.mrf.mxu0  ;;  %v7958_v59 = vpop.f32.mrf.mxu1 }
 0x4ad   : > { %8700 = vst [vmem:[#allocation15_spill] sm:$0xff] %v7956_v4  ;;  %8701 = vst [vmem:[#allocation16_spill] sm:$0xff] %v7958_v59 }
 0x4ae   : > { %v7960_v24 = vpop.f32.mrf.mxu0  ;;  %v7962_v48 = vpop.f32.mrf.mxu1 }
 0x4af   : > { %8702 = vst [vmem:[#allocation17_spill] sm:$0xff] %v7960_v24  ;;  %8703 = vst [vmem:[#allocation18_spill] sm:$0xff] %v7962_v48 }
 0x4b0   : > { %v7964_v57 = vpop.f32.mrf.mxu0  ;;  %v7966_v9 = vpop.f32.mrf.mxu1 }
 0x4b1   : > { %8704 = vst [vmem:[#allocation19_spill] sm:$0xff] %v7964_v57  ;;  %8705 = vst [vmem:[#allocation20_spill] sm:$0xff] %v7966_v9 }
 0x4b2   : > { %v7972_v16 = vpop.f32.mrf.mxu0  ;;  %v7974_v1 = vpop.f32.mrf.mxu1 }
 0x4b3   : > { %8706 = vst [vmem:[#allocation21_spill] sm:$0xff] %v7972_v16  ;;  %8707 = vst [vmem:[#allocation22_spill] sm:$0xff] %v7974_v1 }
 0x4b4   : > { %v7976_v41 = vpop.f32.mrf.mxu0  ;;  %v7978_v44 = vpop.f32.mrf.mxu1 }
 0x4b6   : > { %v7980_v23 = vpop.f32.mrf.mxu0  ;;  %v7982_v17 = vpop.f32.mrf.mxu1 }
 0x4b8   : > { %v7984_v18 = vpop.f32.mrf.mxu0  ;;  %v7986_v54 = vpop.f32.mrf.mxu1 }
 0x4ba   : > { %v7992_v3 = vpop.f32.mrf.mxu0  ;;  %v7994_v38 = vpop.f32.mrf.mxu1 }
 0x4bc   : > { %v7996_v8 = vpop.f32.mrf.mxu0  ;;  %v7998_v42 = vpop.f32.mrf.mxu1 }
 0x4be   : > { %v8000_v21 = vpop.f32.mrf.mxu0  ;;  %v8002_v2 = vpop.f32.mrf.mxu1 }
 0x4c0   : > { %v8004_v5 = vpop.f32.mrf.mxu0  ;;  %v8006_v40 = vpop.f32.mrf.mxu1 }
 0x4c2   : > { %v8008_v60 = vpop.f32.mrf.mxu0  ;;  %v8010_v22 = vpop.f32.mrf.mxu1 }
 0x4c4   : > { %v6238_v49 = vpop.f32.mrf.mxu0  ;;  %v6286_v7 = vpop.f32.mrf.mxu1 }
 0x4c6   : > { %v3055_v35 = vpop.f32.mrf.mxu0  ;;  %v3281_v50 = vpop.f32.mrf.mxu1 }
 0x4c8   : > { %v6239_v36 = vpop.f32.mrf.mxu0  ;;  %v6287_v19 = vpop.f32.mrf.mxu1 }
 0x4c9   : > { %v3819_v1 = vpack.c.bf16 %v6239_v36, %v6238_v49  ;;  %v3835_v48 = vpack.c.bf16 %v6287_v19, %v6286_v7 }
 0x4ca   : > { %v3058_v27 = vpop.f32.mrf.mxu0  ;;  %v3284_v25 = vpop.f32.mrf.mxu1 }
 0x4cc   : > { %v8012_v55 = vpop.f32.mrf.mxu0  ;;  %v8014_v37 = vpop.f32.mrf.mxu1 }
 0x4ce   : > { %v8016_v43 = vpop.f32.mrf.mxu0  ;;  %v8018_v14 = vpop.f32.mrf.mxu1 }
 0x4cf   : > { %8708 = vst [vmem:[#allocation23_spill] sm:$0xff] %v8018_v14  ;;  %v3834_v14 = vpack.c.bf16 %v3284_v25, %v3281_v50 }
 0x4d0   : > { %v8020_v63 = vpop.f32.mrf.mxu0  ;;  %v8022_v47 = vpop.f32.mrf.mxu1 }
 0x4d2   : > { %v8024_v28 = vpop.f32.mrf.mxu0  ;;  %v8026_v52 = vpop.f32.mrf.mxu1 }
 0x4d3   : > { %8709 = vst [vmem:[#allocation24_spill] sm:$0xff] %v8026_v52  ;;  %v3818_v52 = vpack.c.bf16 %v3058_v27, %v3055_v35 }
 0x4d4   : > { %v8028_v29 = vpop.f32.mrf.mxu0  ;;  %v8030_v61 = vpop.f32.mrf.mxu1 }
 0x4d6   : > { %v8032_v0 = vpop.f32.mrf.mxu0  ;;  %v8034_v51 = vpop.f32.mrf.mxu1 }
 0x4d8   : > { %v8036_v31 = vpop.f32.mrf.mxu0  ;;  %v8038_v30 = vpop.f32.mrf.mxu1 }
 0x4da   : > { %v8040_v12 = vpop.f32.mrf.mxu0  ;;  %v8042_v53 = vpop.f32.mrf.mxu1 }
 0x4db   : > { %v3822_v27 = vpack.c.bf16 %v8040_v12, %v8032_v0  ;;  %v3838_v25 = vpack.c.bf16 %v8042_v53, %v8034_v51  ;;  %v8721_v0 = vpack.c.bf16 %v7986_v54, %v7978_v44  ;;  %v3814_v51 = vpack.c.bf16 %v7992_v3, %v7980_v23 }
 0x4dc   : > { %v6250_v45 = vpop.f32.mrf.mxu0  ;;  %v6298_v15 = vpop.f32.mrf.mxu1  ;;  %v3820_v3 = vpack.c.bf16 %v8024_v28, %v8016_v43  ;;  %v3888_v43 = vld [vmem:[%s8636_s9 + $0x60] sm:$0xff]  ;;  %v3885_v28 = vld [vmem:[%s8636_s9 + $0x48] sm:$0xff] }
 0x4de   : > { %v3103_v46 = vpop.f32.mrf.mxu0  ;;  %v3329_v39 = vpop.f32.mrf.mxu1 }
 0x4e0   : > { %v6251_v13 = vpop.f32.mrf.mxu0  ;;  %v6299_v6 = vpop.f32.mrf.mxu1 }
 0x4e2   : > { %v3106_v33 = vpop.f32.mrf.mxu0  ;;  %v3332_v10 = vpop.f32.mrf.mxu1 }
 0x4e4   : > { %v6254_v56 = vpop.f32.mrf.mxu0  ;;  %v6302_v20 = vpop.f32.mrf.mxu1 }
 0x4e6   : > { %v3119_v11 = vpop.f32.mrf.mxu0  ;;  %v3345_v62 = vpop.f32.mrf.mxu1 }
 0x4e8   : > { %v6255_v58 = vpop.f32.mrf.mxu0  ;;  %v6303_v32 = vpop.f32.mrf.mxu1 }
 0x4e9   : > { %v3827_v34 = vpack.c.bf16 %v6255_v58, %v6254_v56  ;;  %v3843_v26 = vpack.c.bf16 %v6303_v32, %v6302_v20  ;;  %v3825_v20 = vpack.c.bf16 %v6251_v13, %v6250_v45  ;;  %v3841_v56 = vpack.c.bf16 %v6299_v6, %v6298_v15  ;;  %v8725_v15 = vld [vmem:[#allocation15_spill] sm:$0xff]  ;;  %v8728_v13 = vld [vmem:[#allocation16_spill] sm:$0xff] }
 0x4ea   : > { %v3122_v16 = vpop.f32.mrf.mxu0  ;;  %v3348_v24 = vpop.f32.mrf.mxu1 }
 0x4eb   : > { %v3826_v59 = vpack.c.bf16 %v3122_v16, %v3119_v11  ;;  %v3842_v9 = vpack.c.bf16 %v3348_v24, %v3345_v62  ;;  %5715 = vmatprep.subr.bf16.mxu0 %v3827_v34  ;;  %5779 = vmatprep.subr.bf16.mxu1 %v3843_v26  ;;  %v3817_v24 = vpack.c.bf16 %v8004_v5, %v7996_v8 }
 0x4ec   : > { %v8044_v4 = vpop.f32.mrf.mxu0  ;;  %v8046_v57 = vpop.f32.mrf.mxu1  ;;  %5716 = vmatpush3.bf16.msra.mxu0 %v3819_v1  ;;  %5780 = vmatpush3.bf16.msra.mxu1 %v3835_v48  ;;  %v3833_v48 = vpack.c.bf16 %v8006_v40, %v7998_v42  ;;  %v3824_v62 = vpack.c.bf16 %v3106_v33, %v3103_v46  ;;  %v3840_v11 = vpack.c.bf16 %v3332_v10, %v3329_v39  ;;  %v8727_v39 = vld [vmem:[#allocation20_spill] sm:$0xff] }
 0x4ed   : > { %8710 = vst [vmem:[#allocation25_spill] sm:$0xff] %v8044_v4  ;;  %8711 = vst [vmem:[#allocation26_spill] sm:$0xff] %v8046_v57  ;;  %5717 = vmatprep.subr.bf16.mxu0 %v3826_v59  ;;  %5781 = vmatprep.subr.bf16.mxu1 %v3842_v9  ;;  %v3816_v8 = vpack.c.bf16 %v8008_v60, %v8000_v21  ;;  %v3832_v10 = vpack.c.bf16 %v8010_v22, %v8002_v2 }
 0x4ee   : > { %v8048_v58 = vpop.f32.mrf.mxu0  ;;  %v8050_v32 = vpop.f32.mrf.mxu1  ;;  %v3823_v5 = vpack.c.bf16 %v8036_v31, %v8028_v29  ;;  %v3839_v40 = vpack.c.bf16 %v8038_v30, %v8030_v61  ;;  %v8720_v31 = vpack.c.bf16 %v7984_v18, %v7976_v41  ;;  %v3830_v30 = vpack.c.bf16 %v7994_v38, %v7982_v17  ;;  %v8722_v38 = vld [vmem:[#allocation23_spill] sm:$0xff] }
 0x4ef   : > { %8712 = vst [vmem:[#allocation27_spill] sm:$0xff] %v8048_v58  ;;  %8713 = vst [vmem:[#allocation28_spill] sm:$0xff] %v8050_v32  ;;  %v3821_v41 = vpack.c.bf16 %v8020_v63, %v8012_v55  ;;  %v3837_v18 = vpack.c.bf16 %v8022_v47, %v8014_v37  ;;  %v8723_v55 = vld [vmem:[#allocation24_spill] sm:$0xff]  ;;  %v8724_v47 = vld [vmem:[#allocation19_spill] sm:$0xff]  ;;  %v8729_v6 = vpack.c.bf16 %v8727_v39, %v8728_v13 }
 0x4f0   : > { %v8052_v16 = vpop.f32.mrf.mxu0  ;;  %v8054_v34 = vpop.f32.mrf.mxu1  ;;  %5718 = vmatpush3.bf16.msra.mxu0 %v3818_v52  ;;  %5782 = vmatpush3.bf16.msra.mxu1 %v3834_v14  ;;  %v3836_v63 = vpack.c.bf16 %v8723_v55, %v8722_v38  ;;  %v8726_v46 = vpack.c.bf16 %v8724_v47, %v8725_v15  ;;  %v8737_v38 = vld [vmem:[#allocation13_spill] sm:$0xff]  ;;  %v8738_v55 = vld [vmem:[#allocation14_spill] sm:$0xff] }
 0x4f1   : > { %8714 = vst [vmem:[#allocation29_spill] sm:$0xff] %v8052_v16  ;;  %8715 = vst [vmem:[#allocation30_spill] sm:$0xff] %v8054_v34  ;;  %5719 = vmatprep.subr.bf16.mxu0 %v3825_v20  ;;  %5783 = vmatprep.subr.bf16.mxu1 %v3841_v56  ;;  %v3884_v20 = vld [vmem:[%s8636_s9 + $0x40] sm:$0xff]  ;;  %v3889_v56 = vld [vmem:[%s8636_s9 + $0x68] sm:$0xff] }
 0x4f2   : > { %v8064_v9 = vpop.f32.mrf.mxu0  ;;  %v8066_v1 = vpop.f32.mrf.mxu1  ;;  %v3896_v39 = vld [vmem:[%s8636_s9 + $0xa0] sm:$0xff]  ;;  %v3893_v13 = vld [vmem:[%s8636_s9 + $0x88] sm:$0xff] }
 0x4f3   : > { %8716 = vst [vmem:[#allocation31_spill] sm:$0xff] %v8064_v9  ;;  %8717 = vst [vmem:[#allocation32_spill] sm:$0xff] %v8066_v1 }
 0x4f4   : > { %v8072_v35 = vpop.f32.mrf.mxu0  ;;  %v8074_v50 = vpop.f32.mrf.mxu1  ;;  %5720 = vmatpush3.bf16.msra.mxu0 %v3817_v24  ;;  %5784 = vmatpush3.bf16.msra.mxu1 %v3833_v48  ;;  %v8730_v24 = vld [vmem:[#allocation17_spill] sm:$0xff] }
 0x4f5   : > { %5721 = vmatprep.subr.bf16.mxu0 %v3824_v62  ;;  %5785 = vmatprep.subr.bf16.mxu1 %v3840_v11  ;;  %v8731_v48 = vld [vmem:[#allocation21_spill] sm:$0xff]  ;;  %v8732_v11 = vld [vmem:[#allocation18_spill] sm:$0xff] }
 0x4f6   : > { %v8080_v33 = vpop.f32.mrf.mxu0  ;;  %v8082_v42 = vpop.f32.mrf.mxu1  ;;  %v3812_v62 = vpack.c.bf16 %v8731_v48, %v8730_v24 }
 0x4f7   : > { %8718 = vst [vmem:[#allocation33_spill] sm:$0xff] %v8082_v42 }
 0x4f8   : > { %v8088_v36 = vpop.f32.mrf.mxu0  ;;  %v8090_v19 = vpop.f32.mrf.mxu1  ;;  %5722 = vmatpush3.bf16.msra.mxu0 %v3816_v8  ;;  %5786 = vmatpush3.bf16.msra.mxu1 %v3832_v10  ;;  %v8733_v8 = vld [vmem:[#allocation22_spill] sm:$0xff] }
 0x4f9   : > { %5723 = vmatprep.subr.bf16.mxu0 %v3823_v5  ;;  %5787 = vmatprep.subr.bf16.mxu1 %v3839_v40  ;;  %v3828_v10 = vpack.c.bf16 %v8733_v8, %v8732_v11  ;;  %v5445_v11 = vcombine.low %v3885_v28, %v3889_v56 }
 0x4fa   : > { %v8096_v60 = vpop.f32.mrf.mxu0  ;;  %v8098_v22 = vpop.f32.mrf.mxu1 }
 0x4fb   : > { %8719 = vst [vmem:[#allocation34_spill] sm:$0xff] %v8098_v22 }
 0x4fc   : > { %v8108_v29 = vpop.f32.mrf.mxu0  ;;  %v8110_v61 = vpop.f32.mrf.mxu1  ;;  %5724 = vmatpush3.bf16.msra.mxu0 %v8720_v31  ;;  %5788 = vmatpush3.bf16.msra.mxu1 %v8721_v0  ;;  %v5444_v31 = vcombine.high %v3884_v20, %v3888_v43  ;;  %v5446_v0 = vcombine.high %v3885_v28, %v3889_v56  ;;  %v3901_v28 = vld [vmem:[%s8636_s9 + $0xc8] sm:$0xff] }
 0x4fd   : > { %5725 = vmatprep.subr.bf16.mxu0 %v3822_v27  ;;  %5789 = vmatprep.subr.bf16.mxu1 %v3838_v25  ;;  %v3905_v56 = vld [vmem:[%s8636_s9 + $0xe8] sm:$0xff] }
 0x4fe   : > { %v8122_v12 = vpop.f32.mrf.mxu0  ;;  %v8124_v53 = vpop.f32.mrf.mxu1  ;;  %v5462_v49 = vcombine.high %v3901_v28, %v3905_v56 }
 0x500   : > { %v8130_v44 = vpop.f32.mrf.mxu0  ;;  %v8132_v54 = vpop.f32.mrf.mxu1  ;;  %5726 = vmatpush3.bf16.msra.mxu0 %v3814_v51  ;;  %5790 = vmatpush3.bf16.msra.mxu1 %v3830_v30 }
 0x501   : > { %5727 = vmatprep.subr.bf16.mxu0 %v3821_v41  ;;  %5791 = vmatprep.subr.bf16.mxu1 %v3837_v18  ;;  %v8734_v41 = vld [vmem:[#allocation11_spill] sm:$0xff]  ;;  %v8735_v18 = vld [vmem:[#allocation12_spill] sm:$0xff] }
 0x502   : > { %v8134_v23 = vpop.f32.mrf.mxu0  ;;  %v8136_v17 = vpop.f32.mrf.mxu1 }
 0x504   : > { %v8142_v45 = vpop.f32.mrf.mxu0  ;;  %v8144_v37 = vpop.f32.mrf.mxu1  ;;  %5728 = vmatpush3.bf16.msra.mxu0 %v8726_v46  ;;  %5792 = vmatpush3.bf16.msra.mxu1 %v8729_v6  ;;  %v3892_v46 = vld [vmem:[%s8636_s9 + $0x80] sm:$0xff]  ;;  %v3897_v6 = vld [vmem:[%s8636_s9 + $0xa8] sm:$0xff] }
 0x505   : > { %5729 = vmatprep.subr.bf16.mxu0 %v3820_v3  ;;  %5793 = vmatprep.subr.bf16.mxu1 %v3836_v63  ;;  %v8736_v3 = vcombine.low %v8734_v41, %v8735_v18  ;;  %v8739_v63 = vcombine.low %v8737_v38, %v8738_v55 }
 0x506   : > { %v8168_v5 = vpop.f32.mrf.mxu0  ;;  %v8170_v40 = vpop.f32.mrf.mxu1 }
 0x508   : > { %v8172_v27 = vpop.f32.mrf.mxu0  ;;  %v8174_v25 = vpop.f32.mrf.mxu1  ;;  %5730 = vmatpush3.bf16.msra.mxu0 %v3812_v62  ;;  %5794 = vmatpush3.bf16.msra.mxu1 %v3828_v10  ;;  %v5443_v62 = vcombine.low %v3884_v20, %v3888_v43  ;;  %v3900_v20 = vld [vmem:[%s8636_s9 + $0xc0] sm:$0xff] }
 0x509   : > { %v3904_v43 = vld [vmem:[%s8636_s9 + $0xe0] sm:$0xff] }
 0x50a   : > { %v8176_v51 = vpop.f32.mrf.mxu0  ;;  %v8178_v30 = vpop.f32.mrf.mxu1  ;;  %v5460_v7 = vcombine.high %v3900_v20, %v3904_v43 }
 0x50b   : > { %4389 = vmatmul.mubr.bf16.vlgmr.msra.gmra.mxu0 %v8736_v3  ;;  %4486 = vmatmul.mubr.bf16.vlgmr.msra.gmra.mxu1 %v8739_v63 }
 0x50c   : > { %v8186_v47 = vpop.f32.mrf.mxu0  ;;  %v8188_v15 = vpop.f32.mrf.mxu1  ;;  %4396 = vmatprep.mubr.bf16.mxu0 %v5444_v31  ;;  %4493 = vmatprep.mubr.bf16.mxu1 %v5446_v0  ;;  %v5452_v31 = vcombine.high %v3892_v46, %v3896_v39  ;;  %v5454_v0 = vcombine.high %v3893_v13, %v3897_v6 }
 0x50e   : > { %v8202_v24 = vpop.f32.mrf.mxu0  ;;  %v8204_v48 = vpop.f32.mrf.mxu1 }
 0x50f   : > { %8740 = vst [vmem:[#allocation23_spill] sm:$0xff] %v8202_v24  ;;  %8741 = vst [vmem:[#allocation24_spill] sm:$0xff] %v8204_v48  ;;  %v3867_v24 = vpack.c.bf16 %v8174_v25, %v8144_v37  ;;  %v3850_v37 = vpack.c.bf16 %v8176_v51, %v8168_v5 }
 0x510   : > { %v8206_v8 = vpop.f32.mrf.mxu0  ;;  %v8208_v10 = vpop.f32.mrf.mxu1 }
 0x512   : > { %v8210_v41 = vpop.f32.mrf.mxu0  ;;  %v8212_v18 = vpop.f32.mrf.mxu1 }
 0x513   : > { %8742 = vst [vmem:[#allocation19_spill] sm:$0xff] %v8210_v41  ;;  %8743 = vst [vmem:[#allocation15_spill] sm:$0xff] %v8212_v18  ;;  %4397 = vmatmul.mubr.bf16.gmra.mxu0 %v5443_v62  ;;  %4494 = vmatmul.mubr.bf16.gmra.mxu1 %v5445_v11  ;;  %v5451_v62 = vcombine.low %v3892_v46, %v3896_v39  ;;  %v5453_v11 = vcombine.low %v3893_v13, %v3897_v6  ;;  %v3908_v46 = vld [vmem:[%s8636_s9 + $0x100] sm:$0xff]  ;;  %v3909_v13 = vld [vmem:[%s8636_s9 + $0x108] sm:$0xff] }
 0x514   : > { %v8214_v3 = vpop.f32.mrf.mxu0  ;;  %v8216_v38 = vpop.f32.mrf.mxu1  ;;  %4404 = vmatprep.mubr.bf16.mxu0 %v5452_v31  ;;  %4501 = vmatprep.mubr.bf16.mxu1 %v5454_v0  ;;  %v3912_v39 = vld [vmem:[%s8636_s9 + $0x120] sm:$0xff]  ;;  %v3913_v6 = vld [vmem:[%s8636_s9 + $0x128] sm:$0xff] }
 0x515   : > { %v5468_v32 = vcombine.high %v3908_v46, %v3912_v39  ;;  %v5470_v1 = vcombine.high %v3909_v13, %v3913_v6 }
 0x516   : > { %v8230_v55 = vpop.f32.mrf.mxu0  ;;  %v8232_v63 = vpop.f32.mrf.mxu1 }
 0x518   : > { %v8234_v31 = vpop.f32.mrf.mxu0  ;;  %v8236_v0 = vpop.f32.mrf.mxu1 }
 0x51a   : > { %v8238_v59 = vpop.f32.mrf.mxu0  ;;  %v8240_v26 = vpop.f32.mrf.mxu1 }
 0x51b   : > { %4405 = vmatmul.mubr.bf16.gmra.mxu0 %v5451_v62  ;;  %4502 = vmatmul.mubr.bf16.gmra.mxu1 %v5453_v11  ;;  %v5461_v11 = vcombine.low %v3901_v28, %v3905_v56  ;;  %v5469_v28 = vcombine.low %v3909_v13, %v3913_v6  ;;  %v3920_v56 = vld [vmem:[%s8636_s9 + $0x160] sm:$0xff] }
 0x51c   : > { %v8242_v52 = vpop.f32.mrf.mxu0  ;;  %v8244_v14 = vpop.f32.mrf.mxu1  ;;  %4412 = vmatprep.mubr.bf16.mxu0 %v5460_v7  ;;  %4509 = vmatprep.mubr.bf16.mxu1 %v5462_v49  ;;  %v5459_v49 = vcombine.low %v3900_v20, %v3904_v43  ;;  %v3916_v20 = vld [vmem:[%s8636_s9 + $0x140] sm:$0xff]  ;;  %v5467_v43 = vcombine.low %v3908_v46, %v3912_v39  ;;  %v3851_v46 = vpack.c.bf16 %v8172_v27, %v8142_v45  ;;  %v3925_v45 = vld [vmem:[%s8636_s9 + $0x188] sm:$0xff] }
 0x51d   : > { %v5476_v6 = vcombine.high %v3916_v20, %v3920_v56  ;;  %v3866_v27 = vpack.c.bf16 %v8178_v30, %v8170_v40  ;;  %v3871_v40 = vpack.c.bf16 %v8236_v0, %v8216_v38  ;;  %v8748_v0 = vld [vmem:[#allocation33_spill] sm:$0xff] }
 0x51e   : > { %v8258_v62 = vpop.f32.mrf.mxu0  ;;  %v8260_v7 = vpop.f32.mrf.mxu1 }
 0x520   : > { %v6347_v2 = vpop.f32.mrf.mxu0  ;;  %v6395_v21 = vpop.f32.mrf.mxu1 }
 0x522   : > { %v8262_v58 = vpop.f32.mrf.mxu0  ;;  %v8264_v9 = vpop.f32.mrf.mxu1 }
 0x523   : > { %4413 = vmatmul.mubr.bf16.gmra.mxu0 %v5459_v49  ;;  %4510 = vmatmul.mubr.bf16.gmra.mxu1 %v5461_v11  ;;  %v3917_v49 = vld [vmem:[%s8636_s9 + $0x148] sm:$0xff]  ;;  %v3856_v5 = vpack.c.bf16 %v8262_v58, %v8258_v62 }
 0x524   : > { %v6350_v57 = vpop.f32.mrf.mxu0  ;;  %v6398_v34 = vpop.f32.mrf.mxu1  ;;  %4420 = vmatprep.mubr.bf16.mxu0 %v5468_v32  ;;  %4517 = vmatprep.mubr.bf16.mxu1 %v5470_v1  ;;  %v3921_v32 = vld [vmem:[%s8636_s9 + $0x168] sm:$0xff] }
 0x525   : > { %v5478_v41 = vcombine.high %v3917_v49, %v3921_v32  ;;  %v5477_v25 = vcombine.low %v3917_v49, %v3921_v32  ;;  %v3937_v58 = vld [vmem:[%s8636_s9 + $0x1e8] sm:$0xff] }
 0x526   : > { %v3571_v4 = vpop.f32.mrf.mxu0  ;;  %v3797_v16 = vpop.f32.mrf.mxu1  ;;  %v8758_v49 = vld [vmem:[#allocation26_spill] sm:$0xff] }
 0x528   : > { %v6351_v1 = vpop.f32.mrf.mxu0  ;;  %v6399_v11 = vpop.f32.mrf.mxu1 }
 0x529   : > { %v3859_v18 = vpack.c.bf16 %v6351_v1, %v6350_v57  ;;  %v3875_v48 = vpack.c.bf16 %v6399_v11, %v6398_v34  ;;  %v3924_v57 = vld [vmem:[%s8636_s9 + $0x180] sm:$0xff]  ;;  %v3886_v1 = vld [vmem:[%s8636_s9 + $0x50] sm:$0xff] }
 0x52a   : > { %v3574_v39 = vpop.f32.mrf.mxu0  ;;  %v3800_v13 = vpop.f32.mrf.mxu1  ;;  %v3928_v34 = vld [vmem:[%s8636_s9 + $0x1a0] sm:$0xff]  ;;  %v3890_v11 = vld [vmem:[%s8636_s9 + $0x70] sm:$0xff] }
 0x52b   : > { %v3858_v42 = vpack.c.bf16 %v3574_v39, %v3571_v4  ;;  %v3874_v22 = vpack.c.bf16 %v3800_v13, %v3797_v16  ;;  %4421 = vmatmul.mubr.bf16.gmra.mxu0 %v5467_v43  ;;  %4518 = vmatmul.mubr.bf16.gmra.mxu1 %v5469_v28  ;;  %v3929_v4 = vld [vmem:[%s8636_s9 + $0x1a8] sm:$0xff]  ;;  %v5475_v16 = vcombine.low %v3916_v20, %v3920_v56  ;;  %v8755_v56 = vld [vmem:[#allocation25_spill] sm:$0xff] }
 0x52c   : > { %5843 = vmatprep.subr.bf16.mxu0 %v3859_v18  ;;  %5907 = vmatprep.subr.bf16.mxu1 %v3875_v48  ;;  %v3873_v48 = vpack.c.bf16 %v6395_v21, %v8244_v14  ;;  %v5484_v18 = vcombine.high %v3924_v57, %v3928_v34  ;;  %v5486_v43 = vcombine.high %v3925_v45, %v3929_v4  ;;  %v3936_v14 = vld [vmem:[%s8636_s9 + $0x1e0] sm:$0xff]  ;;  %v8751_v20 = vld [vmem:[#allocation19_spill] sm:$0xff]  ;;  %v3891_v39 = vld [vmem:[%s8636_s9 + $0x78] sm:$0xff] }
 0x52d   : > { %5844 = vmatpush3.bf16.msra.mxu0 %v3851_v46  ;;  %5908 = vmatpush3.bf16.msra.mxu1 %v3867_v24  ;;  %v3857_v24 = vpack.c.bf16 %v6347_v2, %v8242_v52  ;;  %v3872_v21 = vpack.c.bf16 %v8264_v9, %v8260_v7  ;;  %v3932_v2 = vld [vmem:[%s8636_s9 + $0x1c0] sm:$0xff]  ;;  %v3933_v52 = vld [vmem:[%s8636_s9 + $0x1c8] sm:$0xff]  ;;  %v3848_v9 = vpack.c.bf16 %v8134_v23, %v8122_v12  ;;  %v3878_v23 = vld [vmem:[%s8636_s9 + $0x10] sm:$0xff] }
 0x52e   : > { %5845 = vmatprep.subr.bf16.mxu0 %v3858_v42  ;;  %5909 = vmatprep.subr.bf16.mxu1 %v3874_v22  ;;  %v3849_v42 = vpack.c.bf16 %v8130_v44, %v8108_v29  ;;  %v3865_v22 = vpack.c.bf16 %v8132_v54, %v8110_v61  ;;  %v3864_v29 = vpack.c.bf16 %v8136_v17, %v8124_v53  ;;  %v8750_v7 = vld [vmem:[#allocation23_spill] sm:$0xff]  ;;  %v3887_v46 = vld [vmem:[%s8636_s9 + $0x58] sm:$0xff] }
 0x52f   : > { %4428 = vmatprep.mubr.bf16.mxu0 %v5476_v6  ;;  %4525 = vmatprep.mubr.bf16.mxu1 %v5478_v41  ;;  %v5483_v61 = vcombine.low %v3924_v57, %v3928_v34  ;;  %v5485_v44 = vcombine.low %v3925_v45, %v3929_v4  ;;  %v3855_v54 = vpack.c.bf16 %v8234_v31, %v8214_v3  ;;  %v3883_v3 = vld [vmem:[%s8636_s9 + $0x38] sm:$0xff]  ;;  %v8747_v31 = vld [vmem:[#allocation34_spill] sm:$0xff]  ;;  %v8753_v28 = vld [vmem:[#allocation15_spill] sm:$0xff] }
 0x530   : > { %v5492_v51 = vcombine.high %v3932_v2, %v3936_v14  ;;  %v5494_v30 = vcombine.high %v3933_v52, %v3937_v58  ;;  %v3854_v12 = vpack.c.bf16 %v8238_v59, %v8230_v55  ;;  %v3870_v53 = vpack.c.bf16 %v8240_v26, %v8232_v63  ;;  %v3882_v59 = vld [vmem:[%s8636_s9 + $0x30] sm:$0xff]  ;;  %v3879_v26 = vld [vmem:[%s8636_s9 + $0x18] sm:$0xff] }
 0x531   : > { %5846 = vmatpush3.bf16.msra.mxu0 %v3850_v37  ;;  %5910 = vmatpush3.bf16.msra.mxu1 %v3866_v27  ;;  %v8744_v17 = vpack.c.bf16 %v8088_v36, %v8072_v35  ;;  %v8745_v41 = vpack.c.bf16 %v8090_v19, %v8074_v50  ;;  %v5491_v35 = vcombine.low %v3932_v2, %v3936_v14  ;;  %v8760_v57 = vld [vmem:[#allocation31_spill] sm:$0xff]  ;;  %v8763_v4 = vld [vmem:[#allocation32_spill] sm:$0xff] }
 0x532   : > { %5847 = vmatprep.subr.bf16.mxu0 %v3857_v24  ;;  %5911 = vmatprep.subr.bf16.mxu1 %v3873_v48  ;;  %v5493_v36 = vcombine.low %v3933_v52, %v3937_v58  ;;  %v3853_v50 = vpack.c.bf16 %v8206_v8, %v8186_v47  ;;  %v3869_v19 = vpack.c.bf16 %v8208_v10, %v8188_v15  ;;  %v8752_v8 = vld [vmem:[#allocation24_spill] sm:$0xff]  ;;  %v8754_v10 = vld [vmem:[#allocation29_spill] sm:$0xff]  ;;  %v8761_v34 = vld [vmem:[#allocation27_spill] sm:$0xff] }
 0x533   : > { %4429 = vmatmul.mubr.bf16.gmra.mxu0 %v5475_v16  ;;  %4526 = vmatmul.mubr.bf16.gmra.mxu1 %v5477_v25  ;;  %v5440_v38 = vcombine.high %v3878_v23, %v3882_v59  ;;  %v5442_v55 = vcombine.high %v3879_v26, %v3883_v3  ;;  %v8746_v63 = vpack.c.bf16 %v8096_v60, %v8080_v33  ;;  %v8757_v60 = vld [vmem:[#allocation30_spill] sm:$0xff]  ;;  %v8764_v16 = vld [vmem:[#allocation28_spill] sm:$0xff] }
 0x534   : > { %4436 = vmatprep.mubr.bf16.mxu0 %v5484_v18  ;;  %4533 = vmatprep.mubr.bf16.mxu1 %v5486_v43  ;;  %v8749_v62 = vpack.c.bf16 %v8747_v31, %v8748_v0  ;;  %v3852_v47 = vpack.c.bf16 %v8751_v20, %v8750_v7  ;;  %v3868_v15 = vpack.c.bf16 %v8753_v28, %v8752_v8  ;;  %v3894_v24 = vld [vmem:[%s8636_s9 + $0x90] sm:$0xff]  ;;  %v3895_v18 = vld [vmem:[%s8636_s9 + $0x98] sm:$0xff] }
 0x535   : > { %5848 = vmatpush3.bf16.msra.mxu0 %v3849_v42  ;;  %5912 = vmatpush3.bf16.msra.mxu1 %v3865_v22  ;;  %v8756_v33 = vpack.c.bf16 %v8754_v10, %v8755_v56  ;;  %v8759_v32 = vpack.c.bf16 %v8757_v60, %v8758_v49  ;;  %v5439_v13 = vcombine.low %v3878_v23, %v3882_v59  ;;  %v3898_v48 = vld [vmem:[%s8636_s9 + $0xb0] sm:$0xff]  ;;  %v3899_v43 = vld [vmem:[%s8636_s9 + $0xb8] sm:$0xff] }
 0x536   : > { %5849 = vmatprep.subr.bf16.mxu0 %v3856_v5  ;;  %5913 = vmatprep.subr.bf16.mxu1 %v3872_v21  ;;  %v5441_v6 = vcombine.low %v3879_v26, %v3883_v3  ;;  %v8762_v45 = vpack.c.bf16 %v8760_v57, %v8761_v34  ;;  %v8765_v37 = vpack.c.bf16 %v8763_v4, %v8764_v16  ;;  %v3902_v2 = vld [vmem:[%s8636_s9 + $0xd0] sm:$0xff]  ;;  %v3903_v52 = vld [vmem:[%s8636_s9 + $0xd8] sm:$0xff] }
 0x537   : > { %v5448_v27 = vcombine.high %v3886_v1, %v3890_v11  ;;  %v5450_v25 = vcombine.high %v3887_v46, %v3891_v39  ;;  %v5447_v42 = vcombine.low %v3886_v1, %v3890_v11  ;;  %v5449_v22 = vcombine.low %v3887_v46, %v3891_v39  ;;  %v3906_v14 = vld [vmem:[%s8636_s9 + $0xf0] sm:$0xff]  ;;  %v3907_v58 = vld [vmem:[%s8636_s9 + $0xf8] sm:$0xff]  ;;  %v8460_v1 = vpop.permute.xlu1 %4028  ;;  %v8462_v11 = vpop.permute.xlu0 %4033 }
 0x538   : > { %v5456_v5 = vcombine.high %v3894_v24, %v3898_v48  ;;  %v5458_v21 = vcombine.high %v3895_v18, %v3899_v43  ;;  %v3922_v59 = vld [vmem:[%s8636_s9 + $0x170] sm:$0xff]  ;;  %v3919_v26 = vld [vmem:[%s8636_s9 + $0x158] sm:$0xff] }
 0x539   : > { %5850 = vmatpush3.bf16.msra.mxu0 %v3848_v9  ;;  %5914 = vmatpush3.bf16.msra.mxu1 %v3864_v29  ;;  %v5455_v9 = vcombine.low %v3894_v24, %v3898_v48  ;;  %v5457_v29 = vcombine.low %v3895_v18, %v3899_v43  ;;  %v3923_v3 = vld [vmem:[%s8636_s9 + $0x178] sm:$0xff]  ;;  %v3938_v8 = vld [vmem:[%s8636_s9 + $0x1f0] sm:$0xff] }
 0x53a   : > { %5851 = vmatprep.subr.bf16.mxu0 %v3855_v54  ;;  %5915 = vmatprep.subr.bf16.mxu1 %v3871_v40  ;;  %v3910_v54 = vld [vmem:[%s8636_s9 + $0x110] sm:$0xff]  ;;  %v3931_v31 = vld [vmem:[%s8636_s9 + $0x1b8] sm:$0xff] }
 0x53b   : > { %4437 = vmatmul.mubr.bf16.gmra.mxu0 %v5483_v61  ;;  %4534 = vmatmul.mubr.bf16.gmra.mxu1 %v5485_v44  ;;  %v5464_v61 = vcombine.high %v3902_v2, %v3906_v14  ;;  %v5466_v44 = vcombine.high %v3903_v52, %v3907_v58  ;;  %v3914_v40 = vld [vmem:[%s8636_s9 + $0x130] sm:$0xff]  ;;  %v3935_v28 = vld [vmem:[%s8636_s9 + $0x1d8] sm:$0xff]  ;;  %v8464_v46 = vpop.permute.xlu1 %4018  ;;  %v8466_v39 = vpop.permute.xlu0 %4023 }
 0x53c   : > { %4444 = vmatprep.mubr.bf16.mxu0 %v5492_v51  ;;  %4541 = vmatprep.mubr.bf16.mxu1 %v5494_v30  ;;  %v3911_v51 = vld [vmem:[%s8636_s9 + $0x118] sm:$0xff]  ;;  %v5472_v23 = vcombine.high %v3910_v54, %v3914_v40 }
 0x53d   : > { %5852 = vmatpush3.bf16.msra.mxu0 %v8744_v17  ;;  %5916 = vmatpush3.bf16.msra.mxu1 %v8745_v41  ;;  %v3915_v30 = vld [vmem:[%s8636_s9 + $0x138] sm:$0xff]  ;;  %v3918_v41 = vld [vmem:[%s8636_s9 + $0x150] sm:$0xff] }
 0x53e   : > { %5853 = vmatprep.subr.bf16.mxu0 %v3854_v12  ;;  %5917 = vmatprep.subr.bf16.mxu1 %v3870_v53  ;;  %v5463_v12 = vcombine.low %v3902_v2, %v3906_v14  ;;  %v5465_v53 = vcombine.low %v3903_v52, %v3907_v58  ;;  %v5474_v17 = vcombine.high %v3911_v51, %v3915_v30 }
 0x53f   : > { %v5479_v0 = vcombine.low %v3918_v41, %v3922_v59 }
 0x541   : > { %5854 = vmatpush3.bf16.msra.mxu0 %v8746_v63  ;;  %5918 = vmatpush3.bf16.msra.mxu1 %v8749_v62  ;;  %v3927_v63 = vld [vmem:[%s8636_s9 + $0x198] sm:$0xff]  ;;  %v5481_v62 = vcombine.low %v3919_v26, %v3923_v3 }
 0x542   : > { %5855 = vmatprep.subr.bf16.mxu0 %v3853_v50  ;;  %5919 = vmatprep.subr.bf16.mxu1 %v3869_v19  ;;  %v5480_v50 = vcombine.high %v3918_v41, %v3922_v59  ;;  %v5482_v19 = vcombine.high %v3919_v26, %v3923_v3  ;;  %v5490_v20 = vcombine.high %v3927_v63, %v3931_v31 }
 0x543   : > { %4445 = vmatmul.mubr.bf16.gmra.mxu0 %v5491_v35  ;;  %4542 = vmatmul.mubr.bf16.gmra.mxu1 %v5493_v36  ;;  %v5471_v35 = vcombine.low %v3910_v54, %v3914_v40  ;;  %v5473_v36 = vcombine.low %v3911_v51, %v3915_v30  ;;  %v5489_v56 = vcombine.low %v3927_v63, %v3931_v31 }
 0x544   : > { %4582 = vmatprep.mubr.bf16.mxu0 %v5440_v38  ;;  %4679 = vmatprep.mubr.bf16.mxu1 %v5442_v55  ;;  %v3926_v38 = vld [vmem:[%s8636_s9 + $0x190] sm:$0xff] }
 0x545   : > { %5856 = vmatpush3.bf16.msra.mxu0 %v8756_v33  ;;  %5920 = vmatpush3.bf16.msra.mxu1 %v8759_v32  ;;  %v3930_v55 = vld [vmem:[%s8636_s9 + $0x1b0] sm:$0xff] }
 0x546   : > { %5857 = vmatprep.subr.bf16.mxu0 %v3852_v47  ;;  %5921 = vmatprep.subr.bf16.mxu1 %v3868_v15  ;;  %v5488_v7 = vcombine.high %v3926_v38, %v3930_v55  ;;  %v3934_v47 = vld [vmem:[%s8636_s9 + $0x1d0] sm:$0xff]  ;;  %v3939_v15 = vld [vmem:[%s8636_s9 + $0x1f8] sm:$0xff]  ;;  %v5487_v10 = vcombine.low %v3926_v38, %v3930_v55 }
 0x547   : > { %v5496_v33 = vcombine.high %v3934_v47, %v3938_v8  ;;  %v5498_v60 = vcombine.high %v3935_v28, %v3939_v15  ;;  %v5495_v49 = vcombine.low %v3934_v47, %v3938_v8  ;;  %v5497_v32 = vcombine.low %v3935_v28, %v3939_v15 }
 0x549   : > { %5858 = vmatpush3.bf16.msra.mxu0 %v8762_v45  ;;  %5922 = vmatpush3.bf16.msra.mxu1 %v8765_v37 }
 0x54c   : > { %4583 = vmatmul.mubr.bf16.vlgmr.msra.gmra.mxu0 %v5439_v13  ;;  %4680 = vmatmul.mubr.bf16.vlgmr.msra.gmra.mxu1 %v5441_v6  ;;  %v8468_v13 = vpop.permute.xlu1 %4008  ;;  %v8470_v6 = vpop.permute.xlu0 %4013 }
 0x54d   : > { %4590 = vmatprep.mubr.bf16.mxu0 %v5448_v27  ;;  %4687 = vmatprep.mubr.bf16.mxu1 %v5450_v25 }
 0x550   : > { %v8472_v57 = vpop.permute.xlu1 %3998  ;;  %v8474_v34 = vpop.permute.xlu0 %4003 }
 0x554   : > { %4591 = vmatmul.mubr.bf16.gmra.mxu0 %v5447_v42  ;;  %4688 = vmatmul.mubr.bf16.gmra.mxu1 %v5449_v22  ;;  %v8476_v45 = vpop.permute.xlu1 %3988  ;;  %v8478_v4 = vpop.permute.xlu0 %3993 }
 0x555   : > { %4598 = vmatprep.mubr.bf16.mxu0 %v5456_v5  ;;  %4695 = vmatprep.mubr.bf16.mxu1 %v5458_v21 }
 0x558   : > { %v3979_v16 = vpop.permute.xlu1 %3978  ;;  %v3984_v37 = vpop.permute.xlu0 %3983 }
 0x55c   : > { %4599 = vmatmul.mubr.bf16.gmra.mxu0 %v5455_v9  ;;  %4696 = vmatmul.mubr.bf16.gmra.mxu1 %v5457_v29  ;;  %v3969_v27 = vpop.permute.xlu1 %3968  ;;  %v3974_v48 = vpop.permute.xlu0 %3973 }
 0x55d   : > { %4606 = vmatprep.mubr.bf16.mxu0 %v5464_v61  ;;  %4703 = vmatprep.mubr.bf16.mxu1 %v5466_v44 }
 0x560   : > { %v3959_v42 = vpop.permute.xlu1 %3958  ;;  %v3964_v9 = vpop.permute.xlu0 %3963 }
 0x564   : > { %4607 = vmatmul.mubr.bf16.gmra.mxu0 %v5463_v12  ;;  %4704 = vmatmul.mubr.bf16.gmra.mxu1 %v5465_v53 }
 0x565   : > { %4614 = vmatprep.mubr.bf16.mxu0 %v5472_v23  ;;  %4711 = vmatprep.mubr.bf16.mxu1 %v5474_v17 }
 0x56c   : > { %4615 = vmatmul.mubr.bf16.gmra.mxu0 %v5471_v35  ;;  %4712 = vmatmul.mubr.bf16.gmra.mxu1 %v5473_v36 }
 0x56d   : > { %4622 = vmatprep.mubr.bf16.mxu0 %v5480_v50  ;;  %4719 = vmatprep.mubr.bf16.mxu1 %v5482_v19 }
 0x574   : > { %4623 = vmatmul.mubr.bf16.gmra.mxu0 %v5479_v0  ;;  %4720 = vmatmul.mubr.bf16.gmra.mxu1 %v5481_v62 }
 0x575   : > { %4630 = vmatprep.mubr.bf16.mxu0 %v5488_v7  ;;  %4727 = vmatprep.mubr.bf16.mxu1 %v5490_v20 }
 0x57c   : > { %4631 = vmatmul.mubr.bf16.gmra.mxu0 %v5487_v10  ;;  %4728 = vmatmul.mubr.bf16.gmra.mxu1 %v5489_v56 }
 0x57d   : > { %4638 = vmatprep.mubr.bf16.mxu0 %v5496_v33  ;;  %4735 = vmatprep.mubr.bf16.mxu1 %v5498_v60 }
 0x584   : > { %4639 = vmatmul.mubr.bf16.gmra.mxu0 %v5495_v49  ;;  %4736 = vmatmul.mubr.bf16.gmra.mxu1 %v5497_v32 }
 0x5cb   : > { %v5731_v25 = vpop.f32.mrf.mxu0  ;;  %v5795_v24 = vpop.f32.mrf.mxu1 }
 0x5cd   : > { %v5732_v18 = vpop.f32.mrf.mxu0  ;;  %v5796_v43 = vpop.f32.mrf.mxu1 }
 0x5ce   : > { %v5733_v22 = vadd.f32 %v5732_v18, %v5731_v25  ;;  %v5797_v5 = vadd.f32 %v5796_v43, %v5795_v24 }
 0x5cf   : > { %v5734_v21 = vpop.f32.mrf.mxu0  ;;  %v5798_v2 = vpop.f32.mrf.mxu1 }
 0x5d0   : > { %v4391_v14 = vadd.f32 %v5733_v22, %v3959_v42 }
 0x5d1   : > { %v5735_v52 = vpop.f32.mrf.mxu0  ;;  %v5799_v58 = vpop.f32.mrf.mxu1 }
 0x5d2   : > { %v8480_v29 = vadd.f32 %v5797_v5, %v4391_v14  ;;  %v5736_v61 = vadd.f32 %v5735_v52, %v5734_v21  ;;  %v5800_v44 = vadd.f32 %v5799_v58, %v5798_v2 }
 0x5d3   : > { %v5737_v54 = vpop.f32.mrf.mxu0  ;;  %v5801_v40 = vpop.f32.mrf.mxu1 }
 0x5d4   : > { %v4394_v51 = vadd.f32 %v5736_v61, %v3964_v9 }
 0x5d5   : > { %v5738_v30 = vpop.f32.mrf.mxu0  ;;  %v5802_v12 = vpop.f32.mrf.mxu1 }
 0x5d6   : > { %v8482_v53 = vadd.f32 %v5800_v44, %v4394_v51  ;;  %v5739_v23 = vadd.f32 %v5738_v30, %v5737_v54  ;;  %v5803_v17 = vadd.f32 %v5802_v12, %v5801_v40 }
 0x5d7   : > { %v5740_v41 = vpop.f32.mrf.mxu0  ;;  %v5804_v59 = vpop.f32.mrf.mxu1 }
 0x5d8   : > { %v4399_v26 = vadd.f32 %v5739_v23, %v3969_v27 }
 0x5d9   : > { %v5741_v3 = vpop.f32.mrf.mxu0  ;;  %v5805_v35 = vpop.f32.mrf.mxu1 }
 0x5da   : > { %v8484_v36 = vadd.f32 %v5803_v17, %v4399_v26  ;;  %v5742_v50 = vadd.f32 %v5741_v3, %v5740_v41  ;;  %v5806_v19 = vadd.f32 %v5805_v35, %v5804_v59 }
 0x5db   : > { %v5743_v38 = vpop.f32.mrf.mxu0  ;;  %v5807_v55 = vpop.f32.mrf.mxu1 }
 0x5dc   : > { %v4402_v63 = vadd.f32 %v5742_v50, %v3974_v48 }
 0x5dd   : > { %v5744_v31 = vpop.f32.mrf.mxu0  ;;  %v5808_v0 = vpop.f32.mrf.mxu1 }
 0x5de   : > { %v8486_v62 = vadd.f32 %v5806_v19, %v4402_v63  ;;  %v5745_v7 = vadd.f32 %v5744_v31, %v5743_v38  ;;  %v5809_v20 = vadd.f32 %v5808_v0, %v5807_v55 }
 0x5df   : > { %v5746_v47 = vpop.f32.mrf.mxu0  ;;  %v5810_v8 = vpop.f32.mrf.mxu1 }
 0x5e0   : > { %v4407_v28 = vadd.f32 %v5745_v7, %v3979_v16 }
 0x5e1   : > { %v5747_v15 = vpop.f32.mrf.mxu0  ;;  %v5811_v10 = vpop.f32.mrf.mxu1 }
 0x5e2   : > { %v8488_v56 = vadd.f32 %v5809_v20, %v4407_v28  ;;  %v5748_v33 = vadd.f32 %v5747_v15, %v5746_v47  ;;  %v5812_v60 = vadd.f32 %v5811_v10, %v5810_v8 }
 0x5e3   : > { %v5749_v49 = vpop.f32.mrf.mxu0  ;;  %v5813_v32 = vpop.f32.mrf.mxu1 }
 0x5e4   : > { %v4410_v27 = vadd.f32 %v5748_v33, %v3984_v37 }
 0x5e5   : > { %v5750_v25 = vpop.f32.mrf.mxu0  ;;  %v5814_v24 = vpop.f32.mrf.mxu1 }
 0x5e6   : > { %v8490_v48 = vadd.f32 %v5812_v60, %v4410_v27  ;;  %v5751_v18 = vadd.f32 %v5750_v25, %v5749_v49  ;;  %v5815_v43 = vadd.f32 %v5814_v24, %v5813_v32 }
 0x5e7   : > { %v5752_v42 = vpop.f32.mrf.mxu0  ;;  %v5816_v22 = vpop.f32.mrf.mxu1 }
 0x5e8   : > { %v4415_v5 = vadd.f32 %v5751_v18, %v8476_v45 }
 0x5e9   : > { %v5753_v16 = vpop.f32.mrf.mxu0  ;;  %v5817_v21 = vpop.f32.mrf.mxu1 }
 0x5ea   : > { %v8493_v2 = vadd.f32 %v5815_v43, %v4415_v5  ;;  %v5754_v14 = vadd.f32 %v5753_v16, %v5752_v42  ;;  %v5818_v52 = vadd.f32 %v5817_v21, %v5816_v22 }
 0x5eb   : > { %v5755_v58 = vpop.f32.mrf.mxu0  ;;  %v5819_v9 = vpop.f32.mrf.mxu1 }
 0x5ec   : > { %v4418_v37 = vadd.f32 %v5754_v14, %v8478_v4  ;;  %v6611_v4 = vld [vmem:[%s8638_s11] sm:$0xff]  }
 0x5ed   : > { %v5756_v61 = vpop.f32.mrf.mxu0  ;;  %v5820_v44 = vpop.f32.mrf.mxu1  ;;  %6416 = vmatprep.mubr.bf16.mxu0 %v6611_v4 }
 0x5ee   : > { %v8496_v54 = vadd.f32 %v5818_v52, %v4418_v37  ;;  %v5757_v40 = vadd.f32 %v5756_v61, %v5755_v58  ;;  %v5821_v51 = vadd.f32 %v5820_v44, %v5819_v9 }
 0x5ef   : > { %v5758_v30 = vpop.f32.mrf.mxu0  ;;  %v5822_v12 = vpop.f32.mrf.mxu1 }
 0x5f0   : > { %v4423_v45 = vadd.f32 %v5757_v40, %v8472_v57 }
 0x5f1   : > { %v5759_v23 = vpop.f32.mrf.mxu0  ;;  %v5823_v17 = vpop.f32.mrf.mxu1 }
 0x5f2   : > { %v8499_v41 = vadd.f32 %v5821_v51, %v4423_v45  ;;  %v5760_v59 = vadd.f32 %v5759_v23, %v5758_v30  ;;  %v5824_v26 = vadd.f32 %v5823_v17, %v5822_v12 }
 0x5f3   : > { %v5761_v3 = vpop.f32.mrf.mxu0  ;;  %v5825_v35 = vpop.f32.mrf.mxu1 }
 0x5f4   : > { %v4426_v50 = vadd.f32 %v5760_v59, %v8474_v34 }
 0x5f5   : > { %v5762_v19 = vpop.f32.mrf.mxu0  ;;  %v5826_v38 = vpop.f32.mrf.mxu1 }
 0x5f6   : > { %v8505_v55 = vadd.f32 %v5824_v26, %v4426_v50  ;;  %v5763_v57 = vadd.f32 %v5762_v19, %v5761_v3  ;;  %v5827_v63 = vadd.f32 %v5826_v38, %v5825_v35 }
 0x5f7   : > { %v5764_v31 = vpop.f32.mrf.mxu0  ;;  %v5828_v0 = vpop.f32.mrf.mxu1 }
 0x5f8   : > { %v4431_v7 = vadd.f32 %v5763_v57, %v8468_v13 }
 0x5f9   : > { %v5765_v20 = vpop.f32.mrf.mxu0  ;;  %v5829_v47 = vpop.f32.mrf.mxu1 }
 0x5fa   : > { %v8508_v8 = vadd.f32 %v5827_v63, %v4431_v7  ;;  %v5766_v28 = vadd.f32 %v5765_v20, %v5764_v31  ;;  %v5830_v15 = vadd.f32 %v5829_v47, %v5828_v0 }
 0x5fb   : > { %v5767_v10 = vpop.f32.mrf.mxu0  ;;  %v5831_v33 = vpop.f32.mrf.mxu1 }
 0x5fc   : > { %v4434_v34 = vadd.f32 %v5766_v28, %v8470_v6 }
 0x5fd   : > { %v5768_v60 = vpop.f32.mrf.mxu0  ;;  %v5832_v49 = vpop.f32.mrf.mxu1 }
 0x5fe   : > { %v8511_v32 = vadd.f32 %v5830_v15, %v4434_v34  ;;  %v5769_v27 = vadd.f32 %v5768_v60, %v5767_v10  ;;  %v5833_v25 = vadd.f32 %v5832_v49, %v5831_v33 }
 0x5ff   : > { %v5770_v24 = vpop.f32.mrf.mxu0  ;;  %v5834_v18 = vpop.f32.mrf.mxu1 }
 0x600   : > { %v4439_v13 = vadd.f32 %v5769_v27, %v8464_v46 }
 0x601   : > { %v5771_v43 = vpop.f32.mrf.mxu0  ;;  %v5835_v42 = vpop.f32.mrf.mxu1 }
 0x602   : > { %v8514_v22 = vadd.f32 %v5833_v25, %v4439_v13  ;;  %v5772_v5 = vadd.f32 %v5771_v43, %v5770_v24  ;;  %v5836_v16 = vadd.f32 %v5835_v42, %v5834_v18 }
 0x603   : > { %v5773_v21 = vpop.f32.mrf.mxu0  ;;  %v5837_v14 = vpop.f32.mrf.mxu1 }
 0x604   : > { %v4442_v6 = vadd.f32 %v5772_v5, %v8466_v39 }
 0x605   : > { %v5774_v52 = vpop.f32.mrf.mxu0  ;;  %v5838_v58 = vpop.f32.mrf.mxu1 }
 0x606   : > { %v8517_v9 = vadd.f32 %v5836_v16, %v4442_v6  ;;  %v5775_v37 = vadd.f32 %v5774_v52, %v5773_v21  ;;  %v5839_v61 = vadd.f32 %v5838_v58, %v5837_v14 }
 0x607   : > { %v8519_v44 = vpop.f32.mrf.mxu0  ;;  %v8521_v40 = vpop.f32.mrf.mxu1 }
 0x608   : > { %v4447_v46 = vadd.f32 %v5775_v37, %v8460_v1 }
 0x609   : > { %v8524_v51 = vpop.f32.mrf.mxu0  ;;  %v8526_v30 = vpop.f32.mrf.mxu1 }
 0x60a   : > { %v8528_v12 = vadd.f32 %v5839_v61, %v4447_v46 }
 0x60c   : > { %v5859_v45 = vpop.f32.mrf.mxu0  ;;  %v5923_v39 = vpop.f32.mrf.mxu1 }
 0x60e   : > { %v5860_v23 = vpop.f32.mrf.mxu0  ;;  %v5924_v17 = vpop.f32.mrf.mxu1 }
 0x60f   : > { %v5861_v59 = vadd.f32 %v5860_v23, %v5859_v45  ;;  %v5925_v26 = vadd.f32 %v5924_v17, %v5923_v39 }
 0x610   : > { %v5862_v4 = vpop.f32.mrf.mxu0  ;;  %v5926_v3 = vpop.f32.mrf.mxu1 }
 0x611   : > { %v4585_v35 = vadd.f32 %v5861_v59, %v8480_v29 }
 0x612   : > { %v5863_v50 = vpop.f32.mrf.mxu0  ;;  %v5927_v19 = vpop.f32.mrf.mxu1 }
 0x613   : > { %v4682_v38 = vadd.f32 %v5925_v26, %v4585_v35  ;;  %v5864_v1 = vadd.f32 %v5863_v50, %v5862_v4  ;;  %v5928_v57 = vadd.f32 %v5927_v19, %v5926_v3 }
 0x614   : > { %v5865_v63 = vpop.f32.mrf.mxu0  ;;  %v5929_v31 = vpop.f32.mrf.mxu1 }
 0x615   : > { %v4588_v0 = vadd.f32 %v5864_v1, %v8482_v53  ;;  %v4744_v34 = vmax.f32 %v4682_v38, 0.0 }
 0x616   : > { %v5866_v7 = vpop.f32.mrf.mxu0  ;;  %v5930_v20 = vpop.f32.mrf.mxu1 }
 0x617   : > { %v4685_v47 = vadd.f32 %v5928_v57, %v4588_v0  ;;  %v5867_v28 = vadd.f32 %v5866_v7, %v5865_v63  ;;  %v5931_v15 = vadd.f32 %v5930_v20, %v5929_v31 }
 0x618   : > { %v5868_v10 = vpop.f32.mrf.mxu0  ;;  %v5932_v33 = vpop.f32.mrf.mxu1 }
 0x619   : > { %v4745_v60 = vmax.f32 %v4685_v47, 0.0  ;;  %v4593_v29 = vadd.f32 %v5867_v28, %v8484_v36 }
 0x61a   : > { %v5869_v49 = vpop.f32.mrf.mxu0  ;;  %v5933_v27 = vpop.f32.mrf.mxu1 }
 0x61b   : > { %v4690_v25 = vadd.f32 %v5931_v15, %v4593_v29  ;;  %v5870_v24 = vadd.f32 %v5869_v49, %v5868_v10  ;;  %v5934_v18 = vadd.f32 %v5933_v27, %v5932_v33  ;;  %v8533_v13 = vpack.c.bf16 %v4745_v60, %v4744_v34 }
 0x61c   : > { %v5871_v43 = vpop.f32.mrf.mxu0  ;;  %v5935_v53 = vpop.f32.mrf.mxu1 }
 0x61d   : > { %v4596_v42 = vadd.f32 %v5870_v24, %v8486_v62  ;;  %v4746_v58 = vmax.f32 %v4690_v25, 0.0 }
 0x61e   : > { %v5872_v5 = vpop.f32.mrf.mxu0  ;;  %v5936_v16 = vpop.f32.mrf.mxu1 }
 0x61f   : > { %v4693_v21 = vadd.f32 %v5934_v18, %v4596_v42  ;;  %v5873_v14 = vadd.f32 %v5872_v5, %v5871_v43  ;;  %v5937_v61 = vadd.f32 %v5936_v16, %v5935_v53 }
 0x620   : > { %v5874_v6 = vpop.f32.mrf.mxu0  ;;  %v5938_v52 = vpop.f32.mrf.mxu1 }
 0x621   : > { %v4747_v37 = vmax.f32 %v4693_v21, 0.0  ;;  %v4601_v36 = vadd.f32 %v5873_v14, %v8488_v56 }
 0x622   : > { %v5875_v46 = vpop.f32.mrf.mxu0  ;;  %v5939_v45 = vpop.f32.mrf.mxu1 }
 0x623   : > { %v4698_v39 = vadd.f32 %v5937_v61, %v4601_v36  ;;  %v5876_v23 = vadd.f32 %v5875_v46, %v5874_v6  ;;  %v8537_v17 = vpack.c.bf16 %v4747_v37, %v4746_v58  ;;  %v5940_v4 = vadd.f32 %v5939_v45, %v5938_v52 }
 0x624   : > { %v5877_v59 = vpop.f32.mrf.mxu0  ;;  %v5941_v26 = vpop.f32.mrf.mxu1 }
 0x625   : > { %v4604_v62 = vadd.f32 %v5876_v23, %v8490_v48  ;;  %v4748_v57 = vmax.f32 %v4698_v39, 0.0 }
 0x626   : > { %v5878_v3 = vpop.f32.mrf.mxu0  ;;  %v5942_v35 = vpop.f32.mrf.mxu1 }
 0x627   : > { %v4701_v50 = vadd.f32 %v5940_v4, %v4604_v62  ;;  %v5879_v19 = vadd.f32 %v5878_v3, %v5877_v59  ;;  %v5943_v7 = vadd.f32 %v5942_v35, %v5941_v26 }
 0x628   : > { %v5880_v38 = vpop.f32.mrf.mxu0  ;;  %v5944_v1 = vpop.f32.mrf.mxu1 }
 0x629   : > { %v4749_v56 = vmax.f32 %v4701_v50, 0.0  ;;  %v4609_v63 = vadd.f32 %v5879_v19, %v8493_v2 }
 0x62a   : > { %v5881_v31 = vpop.f32.mrf.mxu0  ;;  %v5945_v0 = vpop.f32.mrf.mxu1 }
 0x62b   : > { %v5882_v20 = vadd.f32 %v5881_v31, %v5880_v38  ;;  %v8541_v47 = vpack.c.bf16 %v4749_v56, %v4748_v57  ;;  %v4706_v48 = vadd.f32 %v5943_v7, %v4609_v63  ;;  %v5946_v33 = vadd.f32 %v5945_v0, %v5944_v1 }
 0x62c   : > { %v5883_v28 = vpop.f32.mrf.mxu0  ;;  %v5947_v15 = vpop.f32.mrf.mxu1 }
 0x62d   : > { %v4612_v10 = vadd.f32 %v5882_v20, %v8496_v54  ;;  %v4750_v24 = vmax.f32 %v4706_v48, 0.0  ;;  %v5778_v48 = vadd.f32 %v8524_v51, %v8519_v44  ;;  %v5842_v44 = vadd.f32 %v8526_v30, %v8521_v40  ;;  %v6612_v40 = vld [vmem:[%s8638_s11 + $0x8] sm:$0xff]   ;;  %v6613_v30 = vld [vmem:[%s8638_s11 + $0x10] sm:$0xff]  }
 0x62e   : > { %v5884_v34 = vpop.f32.mrf.mxu0  ;;  %v5948_v60 = vpop.f32.mrf.mxu1 }
 0x62f   : > { %v4709_v29 = vadd.f32 %v5946_v33, %v4612_v10  ;;  %v5885_v49 = vadd.f32 %v5884_v34, %v5883_v28  ;;  %v5949_v42 = vadd.f32 %v5948_v60, %v5947_v15 }
 0x630   : > { %v5886_v27 = vpop.f32.mrf.mxu0  ;;  %v5950_v25 = vpop.f32.mrf.mxu1 }
 0x631   : > { %v4751_v2 = vmax.f32 %v4709_v29, 0.0  ;;  %v4617_v18 = vadd.f32 %v5885_v49, %v8499_v41 }
 0x632   : > { %v5887_v43 = vpop.f32.mrf.mxu0  ;;  %v5951_v53 = vpop.f32.mrf.mxu1 }
 0x633   : > { %v5888_v5 = vadd.f32 %v5887_v43, %v5886_v27  ;;  %v8545_v16 = vpack.c.bf16 %v4751_v2, %v4750_v24  ;;  %v4714_v54 = vadd.f32 %v5949_v42, %v4617_v18  ;;  %v5952_v52 = vadd.f32 %v5951_v53, %v5950_v25 }
 0x634   : > { %v5889_v21 = vpop.f32.mrf.mxu0  ;;  %v5953_v14 = vpop.f32.mrf.mxu1  ;;  %v4450_v2 = vadd.f32 %v5778_v48, %v8462_v11 }
 0x635   : > { %v4620_v6 = vadd.f32 %v5888_v5, %v8505_v55  ;;  %v4752_v39 = vmax.f32 %v4714_v54, 0.0 }
 0x636   : > { %v5890_v58 = vpop.f32.mrf.mxu0  ;;  %v5954_v37 = vpop.f32.mrf.mxu1  ;;  %v4547_v54 = vadd.f32 %v5842_v44, %v4450_v2 }
 0x637   : > { %v4717_v36 = vadd.f32 %v5952_v52, %v4620_v6  ;;  %v5891_v61 = vadd.f32 %v5890_v58, %v5889_v21  ;;  %v5955_v62 = vadd.f32 %v5954_v37, %v5953_v14 }
 0x638   : > { %v5892_v46 = vpop.f32.mrf.mxu0  ;;  %v5956_v45 = vpop.f32.mrf.mxu1 }
 0x639   : > { %v4753_v41 = vmax.f32 %v4717_v36, 0.0  ;;  %v4625_v23 = vadd.f32 %v5891_v61, %v8508_v8 }
 0x63a   : > { %v5893_v59 = vpop.f32.mrf.mxu0  ;;  %v5957_v26 = vpop.f32.mrf.mxu1 }
 0x63b   : > { %v5894_v4 = vadd.f32 %v5893_v59, %v5892_v46  ;;  %v4772_v3 = vpack.c.bf16 %v4753_v41, %v4752_v39  ;;  %v4722_v19 = vadd.f32 %v5955_v62, %v4625_v23  ;;  %v5958_v38 = vadd.f32 %v5957_v26, %v5956_v45 }
 0x63c   : > { %v5895_v35 = vpop.f32.mrf.mxu0  ;;  %v5959_v50 = vpop.f32.mrf.mxu1 }
 0x63d   : > { %v4628_v55 = vadd.f32 %v5894_v4, %v8511_v32  ;;  %v4754_v7 = vmax.f32 %v4722_v19, 0.0 }
 0x63e   : > { %v5896_v1 = vpop.f32.mrf.mxu0  ;;  %v5960_v57 = vpop.f32.mrf.mxu1 }
 0x63f   : > { %v4725_v56 = vadd.f32 %v5958_v38, %v4628_v55  ;;  %v5897_v63 = vadd.f32 %v5896_v1, %v5895_v35  ;;  %v5961_v10 = vadd.f32 %v5960_v57, %v5959_v50 }
 0x640   : > { %v5898_v31 = vpop.f32.mrf.mxu0  ;;  %v5962_v0 = vpop.f32.mrf.mxu1 }
 0x641   : > { %v4755_v20 = vmax.f32 %v4725_v56, 0.0  ;;  %v4633_v8 = vadd.f32 %v5897_v63, %v8514_v22 }
 0x642   : > { %v5899_v28 = vpop.f32.mrf.mxu0  ;;  %v5963_v15 = vpop.f32.mrf.mxu1 }
 0x643   : > { %v5900_v33 = vadd.f32 %v5899_v28, %v5898_v31  ;;  %v4773_v34 = vpack.c.bf16 %v4755_v20, %v4754_v7  ;;  %v4730_v29 = vadd.f32 %v5961_v10, %v4633_v8  ;;  %v5964_v27 = vadd.f32 %v5963_v15, %v5962_v0 }
 0x644   : > { %v5901_v32 = vpop.f32.mrf.mxu0  ;;  %v5965_v60 = vpop.f32.mrf.mxu1 }
 0x645   : > { %v4636_v49 = vadd.f32 %v5900_v33, %v8517_v9  ;;  %v4756_v51 = vmax.f32 %v4730_v29, 0.0 }
 0x646   : > { %v5902_v25 = vpop.f32.mrf.mxu0  ;;  %v5966_v24 = vpop.f32.mrf.mxu1 }
 0x647   : > { %v4733_v18 = vadd.f32 %v5964_v27, %v4636_v49  ;;  %v5903_v22 = vadd.f32 %v5902_v25, %v5901_v32  ;;  %v5967_v9 = vadd.f32 %v5966_v24, %v5965_v60  ;;  %v6616_v25 = vld [vmem:[%s8640_s13 + $0x8] sm:$0xff]   ;;  %v6691_v24 = vmov 0.0  }
 0x648   : > { %v5904_v43 = vpop.f32.mrf.mxu0  ;;  %v5968_v53 = vpop.f32.mrf.mxu1  ;;  %5085 = vst [vmem:[%s540_s2] sm:$0x1] %v6691_v24 }
 0x649   : > { %v4757_v42 = vmax.f32 %v4733_v18, 0.0  ;;  %v4641_v5 = vadd.f32 %v5903_v22, %v8528_v12  ;;  %v6614_v12 = vld [vmem:[%s8638_s11 + $0x18] sm:$0xff]  }
 0x64a   : > { %v5905_v21 = vpop.f32.mrf.mxu0  ;;  %v5969_v14 = vpop.f32.mrf.mxu1 }
 0x64b   : > { %v5906_v6 = vadd.f32 %v5905_v21, %v5904_v43  ;;  %v4774_v52 = vpack.c.bf16 %v4757_v42, %v4756_v51  ;;  %v4738_v58 = vadd.f32 %v5967_v9, %v4641_v5  ;;  %v5970_v11 = vadd.f32 %v5969_v14, %v5968_v53 }
 0x64d   : > { %v4644_v37 = vadd.f32 %v5906_v6, %v4547_v54  ;;  %v4758_v61 = vmax.f32 %v4738_v58, 0.0 }
 0x64f   : > { %v4741_v36 = vadd.f32 %v5970_v11, %v4644_v37 }
 0x651   : > { %v4759_v46 = vmax.f32 %v4741_v36, 0.0  ;;  %v5022_v36 = vld [vmem:[%s8642_s15] sm:$0x1] }
 0x653   : > { %v4775_v45 = vpack.c.bf16 %v4759_v46, %v4758_v61  ;;  %v8766_v46 = vld [vmem:[#allocation10_spill] sm:$0xff] }
 0x655   : > { %6400 = vmatprep.subr.bf16.mxu0 %v4775_v45 }
 0x656   : > { %6401 = vmatpush3.bf16.msra.mxu0 %v4775_v45 }
 0x657   : > { %6402 = vmatprep.subr.bf16.mxu0 %v4774_v52 }
 0x65a   : > { %6403 = vmatpush3.bf16.msra.mxu0 %v4774_v52 }
 0x65b   : > { %6404 = vmatprep.subr.bf16.mxu0 %v4773_v34 }
 0x65e   : > { %6405 = vmatpush3.bf16.msra.mxu0 %v4773_v34 }
 0x65f   : > { %6406 = vmatprep.subr.bf16.mxu0 %v4772_v3 }
 0x662   : > { %6407 = vmatpush3.bf16.msra.mxu0 %v4772_v3 }
 0x663   : > { %6408 = vmatprep.subr.bf16.mxu0 %v8545_v16 }
 0x666   : > { %6409 = vmatpush3.bf16.msra.mxu0 %v8545_v16 }
 0x667   : > { %6410 = vmatprep.subr.bf16.mxu0 %v8541_v47 }
 0x66a   : > { %6411 = vmatpush3.bf16.msra.mxu0 %v8541_v47  ;;  %v4822_v47 = vpop.permute.xlu0 %4821 }
 0x66b   : > { %6412 = vmatprep.subr.bf16.mxu0 %v8537_v17 }
 0x66e   : > { %6413 = vmatpush3.bf16.msra.mxu0 %v8537_v17  ;;  %v6615_v17 = vld [vmem:[%s8640_s13] sm:$0xff]   ;;  %v4812_v23 = vpop.permute.xlu0 %4811 }
 0x66f   : > { %6414 = vmatprep.subr.bf16.mxu0 %v8533_v13 }
 0x672   : > { %6415 = vmatpush3.bf16.msra.mxu0 %v8533_v13  ;;  %v4817_v13 = vpop.permute.xlu1 %4816  ;;  %v4802_v35 = vpop.permute.xlu0 %4801 }
 0x675   : > { %6417 = vmatmul.mubr.bf16.vlgmr.msra.gmra.mxu0 %v6612_v40 }
 0x676   : > { %6420 = vmatprep.mubr.bf16.mxu0 %v6613_v30  ;;  %v4807_v26 = vpop.permute.xlu1 %4806  ;;  %v4792_v28 = vpop.permute.xlu0 %4791 }
 0x67a   : > { %v4797_v38 = vpop.permute.xlu1 %4796  ;;  %v4951_v18 = vpop.permute.xlu0 %4950 }
 0x67d   : > { %6421 = vmatmul.mubr.bf16.gmra.mxu0 %v6614_v12 }
 0x67e   : > { %6432 = vmatprep.mubr.msk.bf16.mxu0 %vm1007_vm0, %v6615_v17  ;;  %v4787_v33 = vpop.permute.xlu1 %4786  ;;  %v4941_v5 = vpop.permute.xlu0 %4940 }
 0x682   : > { %v4946_v2 = vpop.permute.xlu1 %4945 }
 0x686   : > { %v4936_v51 = vpop.permute.xlu1 %4935 }
 0x68a   : > { %v5029_v61 = vpop.permute.xlu1 %5028 }
 0x68b   : > { %v5034_v45 = vrot.slane %v5029_v61, %v8766_v46 }
 0x735   : > { %v6418_v16 = vpop.f32.mrf.mxu0 }
 0x736   : > { %v4891_v0 = vadd.f32 %v6418_v16, %v4797_v38 }
 0x737   : > { %v4882_v39 = vpop.f32.mrf.mxu0 }
 0x738   : > { %v4915_v34 = vmax.f32 %v4891_v0, 0.0  ;;  %v4883_v32 = vadd.f32 %v4882_v39, %v4787_v33 }
 0x739   : > { %v6419_v41 = vpop.f32.mrf.mxu0 }
 0x73a   : > { %v4894_v57 = vadd.f32 %v6419_v41, %v4802_v35  ;;  %v4913_v49 = vmax.f32 %v4883_v32, 0.0 }
 0x73b   : > { %v4885_v59 = vpop.f32.mrf.mxu0 }
 0x73c   : > { %v4916_v15 = vmax.f32 %v4894_v57, 0.0  ;;  %v4886_v48 = vadd.f32 %v4885_v59, %v4792_v28 }
 0x73d   : > { %v6422_v62 = vpop.f32.mrf.mxu0 }
 0x73e   : > { %v4907_v3 = vadd.f32 %v6422_v62, %v4817_v13  ;;  %v4926_v60 = vpack.c.bf16 %v4916_v15, %v4915_v34  ;;  %v4914_v29 = vmax.f32 %v4886_v48, 0.0 }
 0x73f   : > { %v4898_v4 = vpop.f32.mrf.mxu0 }
 0x740   : > { %v4899_v19 = vadd.f32 %v4898_v4, %v4807_v26  ;;  %v4919_v56 = vmax.f32 %v4907_v3, 0.0  ;;  %v4925_v27 = vpack.c.bf16 %v4914_v29, %v4913_v49 }
 0x741   : > { %v6423_v50 = vpop.f32.mrf.mxu0 }
 0x742   : > { %v4910_v55 = vadd.f32 %v6423_v50, %v4822_v47  ;;  %v4917_v7 = vmax.f32 %v4899_v19, 0.0 }
 0x743   : > { %v4901_v1 = vpop.f32.mrf.mxu0 }
 0x744   : > { %v4920_v63 = vmax.f32 %v4910_v55, 0.0  ;;  %v4902_v31 = vadd.f32 %v4901_v1, %v4812_v23 }
 0x746   : > { %v4928_v20 = vpack.c.bf16 %v4920_v63, %v4919_v56  ;;  %v4918_v8 = vmax.f32 %v4902_v31, 0.0 }
 0x748   : > { %v4927_v10 = vpack.c.bf16 %v4918_v8, %v4917_v7  ;;  %6424 = vmatprep.subr.bf16.mxu0 %v4928_v20 }
 0x749   : > { %6425 = vmatpush3.bf16.msra.mxu0 %v4928_v20 }
 0x74a   : > { %6426 = vmatprep.subr.bf16.mxu0 %v4927_v10 }
 0x74d   : > { %6427 = vmatpush3.bf16.msra.mxu0 %v4927_v10 }
 0x74e   : > { %6428 = vmatprep.subr.bf16.mxu0 %v4926_v60 }
 0x751   : > { %6429 = vmatpush3.bf16.msra.mxu0 %v4926_v60 }
 0x752   : > { %6430 = vmatprep.subr.bf16.mxu0 %v4925_v27 }
 0x755   : > { %6431 = vmatpush3.bf16.msra.mxu0 %v4925_v27 }
 0x756   : > { %6436 = vmatprep.subr.bf16.mxu0 %v6691_v24 }
 0x758   : > { %6433 = vmatmul.mubr.msk.bf16.vlgmr.msra.gmra.mxu0 %vm1007_vm0, %v6616_v25 }
 0x759   : > { %6440 = vmatprep.mubr.msk.bf16.mxu0 %vm6692_vm1, %v6691_v24 }
 0x818   : > { %v6434_v22 = vpop.f32.mrf.mxu0 }
 0x819   : > { %v5012_v53 = vadd.f32 %v6434_v22, %v4946_v2 }
 0x81a   : > { %v5003_v43 = vpop.f32.mrf.mxu0 }
 0x81b   : > { %v5020_v14 = vmax.f32 %v5012_v53, 0.0  ;;  %v5004_v54 = vadd.f32 %v5003_v43, %v4936_v51 }
 0x81c   : > { %v6435_v44 = vpop.f32.mrf.mxu0 }
 0x81d   : > { %v5015_v42 = vadd.f32 %v6435_v44, %v4951_v18  ;;  %v5018_v37 = vmax.f32 %v5004_v54, 0.0 }
 0x81e   : > { %v5006_v21 = vpop.f32.mrf.mxu0 }
 0x81f   : > { %v5021_v9 = vmax.f32 %v5015_v42, 0.0  ;;  %v5007_v6 = vadd.f32 %v5006_v21, %v4941_v5 }
 0x821   : > { %v5024_v52 = vpack.c.bf16 %v5021_v9, %v5020_v14  ;;  %v5019_v58 = vmax.f32 %v5007_v6, 0.0 }
 0x823   : > { %6437 = vmatpush3.bf16.msra.mxu0 %v5024_v52  ;;  %v5023_v11 = vpack.c.bf16 %v5019_v58, %v5018_v37 }
 0x824   : > { %6438 = vmatprep.subr.bf16.mxu0 %v6691_v24 }
 0x827   : > { %6439 = vmatpush3.bf16.msra.mxu0 %v5023_v11 }
 0x82a   : > { %6441 = vmatmul.mubr.msk.bf16.vlgmr.msra.gmra.mxu0 %vm5035_vm2, %v5022_v36 }
 0x8ea   : > { %v5073_v40 = vpop.f32.mrf.mxu0 }
 0x8eb   : > { %v5074_v30 = vadd.f32 %v5073_v40, %v5034_v45 }
 0x8ec   : > { %v6442_v12 = vpop.f32.mrf.mxu0 }
 0x8ed   : > { %v5079_v17 = vsub.f32 0.0, %v5074_v30 }
 0x8ee   : > { %v5076_v47 = vpop.f32.mrf.mxu0 }
 0x8ef   : > { %v5080_v16 = vmul.f32 1.442695, %v5079_v17 }
 0x8f0   : > { %v6443_v13 = vpop.f32.mrf.mxu0 }
 0x8f1   : > { %6617 = vpow2.f32 %v5080_v16 }
 0x8fe   : > { %v6618_v39 = vpop.eup %6617 }
 0x8ff   : > { %v5082_v41 = vadd.f32 1.0, %v6618_v39 }
 0x901   : > { %6619 = vrcp.f32 %v5082_v41 }
 0x90e   : > { %v6620_v23 = vpop.eup %6619 }
 0x90f   : > { %5087 = vst.msk [vmem:[%s540_s2] sm:$0x1] %vm5086_vm3, %v6620_v23 }
 0x910   : > { %6636 = shalt.err (!%p6633_p3)
}
 0x911   : > { %s6637_s28 = scalar_lea.hbm %s8592_s21, 16  ;;  %s6641_s25 = scalar_lea.hbm %s8644_s17, 32 }
 0x912   : > { %p6638_p4 = scmp.ne.s32.totalorder %s8592_s21, %s6637_s28  ;;  %p6642_p9 = scmp.lt.s32.totalorder %s8592_s21, %s8644_s17 }
 0x913   : > { %p6643_p10 = scmp.lt.s32.totalorder %s6641_s25, %s6637_s28 }
 0x914   : > { %p6639_p7 = pnand %p6638_p4, %p6825_p5 }
 0x915   : > { %p6644_p11 = por %p6643_p10, %p6642_p9 }
 0x916   : > { %p6640_p8 = pneg %p6639_p7 }
 0x918   : > { %p6645_p12 = pnand %p6644_p11, %p6640_p8 }
 0x91a   : > { %6648 = shalt.err (!%p6645_p12)
}
 0x91b   : > { %6444 = dma.vmem_to_hbm [thread:$0]  (%p6825_p5), %s5102_s0, 16, %s8592_s21, %s5089_s30  }
 0x91c PF: > { %p6450_p13 = scmp.ge.s32.totalorder %s6683_s29, 2  ;;  %s5113_s22 = sand.u32 1, %s6671_s26  }
 0x91d   : > { %s5114_s24 = scalar_lea.sflag [#allocation4], %s5113_s22 }
 0x91e   : > { %p6447_p0 = pnand %p6450_p13, %p6829_p6 }
 0x920   : > { %p6448_p1 = pneg %p6447_p0 }
 0x922   : > { %6666 = dma.done.wait (%p6448_p1), %s5114_s24, 16  }
 0x923   : > { %6668 = vsyncadd (%p6448_p1), %s5114_s24, 4294967280  ;;  %s8768_s29 = sld [smem:[#allocation7_spill]]  ;;  %s8771_s26 = smov %s6675_s27 }
 0x924   : > { %s8769_s16 = sld [smem:[#allocation6_spill]] }
 0x925   : > { %s8770_s28 = sld [smem:[#allocation8_spill]] }
 0x929   : > { %p29_p2 = scmp.ge.s32.totalorder %s8768_s29, 4  }
 0x92a   : > { %s8772_s27 = smov %s8769_s16 }
 0x92b   :  { %31 = sbr.rel (!%p29_p2) target bundleno = 8 (0x8), region = 130 }
 0x930   :  { %5118 = vsyncpa [#allocation4], 1 }
 0x931   :  { %5120 = vsyncpa [#allocation4 + $0x1], 1 }

</bundles_post_ra>
